<compile_context>
chip_gen: v6e
topology: v6e:2x2x1
jax: 0.10.0
libtpu: 0.0.40
codegen_flags: <defaults>
</compile_context>

<pallas_src>
import functools

import jax
import jax.numpy as jnp
import numpy as np
from jax.experimental import pallas as pl
from jax.experimental.pallas import tpu as pltpu

# ---- model hyper-parameters (small, consistent with the module's forward) ----
NO_LAYERS = 2          # module: no_layers = 2
EMBED_DIM = 64         # module: nn.RNN(input_size=64, ...)
HIDDEN_DIM = 256       # module: hidden_dim = 256
OUTPUT_DIM = 1
VOCAB_SIZE = 50
BATCH = 2
SEQ = 8
LANE = 128             # lane-dense width for the padded FC output


def _rnn_kernel(proj_ref,    # (T, B, H) f32   precomputed layer-0 input path
                whh0_ref,    # (H, H)    bf16  layer-0 recurrent weight (transposed)
                b1_ref,      # (1, H)    f32   b_ih1 + b_hh1
                wih1_hbm,    # (H, H)    bf16  layer-1 input weight  (HBM, manual DMA)
                whh1_hbm,    # (H, H)    bf16  layer-1 recurrent wt. (HBM, manual DMA)
                wfc_hbm,     # (H, 128)  bf16  fc weight, lane-padded (HBM, manual DMA)
                bfc_ref,     # (1, 128)  f32   fc bias, lane-padded
                out_ref,     # (B, 128)  f32   sigmoid(fc); column 0 is the answer
                wih1_vmem,   # scratch (H, H)   bf16
                whh1_vmem,   # scratch (H, H)   bf16
                wfc_vmem,    # scratch (H, 128) bf16
                dma_sems,    # scratch DMA semaphores (3,)
                *, seq_len, batch, hidden):
    # Kick off HBM->VMEM copies of the late-use weights so they overlap the
    # early recurrence compute instead of serializing in the prologue DMA.
    cp_wih1 = pltpu.make_async_copy(wih1_hbm, wih1_vmem, dma_sems.at[0])
    cp_whh1 = pltpu.make_async_copy(whh1_hbm, whh1_vmem, dma_sems.at[1])
    cp_wfc = pltpu.make_async_copy(wfc_hbm, wfc_vmem, dma_sems.at[2])
    cp_wih1.start()
    cp_whh1.start()
    cp_wfc.start()

    # Hoisted bias load + broadcast (JAX does not CSE broadcast_in_dim across
    # the unrolled steps).
    b1 = jnp.broadcast_to(b1_ref[...], (batch, hidden))

    # h-state lives in values (vregs) for the whole recurrence: no VMEM
    # store/load round trips on the serial critical path.
    h1 = jnp.zeros((batch, hidden), jnp.float32)
    h2 = jnp.zeros((batch, hidden), jnp.float32)

    for t in range(seq_len):                 # fully unrolled, static indices
        x_h = proj_ref[t]                    # (B, H) f32, aligned leading-dim read
        if t == 0:
            # h1_prev == h2_prev == 0: skip the two recurrent dots.
            h1 = jnp.maximum(x_h, 0.0)
            cp_wih1.wait()                   # first use of wih1 is right here
            h2 = jnp.maximum(
                jnp.dot(h1.astype(jnp.bfloat16), wih1_vmem[...],
                        preferred_element_type=jnp.float32) + b1, 0.0)
            cp_whh1.wait()                   # whh1 first needed from t == 1 on
        else:
            h1 = jnp.maximum(
                x_h + jnp.dot(h1.astype(jnp.bfloat16), whh0_ref[...],
                              preferred_element_type=jnp.float32), 0.0)
            h2 = jnp.maximum(
                jnp.dot(h1.astype(jnp.bfloat16), wih1_vmem[...],
                        preferred_element_type=jnp.float32)
                + jnp.dot(h2.astype(jnp.bfloat16), whh1_vmem[...],
                          preferred_element_type=jnp.float32)
                + b1, 0.0)

    # Final timestep: fc(out[:, -1]) then sigmoid, written lane-dense (padded).
    cp_wfc.wait()                            # hidden behind the whole recurrence
    logits = (jnp.dot(h2.astype(jnp.bfloat16), wfc_vmem[...],
                      preferred_element_type=jnp.float32) + bfc_ref[...])
    out_ref[...] = jax.nn.sigmoid(logits)


@jax.jit
def rnn_forward(tokens, kparams):
    """tokens: int32 (B, T). Returns sigmoid output (B, 1) float32."""
    B, T = tokens.shape
    H = HIDDEN_DIM

    # Single row gather of the precomputed (V, H) layer-0 projection table,
    # time-major so the kernel reads aligned (B, H) slabs via a leading index.
    proj = jnp.take(kparams["proj_table"], tokens.T, axis=0)       # (T, B, H) f32

    kernel = functools.partial(_rnn_kernel, seq_len=T, batch=B, hidden=H)

    out_padded = pl.pallas_call(
        kernel,
        out_shape=jax.ShapeDtypeStruct((B, LANE), jnp.float32),
        in_specs=[
            pl.BlockSpec(memory_space=pltpu.MemorySpace.VMEM),   # proj
            pl.BlockSpec(memory_space=pltpu.MemorySpace.VMEM),   # whh0
            pl.BlockSpec(memory_space=pltpu.MemorySpace.VMEM),   # b1
            pl.BlockSpec(memory_space=pl.ANY),                   # wih1 (manual DMA)
            pl.BlockSpec(memory_space=pl.ANY),                   # whh1 (manual DMA)
            pl.BlockSpec(memory_space=pl.ANY),                   # wfc  (manual DMA)
            pl.BlockSpec(memory_space=pltpu.MemorySpace.VMEM),   # bfc
        ],
        out_specs=pl.BlockSpec(memory_space=pltpu.MemorySpace.VMEM),
        scratch_shapes=[
            pltpu.VMEM((H, H), jnp.bfloat16),      # wih1 landing buffer
            pltpu.VMEM((H, H), jnp.bfloat16),      # whh1 landing buffer
            pltpu.VMEM((H, LANE), jnp.bfloat16),   # wfc  landing buffer
            pltpu.SemaphoreType.DMA((3,)),
        ],
    )(proj, kparams["whh0"], kparams["b1"], kparams["wih1"],
      kparams["whh1"], kparams["wfc_pad"], kparams["bfc_pad"])

    return out_padded[:, :OUTPUT_DIM]


def init_params(key):
    """f32 parameters matching the PyTorch module's shapes (weights pre-transposed
    so the math is x @ W, like nn.RNN computes x @ W_ih^T with W_ih of shape (H, in))."""
    ks = jax.random.split(key, 12)
    E, H, V, O = EMBED_DIM, HIDDEN_DIM, VOCAB_SIZE, OUTPUT_DIM
    s = 1.0 / np.sqrt(H)
    u = lambda k, shape: jax.random.uniform(k, shape, jnp.float32, -s, s)
    return {
        "embedding": jax.random.normal(ks[0], (V, E), jnp.float32),
        "wih0_t": u(ks[1], (E, H)),
        "whh0_t": u(ks[2], (H, H)),
        "bih0":   u(ks[3], (H,)),
        "bhh0":   u(ks[4], (H,)),
        "wih1_t": u(ks[5], (H, H)),
        "whh1_t": u(ks[6], (H, H)),
        "bih1":   u(ks[7], (H,)),
        "bhh1":   u(ks[8], (H,)),
        "wfc_t":  u(ks[9], (H, O)),
        "bfc":    u(ks[10], (O,)),
    }


def pack_params(p):
    """Kernel-side packing: precomputed f32 layer-0 projection table, bf16
    recurrent/FC weights, pre-summed layer-1 bias, lane-padded FC."""
    H, O = HIDDEN_DIM, OUTPUT_DIM
    # proj_table[v] = embedding[v] @ Wih0^T + b_ih0 + b_hh0   (f32, ~51 KiB)
    proj_table = p["embedding"] @ p["wih0_t"] + (p["bih0"] + p["bhh0"])
    wfc_pad = jnp.zeros((H, LANE), jnp.float32).at[:, :O].set(p["wfc_t"])
    bfc_pad = jnp.zeros((1, LANE), jnp.float32).at[0, :O].set(p["bfc"])
    return {
        "proj_table": proj_table.astype(jnp.float32),
        "whh0": p["whh0_t"].astype(jnp.bfloat16),
        "wih1": p["wih1_t"].astype(jnp.bfloat16),
        "whh1": p["whh1_t"].astype(jnp.bfloat16),
        "b1": (p["bih1"] + p["bhh1"]).reshape(1, H).astype(jnp.float32),
        "wfc_pad": wfc_pad.astype(jnp.bfloat16),
        "bfc_pad": bfc_pad,
    }


def rnn_reference_f32(tokens, p):
    """Pure-f32 JAX reference reproducing the PyTorch module forward exactly."""
    embeds = jnp.take(p["embedding"], tokens, axis=0)    # (B, T, E)
    B = tokens.shape[0]
    h1 = jnp.zeros((B, HIDDEN_DIM), jnp.float32)
    h2 = jnp.zeros((B, HIDDEN_DIM), jnp.float32)

    def step(carry, x_t):
        h1, h2 = carry
        h1 = jax.nn.relu(x_t @ p["wih0_t"] + p["bih0"] + h1 @ p["whh0_t"] + p["bhh0"])
        h2 = jax.nn.relu(h1 @ p["wih1_t"] + p["bih1"] + h2 @ p["whh1_t"] + p["bhh1"])
        return (h1, h2), None

    (h1, h2), _ = jax.lax.scan(step, (h1, h2), jnp.transpose(embeds, (1, 0, 2)))
    return jax.nn.sigmoid(h2 @ p["wfc_t"] + p["bfc"])


def rnn_reference_bf16(tokens, kp):
    """Mirror of the kernel math (f32 projection table gather, bf16 weights /
    bf16 h casts before the recurrent dots, f32 accumulation)."""
    B, T = tokens.shape
    H = HIDDEN_DIM
    proj = jnp.take(kp["proj_table"], tokens.T, axis=0)  # (T, B, H) f32
    h1 = jnp.zeros((B, H), jnp.float32)
    h2 = jnp.zeros((B, H), jnp.float32)
    for t in range(T):
        h1 = jnp.maximum(
            proj[t] + jnp.dot(h1.astype(jnp.bfloat16), kp["whh0"],
                              preferred_element_type=jnp.float32), 0.0)
        h2 = jnp.maximum(
            jnp.dot(h1.astype(jnp.bfloat16), kp["wih1"],
                    preferred_element_type=jnp.float32)
            + jnp.dot(h2.astype(jnp.bfloat16), kp["whh1"],
                      preferred_element_type=jnp.float32)
            + kp["b1"], 0.0)
    logits = (jnp.dot(h2.astype(jnp.bfloat16), kp["wfc_pad"],
                      preferred_element_type=jnp.float32) + kp["bfc_pad"])
    return jax.nn.sigmoid(logits)[:, :OUTPUT_DIM]


if __name__ == "__main__":
    key = jax.random.PRNGKey(0)
    k_tok, k_par = jax.random.split(key)
    tokens = jax.random.randint(k_tok, (BATCH, SEQ), 0, VOCAB_SIZE, dtype=jnp.int32)

    params_f32 = init_params(k_par)
    kparams = pack_params(params_f32)

    out = jax.block_until_ready(rnn_forward(tokens, kparams))

    # Tight check against the bf16-mirror reference (same math as the kernel).
    ref_bf16 = jax.block_until_ready(rnn_reference_bf16(tokens, kparams))
    np.testing.assert_allclose(np.asarray(out), np.asarray(ref_bf16),
                               rtol=1e-3, atol=2e-3)

    # Loose check against the pure-f32 PyTorch-semantics reference
    # (bf16 recurrent weights introduce small, bounded deviation over 8 steps).
    ref_f32 = jax.block_until_ready(rnn_reference_f32(tokens, params_f32))
    np.testing.assert_allclose(np.asarray(out), np.asarray(ref_f32),
                               rtol=0.0, atol=5e-2)

    print("KERNEL_OK")
</pallas_src>

<mosaic_0001>
module attributes {stable_mosaic.version = 11 : i64} {
  func.func @_rnn_kernel(%arg0: memref<8x2x256xf32, #tpu.memory_space<vmem>>, %arg1: memref<256x256xbf16, #tpu.memory_space<vmem>>, %arg2: memref<1x256xf32, #tpu.memory_space<vmem>>, %arg3: memref<256x256xbf16, #tpu.memory_space<any>>, %arg4: memref<256x256xbf16, #tpu.memory_space<any>>, %arg5: memref<256x128xbf16, #tpu.memory_space<any>>, %arg6: memref<1x128xf32, #tpu.memory_space<vmem>>, %arg7: memref<2x128xf32, #tpu.memory_space<vmem>>, %arg8: memref<256x256xbf16, #tpu.memory_space<vmem>>, %arg9: memref<256x256xbf16, #tpu.memory_space<vmem>>, %arg10: memref<256x128xbf16, #tpu.memory_space<vmem>>, %arg11: memref<3x!tpu.dma_semaphore, #tpu.memory_space<semaphore_mem>>) attributes {dimension_semantics = [], scalar_prefetch = 0 : i64, scratch_operands = 4 : i64, tpu.core_type = #tpu.core_type<tc>} {
    %c0_i32 = arith.constant 0 : i32
    %0 = tpu.memref_slice %arg11[%c0_i32] : memref<3x!tpu.dma_semaphore, #tpu.memory_space<semaphore_mem>> -> memref<1x!tpu.dma_semaphore, #tpu.memory_space<semaphore_mem>>
    %1 = tpu.memref_squeeze %0 : memref<1x!tpu.dma_semaphore, #tpu.memory_space<semaphore_mem>> -> memref<!tpu.dma_semaphore, #tpu.memory_space<semaphore_mem>>
    tpu.enqueue_dma source(%arg3 : memref<256x256xbf16, #tpu.memory_space<any>>) target(%arg8 : memref<256x256xbf16, #tpu.memory_space<vmem>>) target_semaphore(%1 : memref<!tpu.dma_semaphore, #tpu.memory_space<semaphore_mem>>)
    %c1_i32 = arith.constant 1 : i32
    %2 = tpu.memref_slice %arg11[%c1_i32] : memref<3x!tpu.dma_semaphore, #tpu.memory_space<semaphore_mem>> -> memref<1x!tpu.dma_semaphore, #tpu.memory_space<semaphore_mem>>
    %3 = tpu.memref_squeeze %2 : memref<1x!tpu.dma_semaphore, #tpu.memory_space<semaphore_mem>> -> memref<!tpu.dma_semaphore, #tpu.memory_space<semaphore_mem>>
    tpu.enqueue_dma source(%arg4 : memref<256x256xbf16, #tpu.memory_space<any>>) target(%arg9 : memref<256x256xbf16, #tpu.memory_space<vmem>>) target_semaphore(%3 : memref<!tpu.dma_semaphore, #tpu.memory_space<semaphore_mem>>)
    %c2_i32 = arith.constant 2 : i32
    %4 = tpu.memref_slice %arg11[%c2_i32] : memref<3x!tpu.dma_semaphore, #tpu.memory_space<semaphore_mem>> -> memref<1x!tpu.dma_semaphore, #tpu.memory_space<semaphore_mem>>
    %5 = tpu.memref_squeeze %4 : memref<1x!tpu.dma_semaphore, #tpu.memory_space<semaphore_mem>> -> memref<!tpu.dma_semaphore, #tpu.memory_space<semaphore_mem>>
    tpu.enqueue_dma source(%arg5 : memref<256x128xbf16, #tpu.memory_space<any>>) target(%arg10 : memref<256x128xbf16, #tpu.memory_space<vmem>>) target_semaphore(%5 : memref<!tpu.dma_semaphore, #tpu.memory_space<semaphore_mem>>)
    %c0 = arith.constant 0 : index
    %c0_0 = arith.constant 0 : index
    %6 = vector.load %arg2[%c0, %c0_0] : memref<1x256xf32, #tpu.memory_space<vmem>>, vector<1x256xf32>
    %7 = vector.shape_cast %6 : vector<1x256xf32> to vector<1x256xf32>
    %8 = vector.broadcast %7 : vector<1x256xf32> to vector<2x256xf32>
    %c0_1 = arith.constant 0 : index
    %c0_2 = arith.constant 0 : index
    %c0_3 = arith.constant 0 : index
    %9 = vector.load %arg0[%c0_1, %c0_2, %c0_3] : memref<8x2x256xf32, #tpu.memory_space<vmem>>, vector<1x2x256xf32>
    %10 = vector.shape_cast %9 : vector<1x2x256xf32> to vector<2x256xf32>
    %cst = arith.constant 0.000000e+00 : f32
    %11 = vector.broadcast %cst : f32 to vector<2x256xf32>
    %12 = arith.maximumf %10, %11 : vector<2x256xf32>
    %c0_i32_4 = arith.constant 0 : i32
    %13 = tpu.memref_slice %arg11[%c0_i32_4] : memref<3x!tpu.dma_semaphore, #tpu.memory_space<semaphore_mem>> -> memref<1x!tpu.dma_semaphore, #tpu.memory_space<semaphore_mem>>
    %14 = tpu.memref_squeeze %13 : memref<1x!tpu.dma_semaphore, #tpu.memory_space<semaphore_mem>> -> memref<!tpu.dma_semaphore, #tpu.memory_space<semaphore_mem>>
    tpu.wait_dma2 semaphore(%14 : memref<!tpu.dma_semaphore, #tpu.memory_space<semaphore_mem>>) src(%arg3 : memref<256x256xbf16, #tpu.memory_space<any>>) dst(%arg8 : memref<256x256xbf16, #tpu.memory_space<vmem>>)
    %15 = arith.truncf %12 : vector<2x256xf32> to vector<2x256xbf16>
    %c0_5 = arith.constant 0 : index
    %c0_6 = arith.constant 0 : index
    %16 = vector.load %arg8[%c0_5, %c0_6] : memref<256x256xbf16, #tpu.memory_space<vmem>>, vector<256x256xbf16>
    %cst_7 = arith.constant dense<0.000000e+00> : vector<2x256xf32>
    %17 = tpu.matmul %15, %16, %cst_7 {dimension_numbers = #tpu.dot_dimension_numbers<[1], [0], [0], [1], [0, 0, 1, 1], [], []>} : vector<2x256xbf16>, vector<256x256xbf16>, vector<2x256xf32> -> vector<2x256xf32>
    %18 = arith.addf %17, %8 : vector<2x256xf32>
    %cst_8 = arith.constant 0.000000e+00 : f32
    %19 = vector.broadcast %cst_8 : f32 to vector<2x256xf32>
    %20 = arith.maximumf %18, %19 : vector<2x256xf32>
    %c1_i32_9 = arith.constant 1 : i32
    %21 = tpu.memref_slice %arg11[%c1_i32_9] : memref<3x!tpu.dma_semaphore, #tpu.memory_space<semaphore_mem>> -> memref<1x!tpu.dma_semaphore, #tpu.memory_space<semaphore_mem>>
    %22 = tpu.memref_squeeze %21 : memref<1x!tpu.dma_semaphore, #tpu.memory_space<semaphore_mem>> -> memref<!tpu.dma_semaphore, #tpu.memory_space<semaphore_mem>>
    tpu.wait_dma2 semaphore(%22 : memref<!tpu.dma_semaphore, #tpu.memory_space<semaphore_mem>>) src(%arg4 : memref<256x256xbf16, #tpu.memory_space<any>>) dst(%arg9 : memref<256x256xbf16, #tpu.memory_space<vmem>>)
    %c1 = arith.constant 1 : index
    %c0_10 = arith.constant 0 : index
    %c0_11 = arith.constant 0 : index
    %23 = vector.load %arg0[%c1, %c0_10, %c0_11] : memref<8x2x256xf32, #tpu.memory_space<vmem>>, vector<1x2x256xf32>
    %24 = vector.shape_cast %23 : vector<1x2x256xf32> to vector<2x256xf32>
    %25 = arith.truncf %12 : vector<2x256xf32> to vector<2x256xbf16>
    %c0_12 = arith.constant 0 : index
    %c0_13 = arith.constant 0 : index
    %26 = vector.load %arg1[%c0_12, %c0_13] : memref<256x256xbf16, #tpu.memory_space<vmem>>, vector<256x256xbf16>
    %cst_14 = arith.constant dense<0.000000e+00> : vector<2x256xf32>
    %27 = tpu.matmul %25, %26, %cst_14 {dimension_numbers = #tpu.dot_dimension_numbers<[1], [0], [0], [1], [0, 0, 1, 1], [], []>} : vector<2x256xbf16>, vector<256x256xbf16>, vector<2x256xf32> -> vector<2x256xf32>
    %28 = arith.addf %24, %27 : vector<2x256xf32>
    %cst_15 = arith.constant 0.000000e+00 : f32
    %29 = vector.broadcast %cst_15 : f32 to vector<2x256xf32>
    %30 = arith.maximumf %28, %29 : vector<2x256xf32>
    %31 = arith.truncf %30 : vector<2x256xf32> to vector<2x256xbf16>
    %c0_16 = arith.constant 0 : index
    %c0_17 = arith.constant 0 : index
    %32 = vector.load %arg8[%c0_16, %c0_17] : memref<256x256xbf16, #tpu.memory_space<vmem>>, vector<256x256xbf16>
    %cst_18 = arith.constant dense<0.000000e+00> : vector<2x256xf32>
    %33 = tpu.matmul %31, %32, %cst_18 {dimension_numbers = #tpu.dot_dimension_numbers<[1], [0], [0], [1], [0, 0, 1, 1], [], []>} : vector<2x256xbf16>, vector<256x256xbf16>, vector<2x256xf32> -> vector<2x256xf32>
    %34 = arith.truncf %20 : vector<2x256xf32> to vector<2x256xbf16>
    %c0_19 = arith.constant 0 : index
    %c0_20 = arith.constant 0 : index
    %35 = vector.load %arg9[%c0_19, %c0_20] : memref<256x256xbf16, #tpu.memory_space<vmem>>, vector<256x256xbf16>
    %cst_21 = arith.constant dense<0.000000e+00> : vector<2x256xf32>
    %36 = tpu.matmul %34, %35, %cst_21 {dimension_numbers = #tpu.dot_dimension_numbers<[1], [0], [0], [1], [0, 0, 1, 1], [], []>} : vector<2x256xbf16>, vector<256x256xbf16>, vector<2x256xf32> -> vector<2x256xf32>
    %37 = arith.addf %33, %36 : vector<2x256xf32>
    %38 = arith.addf %37, %8 : vector<2x256xf32>
    %cst_22 = arith.constant 0.000000e+00 : f32
    %39 = vector.broadcast %cst_22 : f32 to vector<2x256xf32>
    %40 = arith.maximumf %38, %39 : vector<2x256xf32>
    %c2 = arith.constant 2 : index
    %c0_23 = arith.constant 0 : index
    %c0_24 = arith.constant 0 : index
    %41 = vector.load %arg0[%c2, %c0_23, %c0_24] : memref<8x2x256xf32, #tpu.memory_space<vmem>>, vector<1x2x256xf32>
    %42 = vector.shape_cast %41 : vector<1x2x256xf32> to vector<2x256xf32>
    %43 = arith.truncf %30 : vector<2x256xf32> to vector<2x256xbf16>
    %c0_25 = arith.constant 0 : index
    %c0_26 = arith.constant 0 : index
    %44 = vector.load %arg1[%c0_25, %c0_26] : memref<256x256xbf16, #tpu.memory_space<vmem>>, vector<256x256xbf16>
    %cst_27 = arith.constant dense<0.000000e+00> : vector<2x256xf32>
    %45 = tpu.matmul %43, %44, %cst_27 {dimension_numbers = #tpu.dot_dimension_numbers<[1], [0], [0], [1], [0, 0, 1, 1], [], []>} : vector<2x256xbf16>, vector<256x256xbf16>, vector<2x256xf32> -> vector<2x256xf32>
    %46 = arith.addf %42, %45 : vector<2x256xf32>
    %cst_28 = arith.constant 0.000000e+00 : f32
    %47 = vector.broadcast %cst_28 : f32 to vector<2x256xf32>
    %48 = arith.maximumf %46, %47 : vector<2x256xf32>
    %49 = arith.truncf %48 : vector<2x256xf32> to vector<2x256xbf16>
    %c0_29 = arith.constant 0 : index
    %c0_30 = arith.constant 0 : index
    %50 = vector.load %arg8[%c0_29, %c0_30] : memref<256x256xbf16, #tpu.memory_space<vmem>>, vector<256x256xbf16>
    %cst_31 = arith.constant dense<0.000000e+00> : vector<2x256xf32>
    %51 = tpu.matmul %49, %50, %cst_31 {dimension_numbers = #tpu.dot_dimension_numbers<[1], [0], [0], [1], [0, 0, 1, 1], [], []>} : vector<2x256xbf16>, vector<256x256xbf16>, vector<2x256xf32> -> vector<2x256xf32>
    %52 = arith.truncf %40 : vector<2x256xf32> to vector<2x256xbf16>
    %c0_32 = arith.constant 0 : index
    %c0_33 = arith.constant 0 : index
    %53 = vector.load %arg9[%c0_32, %c0_33] : memref<256x256xbf16, #tpu.memory_space<vmem>>, vector<256x256xbf16>
    %cst_34 = arith.constant dense<0.000000e+00> : vector<2x256xf32>
    %54 = tpu.matmul %52, %53, %cst_34 {dimension_numbers = #tpu.dot_dimension_numbers<[1], [0], [0], [1], [0, 0, 1, 1], [], []>} : vector<2x256xbf16>, vector<256x256xbf16>, vector<2x256xf32> -> vector<2x256xf32>
    %55 = arith.addf %51, %54 : vector<2x256xf32>
    %56 = arith.addf %55, %8 : vector<2x256xf32>
    %cst_35 = arith.constant 0.000000e+00 : f32
    %57 = vector.broadcast %cst_35 : f32 to vector<2x256xf32>
    %58 = arith.maximumf %56, %57 : vector<2x256xf32>
    %c3 = arith.constant 3 : index
    %c0_36 = arith.constant 0 : index
    %c0_37 = arith.constant 0 : index
    %59 = vector.load %arg0[%c3, %c0_36, %c0_37] : memref<8x2x256xf32, #tpu.memory_space<vmem>>, vector<1x2x256xf32>
    %60 = vector.shape_cast %59 : vector<1x2x256xf32> to vector<2x256xf32>
    %61 = arith.truncf %48 : vector<2x256xf32> to vector<2x256xbf16>
    %c0_38 = arith.constant 0 : index
    %c0_39 = arith.constant 0 : index
    %62 = vector.load %arg1[%c0_38, %c0_39] : memref<256x256xbf16, #tpu.memory_space<vmem>>, vector<256x256xbf16>
    %cst_40 = arith.constant dense<0.000000e+00> : vector<2x256xf32>
    %63 = tpu.matmul %61, %62, %cst_40 {dimension_numbers = #tpu.dot_dimension_numbers<[1], [0], [0], [1], [0, 0, 1, 1], [], []>} : vector<2x256xbf16>, vector<256x256xbf16>, vector<2x256xf32> -> vector<2x256xf32>
    %64 = arith.addf %60, %63 : vector<2x256xf32>
    %cst_41 = arith.constant 0.000000e+00 : f32
    %65 = vector.broadcast %cst_41 : f32 to vector<2x256xf32>
    %66 = arith.maximumf %64, %65 : vector<2x256xf32>
    %67 = arith.truncf %66 : vector<2x256xf32> to vector<2x256xbf16>
    %c0_42 = arith.constant 0 : index
    %c0_43 = arith.constant 0 : index
    %68 = vector.load %arg8[%c0_42, %c0_43] : memref<256x256xbf16, #tpu.memory_space<vmem>>, vector<256x256xbf16>
    %cst_44 = arith.constant dense<0.000000e+00> : vector<2x256xf32>
    %69 = tpu.matmul %67, %68, %cst_44 {dimension_numbers = #tpu.dot_dimension_numbers<[1], [0], [0], [1], [0, 0, 1, 1], [], []>} : vector<2x256xbf16>, vector<256x256xbf16>, vector<2x256xf32> -> vector<2x256xf32>
    %70 = arith.truncf %58 : vector<2x256xf32> to vector<2x256xbf16>
    %c0_45 = arith.constant 0 : index
    %c0_46 = arith.constant 0 : index
    %71 = vector.load %arg9[%c0_45, %c0_46] : memref<256x256xbf16, #tpu.memory_space<vmem>>, vector<256x256xbf16>
    %cst_47 = arith.constant dense<0.000000e+00> : vector<2x256xf32>
    %72 = tpu.matmul %70, %71, %cst_47 {dimension_numbers = #tpu.dot_dimension_numbers<[1], [0], [0], [1], [0, 0, 1, 1], [], []>} : vector<2x256xbf16>, vector<256x256xbf16>, vector<2x256xf32> -> vector<2x256xf32>
    %73 = arith.addf %69, %72 : vector<2x256xf32>
    %74 = arith.addf %73, %8 : vector<2x256xf32>
    %cst_48 = arith.constant 0.000000e+00 : f32
    %75 = vector.broadcast %cst_48 : f32 to vector<2x256xf32>
    %76 = arith.maximumf %74, %75 : vector<2x256xf32>
    %c4 = arith.constant 4 : index
    %c0_49 = arith.constant 0 : index
    %c0_50 = arith.constant 0 : index
    %77 = vector.load %arg0[%c4, %c0_49, %c0_50] : memref<8x2x256xf32, #tpu.memory_space<vmem>>, vector<1x2x256xf32>
    %78 = vector.shape_cast %77 : vector<1x2x256xf32> to vector<2x256xf32>
    %79 = arith.truncf %66 : vector<2x256xf32> to vector<2x256xbf16>
    %c0_51 = arith.constant 0 : index
    %c0_52 = arith.constant 0 : index
    %80 = vector.load %arg1[%c0_51, %c0_52] : memref<256x256xbf16, #tpu.memory_space<vmem>>, vector<256x256xbf16>
    %cst_53 = arith.constant dense<0.000000e+00> : vector<2x256xf32>
    %81 = tpu.matmul %79, %80, %cst_53 {dimension_numbers = #tpu.dot_dimension_numbers<[1], [0], [0], [1], [0, 0, 1, 1], [], []>} : vector<2x256xbf16>, vector<256x256xbf16>, vector<2x256xf32> -> vector<2x256xf32>
    %82 = arith.addf %78, %81 : vector<2x256xf32>
    %cst_54 = arith.constant 0.000000e+00 : f32
    %83 = vector.broadcast %cst_54 : f32 to vector<2x256xf32>
    %84 = arith.maximumf %82, %83 : vector<2x256xf32>
    %85 = arith.truncf %84 : vector<2x256xf32> to vector<2x256xbf16>
    %c0_55 = arith.constant 0 : index
    %c0_56 = arith.constant 0 : index
    %86 = vector.load %arg8[%c0_55, %c0_56] : memref<256x256xbf16, #tpu.memory_space<vmem>>, vector<256x256xbf16>
    %cst_57 = arith.constant dense<0.000000e+00> : vector<2x256xf32>
    %87 = tpu.matmul %85, %86, %cst_57 {dimension_numbers = #tpu.dot_dimension_numbers<[1], [0], [0], [1], [0, 0, 1, 1], [], []>} : vector<2x256xbf16>, vector<256x256xbf16>, vector<2x256xf32> -> vector<2x256xf32>
    %88 = arith.truncf %76 : vector<2x256xf32> to vector<2x256xbf16>
    %c0_58 = arith.constant 0 : index
    %c0_59 = arith.constant 0 : index
    %89 = vector.load %arg9[%c0_58, %c0_59] : memref<256x256xbf16, #tpu.memory_space<vmem>>, vector<256x256xbf16>
    %cst_60 = arith.constant dense<0.000000e+00> : vector<2x256xf32>
    %90 = tpu.matmul %88, %89, %cst_60 {dimension_numbers = #tpu.dot_dimension_numbers<[1], [0], [0], [1], [0, 0, 1, 1], [], []>} : vector<2x256xbf16>, vector<256x256xbf16>, vector<2x256xf32> -> vector<2x256xf32>
    %91 = arith.addf %87, %90 : vector<2x256xf32>
    %92 = arith.addf %91, %8 : vector<2x256xf32>
    %cst_61 = arith.constant 0.000000e+00 : f32
    %93 = vector.broadcast %cst_61 : f32 to vector<2x256xf32>
    %94 = arith.maximumf %92, %93 : vector<2x256xf32>
    %c5 = arith.constant 5 : index
    %c0_62 = arith.constant 0 : index
    %c0_63 = arith.constant 0 : index
    %95 = vector.load %arg0[%c5, %c0_62, %c0_63] : memref<8x2x256xf32, #tpu.memory_space<vmem>>, vector<1x2x256xf32>
    %96 = vector.shape_cast %95 : vector<1x2x256xf32> to vector<2x256xf32>
    %97 = arith.truncf %84 : vector<2x256xf32> to vector<2x256xbf16>
    %c0_64 = arith.constant 0 : index
    %c0_65 = arith.constant 0 : index
    %98 = vector.load %arg1[%c0_64, %c0_65] : memref<256x256xbf16, #tpu.memory_space<vmem>>, vector<256x256xbf16>
    %cst_66 = arith.constant dense<0.000000e+00> : vector<2x256xf32>
    %99 = tpu.matmul %97, %98, %cst_66 {dimension_numbers = #tpu.dot_dimension_numbers<[1], [0], [0], [1], [0, 0, 1, 1], [], []>} : vector<2x256xbf16>, vector<256x256xbf16>, vector<2x256xf32> -> vector<2x256xf32>
    %100 = arith.addf %96, %99 : vector<2x256xf32>
    %cst_67 = arith.constant 0.000000e+00 : f32
    %101 = vector.broadcast %cst_67 : f32 to vector<2x256xf32>
    %102 = arith.maximumf %100, %101 : vector<2x256xf32>
    %103 = arith.truncf %102 : vector<2x256xf32> to vector<2x256xbf16>
    %c0_68 = arith.constant 0 : index
    %c0_69 = arith.constant 0 : index
    %104 = vector.load %arg8[%c0_68, %c0_69] : memref<256x256xbf16, #tpu.memory_space<vmem>>, vector<256x256xbf16>
    %cst_70 = arith.constant dense<0.000000e+00> : vector<2x256xf32>
    %105 = tpu.matmul %103, %104, %cst_70 {dimension_numbers = #tpu.dot_dimension_numbers<[1], [0], [0], [1], [0, 0, 1, 1], [], []>} : vector<2x256xbf16>, vector<256x256xbf16>, vector<2x256xf32> -> vector<2x256xf32>
    %106 = arith.truncf %94 : vector<2x256xf32> to vector<2x256xbf16>
    %c0_71 = arith.constant 0 : index
    %c0_72 = arith.constant 0 : index
    %107 = vector.load %arg9[%c0_71, %c0_72] : memref<256x256xbf16, #tpu.memory_space<vmem>>, vector<256x256xbf16>
    %cst_73 = arith.constant dense<0.000000e+00> : vector<2x256xf32>
    %108 = tpu.matmul %106, %107, %cst_73 {dimension_numbers = #tpu.dot_dimension_numbers<[1], [0], [0], [1], [0, 0, 1, 1], [], []>} : vector<2x256xbf16>, vector<256x256xbf16>, vector<2x256xf32> -> vector<2x256xf32>
    %109 = arith.addf %105, %108 : vector<2x256xf32>
    %110 = arith.addf %109, %8 : vector<2x256xf32>
    %cst_74 = arith.constant 0.000000e+00 : f32
    %111 = vector.broadcast %cst_74 : f32 to vector<2x256xf32>
    %112 = arith.maximumf %110, %111 : vector<2x256xf32>
    %c6 = arith.constant 6 : index
    %c0_75 = arith.constant 0 : index
    %c0_76 = arith.constant 0 : index
    %113 = vector.load %arg0[%c6, %c0_75, %c0_76] : memref<8x2x256xf32, #tpu.memory_space<vmem>>, vector<1x2x256xf32>
    %114 = vector.shape_cast %113 : vector<1x2x256xf32> to vector<2x256xf32>
    %115 = arith.truncf %102 : vector<2x256xf32> to vector<2x256xbf16>
    %c0_77 = arith.constant 0 : index
    %c0_78 = arith.constant 0 : index
    %116 = vector.load %arg1[%c0_77, %c0_78] : memref<256x256xbf16, #tpu.memory_space<vmem>>, vector<256x256xbf16>
    %cst_79 = arith.constant dense<0.000000e+00> : vector<2x256xf32>
    %117 = tpu.matmul %115, %116, %cst_79 {dimension_numbers = #tpu.dot_dimension_numbers<[1], [0], [0], [1], [0, 0, 1, 1], [], []>} : vector<2x256xbf16>, vector<256x256xbf16>, vector<2x256xf32> -> vector<2x256xf32>
    %118 = arith.addf %114, %117 : vector<2x256xf32>
    %cst_80 = arith.constant 0.000000e+00 : f32
    %119 = vector.broadcast %cst_80 : f32 to vector<2x256xf32>
    %120 = arith.maximumf %118, %119 : vector<2x256xf32>
    %121 = arith.truncf %120 : vector<2x256xf32> to vector<2x256xbf16>
    %c0_81 = arith.constant 0 : index
    %c0_82 = arith.constant 0 : index
    %122 = vector.load %arg8[%c0_81, %c0_82] : memref<256x256xbf16, #tpu.memory_space<vmem>>, vector<256x256xbf16>
    %cst_83 = arith.constant dense<0.000000e+00> : vector<2x256xf32>
    %123 = tpu.matmul %121, %122, %cst_83 {dimension_numbers = #tpu.dot_dimension_numbers<[1], [0], [0], [1], [0, 0, 1, 1], [], []>} : vector<2x256xbf16>, vector<256x256xbf16>, vector<2x256xf32> -> vector<2x256xf32>
    %124 = arith.truncf %112 : vector<2x256xf32> to vector<2x256xbf16>
    %c0_84 = arith.constant 0 : index
    %c0_85 = arith.constant 0 : index
    %125 = vector.load %arg9[%c0_84, %c0_85] : memref<256x256xbf16, #tpu.memory_space<vmem>>, vector<256x256xbf16>
    %cst_86 = arith.constant dense<0.000000e+00> : vector<2x256xf32>
    %126 = tpu.matmul %124, %125, %cst_86 {dimension_numbers = #tpu.dot_dimension_numbers<[1], [0], [0], [1], [0, 0, 1, 1], [], []>} : vector<2x256xbf16>, vector<256x256xbf16>, vector<2x256xf32> -> vector<2x256xf32>
    %127 = arith.addf %123, %126 : vector<2x256xf32>
    %128 = arith.addf %127, %8 : vector<2x256xf32>
    %cst_87 = arith.constant 0.000000e+00 : f32
    %129 = vector.broadcast %cst_87 : f32 to vector<2x256xf32>
    %130 = arith.maximumf %128, %129 : vector<2x256xf32>
    %c7 = arith.constant 7 : index
    %c0_88 = arith.constant 0 : index
    %c0_89 = arith.constant 0 : index
    %131 = vector.load %arg0[%c7, %c0_88, %c0_89] : memref<8x2x256xf32, #tpu.memory_space<vmem>>, vector<1x2x256xf32>
    %132 = vector.shape_cast %131 : vector<1x2x256xf32> to vector<2x256xf32>
    %133 = arith.truncf %120 : vector<2x256xf32> to vector<2x256xbf16>
    %c0_90 = arith.constant 0 : index
    %c0_91 = arith.constant 0 : index
    %134 = vector.load %arg1[%c0_90, %c0_91] : memref<256x256xbf16, #tpu.memory_space<vmem>>, vector<256x256xbf16>
    %cst_92 = arith.constant dense<0.000000e+00> : vector<2x256xf32>
    %135 = tpu.matmul %133, %134, %cst_92 {dimension_numbers = #tpu.dot_dimension_numbers<[1], [0], [0], [1], [0, 0, 1, 1], [], []>} : vector<2x256xbf16>, vector<256x256xbf16>, vector<2x256xf32> -> vector<2x256xf32>
    %136 = arith.addf %132, %135 : vector<2x256xf32>
    %cst_93 = arith.constant 0.000000e+00 : f32
    %137 = vector.broadcast %cst_93 : f32 to vector<2x256xf32>
    %138 = arith.maximumf %136, %137 : vector<2x256xf32>
    %139 = arith.truncf %138 : vector<2x256xf32> to vector<2x256xbf16>
    %c0_94 = arith.constant 0 : index
    %c0_95 = arith.constant 0 : index
    %140 = vector.load %arg8[%c0_94, %c0_95] : memref<256x256xbf16, #tpu.memory_space<vmem>>, vector<256x256xbf16>
    %cst_96 = arith.constant dense<0.000000e+00> : vector<2x256xf32>
    %141 = tpu.matmul %139, %140, %cst_96 {dimension_numbers = #tpu.dot_dimension_numbers<[1], [0], [0], [1], [0, 0, 1, 1], [], []>} : vector<2x256xbf16>, vector<256x256xbf16>, vector<2x256xf32> -> vector<2x256xf32>
    %142 = arith.truncf %130 : vector<2x256xf32> to vector<2x256xbf16>
    %c0_97 = arith.constant 0 : index
    %c0_98 = arith.constant 0 : index
    %143 = vector.load %arg9[%c0_97, %c0_98] : memref<256x256xbf16, #tpu.memory_space<vmem>>, vector<256x256xbf16>
    %cst_99 = arith.constant dense<0.000000e+00> : vector<2x256xf32>
    %144 = tpu.matmul %142, %143, %cst_99 {dimension_numbers = #tpu.dot_dimension_numbers<[1], [0], [0], [1], [0, 0, 1, 1], [], []>} : vector<2x256xbf16>, vector<256x256xbf16>, vector<2x256xf32> -> vector<2x256xf32>
    %145 = arith.addf %141, %144 : vector<2x256xf32>
    %146 = arith.addf %145, %8 : vector<2x256xf32>
    %cst_100 = arith.constant 0.000000e+00 : f32
    %147 = vector.broadcast %cst_100 : f32 to vector<2x256xf32>
    %148 = arith.maximumf %146, %147 : vector<2x256xf32>
    %c2_i32_101 = arith.constant 2 : i32
    %149 = tpu.memref_slice %arg11[%c2_i32_101] : memref<3x!tpu.dma_semaphore, #tpu.memory_space<semaphore_mem>> -> memref<1x!tpu.dma_semaphore, #tpu.memory_space<semaphore_mem>>
    %150 = tpu.memref_squeeze %149 : memref<1x!tpu.dma_semaphore, #tpu.memory_space<semaphore_mem>> -> memref<!tpu.dma_semaphore, #tpu.memory_space<semaphore_mem>>
    tpu.wait_dma2 semaphore(%150 : memref<!tpu.dma_semaphore, #tpu.memory_space<semaphore_mem>>) src(%arg5 : memref<256x128xbf16, #tpu.memory_space<any>>) dst(%arg10 : memref<256x128xbf16, #tpu.memory_space<vmem>>)
    %151 = arith.truncf %148 : vector<2x256xf32> to vector<2x256xbf16>
    %c0_102 = arith.constant 0 : index
    %c0_103 = arith.constant 0 : index
    %152 = vector.load %arg10[%c0_102, %c0_103] : memref<256x128xbf16, #tpu.memory_space<vmem>>, vector<256x128xbf16>
    %cst_104 = arith.constant dense<0.000000e+00> : vector<2x128xf32>
    %153 = tpu.matmul %151, %152, %cst_104 {dimension_numbers = #tpu.dot_dimension_numbers<[1], [0], [0], [1], [0, 0, 1, 1], [], []>} : vector<2x256xbf16>, vector<256x128xbf16>, vector<2x128xf32> -> vector<2x128xf32>
    %c0_105 = arith.constant 0 : index
    %c0_106 = arith.constant 0 : index
    %154 = vector.load %arg6[%c0_105, %c0_106] : memref<1x128xf32, #tpu.memory_space<vmem>>, vector<1x128xf32>
    %155 = vector.broadcast %154 : vector<1x128xf32> to vector<2x128xf32>
    %156 = arith.addf %153, %155 : vector<2x128xf32>
    %157 = arith.negf %156 : vector<2x128xf32>
    %158 = math.exp %157 : vector<2x128xf32>
    %cst_107 = arith.constant 1.000000e+00 : f32
    %159 = vector.broadcast %cst_107 : f32 to vector<2x128xf32>
    %160 = arith.addf %159, %158 : vector<2x128xf32>
    %161 = arith.divf %159, %160 : vector<2x128xf32>
    %c0_108 = arith.constant 0 : index
    %c0_109 = arith.constant 0 : index
    %162 = vector.load %arg7[%c0_108, %c0_109] : memref<2x128xf32, #tpu.memory_space<vmem>>, vector<2x128xf32>
    tpu.vector_store %arg7[%c0_108, %c0_109], %161 {strides = array<i32>} : memref<2x128xf32, #tpu.memory_space<vmem>>, vector<2x128xf32>,
    return
  }
}

</mosaic_0001>

<bundles_post_ra>
// kernel: rnn_forward.1
= control target key start
LH: loop header
LB: loop body
LE: loop exit
PB: predicated region body
PF: predicated region fallthrough
CT: control target
= control target key end

     0   :  { %s2815_s24 = smov [#allocation2]   ;;  %s2816_s26 = smov [#allocation3]   ;;  %s4260_s0 = inlined_call_operand.vmem [shape: f32[8,2,256], index: 0, kind: input, shape index: {}]   ;;  %s4261_s1 = inlined_call_operand.vmem [shape: bf16[256,256], index: 1, kind: input, shape index: {}]   ;;  %s4262_s2 = inlined_call_operand.vmem [shape: f32[1,256], index: 2, kind: input, shape index: {}]   ;;  %s4263_s3 = inlined_call_operand.hbm [shape: bf16[256,256], index: 3, kind: input, shape index: {}]   ;;  %s4264_s6 = inlined_call_operand.vmem [shape: f32[1,128], index: 6, kind: input, shape index: {}]   ;;  %s4265_s7 = inlined_call_operand.vmem [shape: f32[2,128], index: 7, kind: output, shape index: {}]   ;;  %s4266_s5 = inlined_call_operand.vmem [shape: bf16[256,128], index: 5, kind: input, shape index: {}]   ;;  %s4267_s4 = inlined_call_operand.hbm [shape: bf16[256,256], index: 4, kind: input, shape index: {}]  }
   0x1   :  { %s28_s25 = sshll.u32 %s2815_s24, 4  ;;  %s40_s27 = sshll.u32 %s2816_s26, 4  ;;  %v78_v0 = vld [vmem:[%s4266_s5] sm:$0xff]  ;;  %v80_v1 = vld [vmem:[%s4266_s5 + $0x8] sm:$0xff]  ;;  %v82_v2 = vld [vmem:[%s4266_s5 + $0x10] sm:$0xff]  ;;  %s29_s25 = int_to_ptr.vmem [resolvable:$true] %s28_s25  ;;  %s41_s27 = int_to_ptr.vmem [resolvable:$true] %s40_s27 }
   0x2   :  { %79 = vst [vmem:[#allocation4] sm:$0xff] %v78_v0  ;;  %81 = vst [vmem:[#allocation4 + $0x8] sm:$0xff] %v80_v1  ;;  %v84_v3 = vld [vmem:[%s4266_s5 + $0x18] sm:$0xff]  ;;  %v86_v4 = vld [vmem:[%s4266_s5 + $0x20] sm:$0xff]  ;;  %s2777_s17 = scalar_lea.vmem %s29_s25, 4096  ;;  %p2782_p1 = scmp.lt.s32.totalorder %s29_s25, %s29_s25 }
   0x3   :  { %83 = vst [vmem:[#allocation4 + $0x10] sm:$0xff] %v82_v2  ;;  %v88_v5 = vld [vmem:[%s4266_s5 + $0x28] sm:$0xff]  ;;  %p2778_p0 = scmp.ne.s32.totalorder %s29_s25, %s2777_s17  ;;  %p2783_p2 = scmp.lt.s32.totalorder %s2777_s17, %s2777_s17 }
   0x5   :  { %p2784_p3 = por %p2783_p2, %p2782_p1 }
   0x7   :  { %p2785_p4 = pnand %p2784_p3, %p2778_p0 }
   0x9   :  { %2788 = shalt.err (!%p2785_p4)  }
   0xa   :  { %31 = dma.hbm_to_vmem [thread:$0]  %s4263_s3, 4096, %s29_s25, [#allocation5]  ;;  %85 = vst [vmem:[#allocation4 + $0x18] sm:$0xff] %v84_v3  ;;  %87 = vst [vmem:[#allocation4 + $0x20] sm:$0xff] %v86_v4  ;;  %v90_v6 = vld [vmem:[%s4266_s5 + $0x30] sm:$0xff]  ;;  %v92_v7 = vld [vmem:[%s4266_s5 + $0x38] sm:$0xff] }
   0xb   :  { %89 = vst [vmem:[#allocation4 + $0x28] sm:$0xff] %v88_v5  ;;  %v94_v8 = vld [vmem:[%s4266_s5 + $0x40] sm:$0xff]  ;;  %s2797_s28 = scalar_lea.vmem %s41_s27, 4096  ;;  %p2802_p6 = scmp.lt.s32.totalorder %s41_s27, %s41_s27 }
   0xc   :  { %p2798_p5 = scmp.ne.s32.totalorder %s41_s27, %s2797_s28  ;;  %p2803_p7 = scmp.lt.s32.totalorder %s2797_s28, %s2797_s28 }
   0xe   :  { %p2804_p8 = por %p2803_p7, %p2802_p6 }
  0x10   :  { %p2805_p9 = pnand %p2804_p8, %p2798_p5 }
  0x12   :  { %2808 = shalt.err (!%p2805_p9)  }
  0x13   :  { %43 = dma.hbm_to_vmem [thread:$0]  %s4267_s4, 4096, %s41_s27, [#allocation5 + $0x1]  ;;  %91 = vst [vmem:[#allocation4 + $0x30] sm:$0xff] %v90_v6  ;;  %93 = vst [vmem:[#allocation4 + $0x38] sm:$0xff] %v92_v7  ;;  %v96_v9 = vld [vmem:[%s4266_s5 + $0x48] sm:$0xff]  ;;  %v98_v10 = vld [vmem:[%s4266_s5 + $0x50] sm:$0xff] }
  0x14   :  { %95 = vst [vmem:[#allocation4 + $0x40] sm:$0xff] %v94_v8  ;;  %v100_v11 = vld [vmem:[%s4266_s5 + $0x58] sm:$0xff]  ;;  %97 = vst [vmem:[#allocation4 + $0x48] sm:$0xff] %v96_v9  ;;  %v102_v12 = vld [vmem:[%s4266_s5 + $0x60] sm:$0xff] }
  0x15   :  { %99 = vst [vmem:[#allocation4 + $0x50] sm:$0xff] %v98_v10  ;;  %101 = vst [vmem:[#allocation4 + $0x58] sm:$0xff] %v100_v11  ;;  %v104_v13 = vld [vmem:[%s4266_s5 + $0x68] sm:$0xff]  ;;  %v106_v14 = vld [vmem:[%s4266_s5 + $0x70] sm:$0xff] }
  0x16   :  { %103 = vst [vmem:[#allocation4 + $0x60] sm:$0xff] %v102_v12  ;;  %105 = vst [vmem:[#allocation4 + $0x68] sm:$0xff] %v104_v13  ;;  %v108_v15 = vld [vmem:[%s4266_s5 + $0x78] sm:$0xff] }
  0x17   :  { %107 = vst [vmem:[#allocation4 + $0x70] sm:$0xff] %v106_v14  ;;  %109 = vst [vmem:[#allocation4 + $0x78] sm:$0xff] %v108_v15 }
  0x18   :  { %117 = vsyncadd [#allocation5 + $0x2], 2048  ;;  %v120_v16 = vlaneseq  ;;  %v130_v17 = vld [vmem:[%s4260_s0] sm:$0xf] }
  0x19   :  { %v131_v18 = vmax.f32 %v130_v17, 0.0  ;;  %v118_v20 = vld [vmem:[%s4262_s2] sm:$0x3] }
  0x1a   :  { %v121_v19 = vshrl.u32 %v120_v16, 7 }
  0x1c   :  { %v122_v21 = vsub.s32 0, %v121_v19  ;;  %v126_v22 = vsub.s32 1, %v121_v19 }
  0x1e   :  { %v2918_v23 = vrot.slane %v118_v20, %v122_v21  ;;  %v2920_v24 = vrot.slane %v118_v20, %v126_v22 }
  0x20   :  { %4530 = vst [vmem:[#allocation16_spill] sm:$0xff] %v2918_v23  ;;  %4531 = vst [vmem:[#allocation17_spill] sm:$0xff] %v2920_v24 }
  0x21   :  { %2809 = dma.done.wait [#allocation5], 4096 }
  0x22   :  { %2810 = vsyncadd [#allocation5], 4294963200  ;;  %v2817_v25 = vmov 1983009808   ;;  %v2461_v29 = vld [vmem:[#allocation2 + $0x74] ss:$8 sps:$4 sm:$0xff]  }
  0x23   :  { %v138_v26 = vunpack.c.l.s4 %v2817_v25  ;;  %v2463_v31 = vld [vmem:[#allocation2 + $0x70] ss:$8 sps:$4 sm:$0xff]   ;;  %341 = vmatprep.subr.bf16.mxu0 %v2461_v29  ;;  %v2464_v32 = vld [vmem:[#allocation2 + $0x64] ss:$8 sps:$4 sm:$0xff]   ;;  %v2466_v34 = vld [vmem:[#allocation2 + $0x60] ss:$8 sps:$4 sm:$0xff]  }
  0x24   :  { %342 = vmatpush1.bf16.msra.mxu0 %v2463_v31  ;;  %v2467_v35 = vld [vmem:[#allocation2 + $0x54] ss:$8 sps:$4 sm:$0xff]   ;;  %v2469_v37 = vld [vmem:[#allocation2 + $0x50] ss:$8 sps:$4 sm:$0xff]   ;;  %v2470_v38 = vld [vmem:[#allocation2 + $0x44] ss:$8 sps:$4 sm:$0xff]  }
  0x25   :  { %v139_v27 = vunpack.c.0.s8 %v138_v26  ;;  %343 = vmatprep.subr.bf16.mxu0 %v2464_v32  ;;  %v2472_v39 = vld [vmem:[#allocation2 + $0x40] ss:$8 sps:$4 sm:$0xff]   ;;  %v2473_v40 = vld [vmem:[#allocation2 + $0x34] ss:$8 sps:$4 sm:$0xff]   ;;  %v2475_v41 = vld [vmem:[#allocation2 + $0x30] ss:$8 sps:$4 sm:$0xff]  }
  0x26   :  { %v2476_v42 = vld [vmem:[#allocation2 + $0x24] ss:$8 sps:$4 sm:$0xff]   ;;  %v2478_v43 = vld [vmem:[#allocation2 + $0x20] ss:$8 sps:$4 sm:$0xff]   ;;  %v2479_v44 = vld [vmem:[#allocation2 + $0x14] ss:$8 sps:$4 sm:$0xff]  }
  0x27   :  { %v2922_v28 = vsub.s32 %v139_v27, %v121_v19  ;;  %v2481_v45 = vld [vmem:[#allocation2 + $0x10] ss:$8 sps:$4 sm:$0xff]   ;;  %v2482_v46 = vld [vmem:[#allocation2 + $0x4] ss:$8 sps:$4 sm:$0xff]   ;;  %v2484_v47 = vld [vmem:[#allocation2] ss:$8 sps:$4 sm:$0xff]  }
  0x28   :  { %344 = vmatpush1.bf16.msra.mxu0 %v2466_v34  ;;  %v2485_v48 = vld [vmem:[#allocation2 + $0xf4] ss:$8 sps:$4 sm:$0xff]   ;;  %v2487_v49 = vld [vmem:[#allocation2 + $0xf0] ss:$8 sps:$4 sm:$0xff]   ;;  %v2488_v50 = vld [vmem:[#allocation2 + $0xe4] ss:$8 sps:$4 sm:$0xff]  }
  0x29   :  { %v2925_v30 = vrot.slane %v131_v18, %v2922_v28  ;;  %345 = vmatprep.subr.bf16.mxu0 %v2467_v35  ;;  %v2490_v51 = vld [vmem:[#allocation2 + $0xe0] ss:$8 sps:$4 sm:$0xff]   ;;  %v2491_v52 = vld [vmem:[#allocation2 + $0xd4] ss:$8 sps:$4 sm:$0xff]   ;;  %v2493_v53 = vld [vmem:[#allocation2 + $0xd0] ss:$8 sps:$4 sm:$0xff]  }
  0x2a   :  { %v2494_v54 = vld [vmem:[#allocation2 + $0xc4] ss:$8 sps:$4 sm:$0xff]   ;;  %v2496_v55 = vld [vmem:[#allocation2 + $0xc0] ss:$8 sps:$4 sm:$0xff]   ;;  %v2497_v56 = vld [vmem:[#allocation2 + $0xb4] ss:$8 sps:$4 sm:$0xff]  }
  0x2b   :  { %v144_v33 = vcombine.high %v2925_v30, %v2925_v30  ;;  %v2499_v57 = vld [vmem:[#allocation2 + $0xb0] ss:$8 sps:$4 sm:$0xff]   ;;  %v2500_v58 = vld [vmem:[#allocation2 + $0xa4] ss:$8 sps:$4 sm:$0xff]   ;;  %v2502_v59 = vld [vmem:[#allocation2 + $0xa0] ss:$8 sps:$4 sm:$0xff]   ;;  %v2934_v0 = vpack.c.bf16 %v2925_v30, %v2925_v30 }
  0x2c   :  { %346 = vmatpush1.bf16.msra.mxu0 %v2469_v37  ;;  %v2503_v60 = vld [vmem:[#allocation2 + $0x94] ss:$8 sps:$4 sm:$0xff]   ;;  %v2505_v61 = vld [vmem:[#allocation2 + $0x90] ss:$8 sps:$4 sm:$0xff]   ;;  %v2506_v62 = vld [vmem:[#allocation2 + $0x84] ss:$8 sps:$4 sm:$0xff]  }
  0x2d   :  { %v2929_v36 = vpack.c.bf16 %v144_v33, %v144_v33  ;;  %347 = vmatprep.subr.bf16.mxu0 %v2470_v38  ;;  %v2508_v63 = vld [vmem:[#allocation2 + $0x80] ss:$8 sps:$4 sm:$0xff]  }
  0x2f   :  { %373 = vmatprep.mubr.bf16.mxu0 %v2929_v36 }
  0x30   :  { %348 = vmatpush1.bf16.msra.mxu0 %v2472_v39 }
  0x31   :  { %349 = vmatprep.subr.bf16.mxu0 %v2473_v40 }
  0x34   :  { %350 = vmatpush1.bf16.msra.mxu0 %v2475_v41 }
  0x35   :  { %351 = vmatprep.subr.bf16.mxu0 %v2476_v42 }
  0x38   :  { %352 = vmatpush1.bf16.msra.mxu0 %v2478_v43 }
  0x39   :  { %353 = vmatprep.subr.bf16.mxu0 %v2479_v44 }
  0x3c   :  { %354 = vmatpush1.bf16.msra.mxu0 %v2481_v45 }
  0x3d   :  { %355 = vmatprep.subr.bf16.mxu0 %v2482_v46 }
  0x40   :  { %356 = vmatpush1.bf16.msra.mxu0 %v2484_v47 }
  0x41   :  { %357 = vmatprep.subr.bf16.mxu0 %v2485_v48 }
  0x44   :  { %358 = vmatpush2.bf16.msra.mxu0 %v2487_v49 }
  0x45   :  { %359 = vmatprep.subr.bf16.mxu0 %v2488_v50 }
  0x48   :  { %360 = vmatpush2.bf16.msra.mxu0 %v2490_v51 }
  0x49   :  { %361 = vmatprep.subr.bf16.mxu0 %v2491_v52 }
  0x4c   :  { %362 = vmatpush2.bf16.msra.mxu0 %v2493_v53 }
  0x4d   :  { %363 = vmatprep.subr.bf16.mxu0 %v2494_v54 }
  0x50   :  { %364 = vmatpush2.bf16.msra.mxu0 %v2496_v55 }
  0x51   :  { %365 = vmatprep.subr.bf16.mxu0 %v2497_v56 }
  0x54   :  { %366 = vmatpush2.bf16.msra.mxu0 %v2499_v57 }
  0x55   :  { %367 = vmatprep.subr.bf16.mxu0 %v2500_v58 }
  0x58   :  { %368 = vmatpush2.bf16.msra.mxu0 %v2502_v59 }
  0x59   :  { %369 = vmatprep.subr.bf16.mxu0 %v2503_v60 }
  0x5c   :  { %370 = vmatpush2.bf16.msra.mxu0 %v2505_v61 }
  0x5d   :  { %371 = vmatprep.subr.bf16.mxu0 %v2506_v62 }
  0x60   :  { %372 = vmatpush2.bf16.msra.mxu0 %v2508_v63 }
  0x63   :  { %374 = vmatmul.mubr.bf16.vlgmr.msra.gmra.mxu0 %v2934_v0 }
 0x123   :  { %v375_v1 = vpop.f32.mrf.mxu0 }
 0x124   :  { %v2938_v2 = vadd.f32 %v375_v1, %v2918_v23 }
 0x125   :  { %v377_v3 = vpop.f32.mrf.mxu0 }
 0x126   :  { %v378_v5 = vadd.f32 %v377_v3, %v2920_v24 }
 0x127   :  { %v379_v6 = vpop.f32.mrf.mxu0 }
 0x128   :  { %v383_v7 = vmax.f32 %v378_v5, 0.0 }
 0x129   :  { %v380_v8 = vpop.f32.mrf.mxu0 }
 0x12a   :  { %2811 = dma.done.wait [#allocation5 + $0x1], 4096 }
 0x12b   :  { %2812 = vsyncadd [#allocation5 + $0x1], 4294963200  ;;  %612 = vmatprep.mubr.bf16.mxu1 %v2929_v36  ;;  %v680_v9 = vpack.c.bf16 %v383_v7, %v383_v7  ;;  %v2946_v10 = vld [vmem:[%s4261_s1 + $0x74] ss:$8 sps:$4 sm:$0xff]   ;;  %v2951_v11 = vld [vmem:[%s4261_s1 + $0x70] ss:$8 sps:$4 sm:$0xff]  }
 0x12c   :  { %4532 = vst [vmem:[#allocation18_spill] sm:$0xff] %v2951_v11  ;;  %580 = vmatprep.subr.bf16.mxu1 %v2946_v10  ;;  %v2957_v12 = vld [vmem:[%s4261_s1 + $0x64] ss:$8 sps:$4 sm:$0xff]   ;;  %v2963_v13 = vld [vmem:[%s4261_s1 + $0x60] ss:$8 sps:$4 sm:$0xff]  }
 0x12d   :  { %905 = vmatprep.mubr.bf16.mxu0 %v680_v9  ;;  %4533 = vst [vmem:[#allocation19_spill] sm:$0xff] %v2957_v12  ;;  %581 = vmatpush1.bf16.msra.mxu1 %v2951_v11  ;;  %4534 = vst [vmem:[#allocation20_spill] sm:$0xff] %v2963_v13  ;;  %v2969_v14 = vld [vmem:[%s4261_s1 + $0x54] ss:$8 sps:$4 sm:$0xff]   ;;  %v2975_v15 = vld [vmem:[%s4261_s1 + $0x50] ss:$8 sps:$4 sm:$0xff]  }
 0x12e   :  { %582 = vmatprep.subr.bf16.mxu1 %v2957_v12  ;;  %4535 = vst [vmem:[#allocation21_spill] sm:$0xff] %v2969_v14  ;;  %4536 = vst [vmem:[#allocation22_spill] sm:$0xff] %v2975_v15  ;;  %v2981_v16 = vld [vmem:[%s4261_s1 + $0x44] ss:$8 sps:$4 sm:$0xff]   ;;  %v2987_v17 = vld [vmem:[%s4261_s1 + $0x40] ss:$8 sps:$4 sm:$0xff]  }
 0x12f   :  { %4537 = vst [vmem:[#allocation23_spill] sm:$0xff] %v2981_v16  ;;  %v2993_v18 = vld [vmem:[%s4261_s1 + $0x34] ss:$8 sps:$4 sm:$0xff]   ;;  %v2999_v19 = vld [vmem:[%s4261_s1 + $0x30] ss:$8 sps:$4 sm:$0xff]  }
 0x130   :  { %v3005_v20 = vld [vmem:[%s4261_s1 + $0x24] ss:$8 sps:$4 sm:$0xff]   ;;  %v3011_v21 = vld [vmem:[%s4261_s1 + $0x20] ss:$8 sps:$4 sm:$0xff]   ;;  %v3017_v22 = vld [vmem:[%s4261_s1 + $0x14] ss:$8 sps:$4 sm:$0xff]  }
 0x131   :  { %583 = vmatpush1.bf16.msra.mxu1 %v2963_v13  ;;  %4538 = vst [vmem:[#allocation24_spill] sm:$0xff] %v3011_v21  ;;  %4539 = vst [vmem:[#allocation25_spill] sm:$0xff] %v3017_v22  ;;  %v3019_v25 = vld [vmem:[#allocation3 + $0x74] ss:$8 sps:$4 sm:$0xff]   ;;  %v3021_v26 = vld [vmem:[#allocation3 + $0x70] ss:$8 sps:$4 sm:$0xff]  }
 0x132   :  { %584 = vmatprep.subr.bf16.mxu1 %v2969_v14  ;;  %4540 = vst [vmem:[#allocation26_spill] sm:$0xff] %v3019_v25  ;;  %v3027_v27 = vld [vmem:[%s4261_s1 + $0x10] ss:$8 sps:$4 sm:$0xff]   ;;  %v3029_v29 = vld [vmem:[#allocation3 + $0x64] ss:$8 sps:$4 sm:$0xff]   ;;  %873 = vmatprep.subr.bf16.mxu0 %v3019_v25 }
 0x133   :  { %4541 = vst [vmem:[#allocation27_spill] sm:$0xff] %v3027_v27  ;;  %v3035_v30 = vld [vmem:[%s4261_s1 + $0x4] ss:$8 sps:$4 sm:$0xff]   ;;  %874 = vmatpush1.bf16.msra.mxu0 %v3021_v26  ;;  %v3039_v31 = vld [vmem:[#allocation3 + $0x60] ss:$8 sps:$4 sm:$0xff]  }
 0x134   :  { %4542 = vst [vmem:[#allocation28_spill] sm:$0xff] %v3035_v30  ;;  %875 = vmatprep.subr.bf16.mxu0 %v3029_v29  ;;  %v3042_v32 = vld [vmem:[#allocation3 + $0x54] ss:$8 sps:$4 sm:$0xff]   ;;  %v3048_v33 = vld [vmem:[%s4261_s1] ss:$8 sps:$4 sm:$0xff]  }
 0x135   :  { %585 = vmatpush1.bf16.msra.mxu1 %v2975_v15  ;;  %4543 = vst [vmem:[#allocation29_spill] sm:$0xff] %v3048_v33  ;;  %v3054_v34 = vld [vmem:[%s4261_s1 + $0xf4] ss:$8 sps:$4 sm:$0xff]   ;;  %v3057_v35 = vld [vmem:[#allocation3 + $0x50] ss:$8 sps:$4 sm:$0xff]  }
 0x136   :  { %586 = vmatprep.subr.bf16.mxu1 %v2981_v16  ;;  %4544 = vst [vmem:[#allocation30_spill] sm:$0xff] %v3054_v34  ;;  %v3060_v36 = vld [vmem:[#allocation3 + $0x44] ss:$8 sps:$4 sm:$0xff]   ;;  %v3066_v37 = vld [vmem:[%s4261_s1 + $0xf0] ss:$8 sps:$4 sm:$0xff]  }
 0x137   :  { %876 = vmatpush1.bf16.msra.mxu0 %v3039_v31  ;;  %4545 = vst [vmem:[#allocation31_spill] sm:$0xff] %v3066_v37  ;;  %v3072_v38 = vld [vmem:[%s4261_s1 + $0xe4] ss:$8 sps:$4 sm:$0xff]   ;;  %v3075_v39 = vld [vmem:[#allocation3 + $0x40] ss:$8 sps:$4 sm:$0xff]  }
 0x138   :  { %877 = vmatprep.subr.bf16.mxu0 %v3042_v32  ;;  %4546 = vst [vmem:[#allocation32_spill] sm:$0xff] %v3072_v38  ;;  %v3078_v40 = vld [vmem:[#allocation3 + $0x34] ss:$8 sps:$4 sm:$0xff]   ;;  %v3084_v41 = vld [vmem:[%s4261_s1 + $0xe0] ss:$8 sps:$4 sm:$0xff]  }
 0x139   :  { %587 = vmatpush1.bf16.msra.mxu1 %v2987_v17  ;;  %4547 = vst [vmem:[#allocation33_spill] sm:$0xff] %v3084_v41  ;;  %v3090_v42 = vld [vmem:[%s4261_s1 + $0xd4] ss:$8 sps:$4 sm:$0xff]   ;;  %v3093_v43 = vld [vmem:[#allocation3 + $0x30] ss:$8 sps:$4 sm:$0xff]  }
 0x13a   :  { %588 = vmatprep.subr.bf16.mxu1 %v2993_v18  ;;  %4548 = vst [vmem:[#allocation34_spill] sm:$0xff] %v3090_v42  ;;  %v3096_v44 = vld [vmem:[#allocation3 + $0x24] ss:$8 sps:$4 sm:$0xff]   ;;  %v3102_v45 = vld [vmem:[%s4261_s1 + $0xd0] ss:$8 sps:$4 sm:$0xff]  }
 0x13b   :  { %878 = vmatpush1.bf16.msra.mxu0 %v3057_v35  ;;  %4549 = vst [vmem:[#allocation35_spill] sm:$0xff] %v3102_v45  ;;  %v3108_v46 = vld [vmem:[%s4261_s1 + $0xc4] ss:$8 sps:$4 sm:$0xff]   ;;  %v3111_v47 = vld [vmem:[#allocation3 + $0x20] ss:$8 sps:$4 sm:$0xff]  }
 0x13c   :  { %879 = vmatprep.subr.bf16.mxu0 %v3060_v36  ;;  %4550 = vst [vmem:[#allocation36_spill] sm:$0xff] %v3108_v46  ;;  %v3114_v48 = vld [vmem:[#allocation3 + $0x14] ss:$8 sps:$4 sm:$0xff]   ;;  %v3120_v49 = vld [vmem:[%s4261_s1 + $0xc0] ss:$8 sps:$4 sm:$0xff]  }
 0x13d   :  { %589 = vmatpush1.bf16.msra.mxu1 %v2999_v19  ;;  %4551 = vst [vmem:[#allocation37_spill] sm:$0xff] %v3114_v48  ;;  %4552 = vst [vmem:[#allocation38_spill] sm:$0xff] %v3120_v49  ;;  %v3126_v50 = vld [vmem:[%s4261_s1 + $0xb4] ss:$8 sps:$4 sm:$0xff]   ;;  %v3129_v51 = vld [vmem:[#allocation3 + $0x10] ss:$8 sps:$4 sm:$0xff]  }
 0x13e   :  { %590 = vmatprep.subr.bf16.mxu1 %v3005_v20  ;;  %4553 = vst [vmem:[#allocation39_spill] sm:$0xff] %v3126_v50  ;;  %4554 = vst [vmem:[#allocation40_spill] sm:$0xff] %v3129_v51  ;;  %v3132_v52 = vld [vmem:[#allocation3 + $0x4] ss:$8 sps:$4 sm:$0xff]   ;;  %v3138_v53 = vld [vmem:[%s4261_s1 + $0xb0] ss:$8 sps:$4 sm:$0xff]  }
 0x13f   :  { %880 = vmatpush1.bf16.msra.mxu0 %v3075_v39  ;;  %4555 = vst [vmem:[#allocation41_spill] sm:$0xff] %v3132_v52  ;;  %4556 = vst [vmem:[#allocation42_spill] sm:$0xff] %v3138_v53  ;;  %v3144_v54 = vld [vmem:[%s4261_s1 + $0xa4] ss:$8 sps:$4 sm:$0xff]   ;;  %v3147_v55 = vld [vmem:[#allocation3] ss:$8 sps:$4 sm:$0xff]  }
 0x140   :  { %881 = vmatprep.subr.bf16.mxu0 %v3078_v40  ;;  %4557 = vst [vmem:[#allocation43_spill] sm:$0xff] %v3144_v54  ;;  %4558 = vst [vmem:[#allocation44_spill] sm:$0xff] %v3147_v55  ;;  %v3150_v56 = vld [vmem:[#allocation3 + $0xf4] ss:$8 sps:$4 sm:$0xff]   ;;  %v3156_v57 = vld [vmem:[%s4261_s1 + $0xa0] ss:$8 sps:$4 sm:$0xff]  }
 0x141   :  { %591 = vmatpush1.bf16.msra.mxu1 %v3011_v21  ;;  %4559 = vst [vmem:[#allocation45_spill] sm:$0xff] %v3150_v56  ;;  %4560 = vst [vmem:[#allocation46_spill] sm:$0xff] %v3156_v57  ;;  %v3162_v58 = vld [vmem:[%s4261_s1 + $0x94] ss:$8 sps:$4 sm:$0xff]   ;;  %v3165_v59 = vld [vmem:[#allocation3 + $0xf0] ss:$8 sps:$4 sm:$0xff]  }
 0x142   :  { %592 = vmatprep.subr.bf16.mxu1 %v3017_v22  ;;  %4561 = vst [vmem:[#allocation47_spill] sm:$0xff] %v3162_v58  ;;  %4562 = vst [vmem:[#allocation48_spill] sm:$0xff] %v3165_v59  ;;  %v3168_v60 = vld [vmem:[#allocation3 + $0xe4] ss:$8 sps:$4 sm:$0xff]   ;;  %v3174_v61 = vld [vmem:[%s4261_s1 + $0x90] ss:$8 sps:$4 sm:$0xff]  }
 0x143   :  { %882 = vmatpush1.bf16.msra.mxu0 %v3093_v43  ;;  %4563 = vst [vmem:[#allocation49_spill] sm:$0xff] %v3168_v60  ;;  %4564 = vst [vmem:[#allocation50_spill] sm:$0xff] %v3174_v61  ;;  %v3180_v62 = vld [vmem:[%s4261_s1 + $0x84] ss:$8 sps:$4 sm:$0xff]   ;;  %v3185_v63 = vld [vmem:[%s4261_s1 + $0x80] ss:$8 sps:$4 sm:$0xff]  }
 0x144   :  { %883 = vmatprep.subr.bf16.mxu0 %v3096_v44  ;;  %4565 = vst [vmem:[#allocation51_spill] sm:$0xff] %v3180_v62  ;;  %4566 = vst [vmem:[#allocation52_spill] sm:$0xff] %v3185_v63  ;;  %v3188_v1 = vld [vmem:[#allocation3 + $0xe0] ss:$8 sps:$4 sm:$0xff]   ;;  %v3191_v3 = vld [vmem:[#allocation3 + $0xd4] ss:$8 sps:$4 sm:$0xff]  }
 0x145   :  { %593 = vmatpush1.bf16.msra.mxu1 %v3027_v27  ;;  %4567 = vst [vmem:[#allocation53_spill] sm:$0xff] %v3188_v1  ;;  %4568 = vst [vmem:[#allocation54_spill] sm:$0xff] %v3191_v3  ;;  %v3193_v5 = vld [vmem:[#allocation2 + $0x74] ss:$8 sps:$4 sm:$0xff]   ;;  %v3198_v6 = vld [vmem:[#allocation3 + $0xd0] ss:$8 sps:$4 sm:$0xff]  }
 0x146   :  { %594 = vmatprep.subr.bf16.mxu1 %v3035_v30  ;;  %4569 = vst [vmem:[#allocation55_spill] sm:$0xff] %v3198_v6  ;;  %v3201_v7 = vld [vmem:[#allocation3 + $0xc4] ss:$8 sps:$4 sm:$0xff]   ;;  %v3204_v8 = vld [vmem:[#allocation2 + $0x70] ss:$8 sps:$4 sm:$0xff]  }
 0x147   :  { %884 = vmatpush1.bf16.msra.mxu0 %v3111_v47  ;;  %4570 = vst [vmem:[#allocation56_spill] sm:$0xff] %v3201_v7  ;;  %v3207_v9 = vld [vmem:[#allocation2 + $0x64] ss:$8 sps:$4 sm:$0xff]   ;;  %v3210_v4 = vld [vmem:[#allocation3 + $0xc0] ss:$8 sps:$4 sm:$0xff]  }
 0x148   :  { %885 = vmatprep.subr.bf16.mxu0 %v3114_v48  ;;  %4571 = vst [vmem:[#allocation57_spill] sm:$0xff] %v3210_v4  ;;  %v3214_v24 = vld [vmem:[#allocation3 + $0xb4] ss:$8 sps:$4 sm:$0xff]   ;;  %v3217_v23 = vld [vmem:[#allocation2 + $0x60] ss:$8 sps:$4 sm:$0xff]  }
 0x149   :  { %595 = vmatpush1.bf16.msra.mxu1 %v3048_v33  ;;  %4572 = vst [vmem:[#allocation58_spill] sm:$0xff] %v3214_v24  ;;  %v3269_v48 = vld [vmem:[#allocation2 + $0x14] ss:$8 sps:$4 sm:$0xff]  }
 0x14a   :  { %596 = vmatprep.subr.bf16.mxu1 %v3054_v34  ;;  %4587 = vst [vmem:[#allocation72_spill] sm:$0xff] %v3269_v48 }
 0x14b   :  { %886 = vmatpush1.bf16.msra.mxu0 %v3129_v51 }
 0x14c   :  { %887 = vmatprep.subr.bf16.mxu0 %v3132_v52  ;;  %v3259_v52 = vld [vmem:[#allocation3 + $0x80] ss:$8 sps:$4 sm:$0xff]  }
 0x14d   :  { %597 = vmatpush2.bf16.msra.mxu1 %v3066_v37  ;;  %4584 = vst [vmem:[#allocation70_spill] sm:$0xff] %v3259_v52 }
 0x14e   :  { %598 = vmatprep.subr.bf16.mxu1 %v3072_v38 }
 0x14f   :  { %888 = vmatpush1.bf16.msra.mxu0 %v3147_v55  ;;  %v3256_v55 = vld [vmem:[#allocation2 + $0x24] ss:$8 sps:$4 sm:$0xff]  }
 0x150   :  { %889 = vmatprep.subr.bf16.mxu0 %v3150_v56  ;;  %v3247_v56 = vld [vmem:[#allocation3 + $0x90] ss:$8 sps:$4 sm:$0xff]   ;;  %4583 = vst [vmem:[#allocation69_spill] sm:$0xff] %v3256_v55 }
 0x151   :  { %599 = vmatpush2.bf16.msra.mxu1 %v3084_v41  ;;  %4580 = vst [vmem:[#allocation66_spill] sm:$0xff] %v3247_v56 }
 0x152   :  { %600 = vmatprep.subr.bf16.mxu1 %v3090_v42 }
 0x153   :  { %890 = vmatpush2.bf16.msra.mxu0 %v3165_v59  ;;  %v3244_v59 = vld [vmem:[#allocation2 + $0x34] ss:$8 sps:$4 sm:$0xff]  }
 0x154   :  { %891 = vmatprep.subr.bf16.mxu0 %v3168_v60  ;;  %v3235_v60 = vld [vmem:[#allocation3 + $0xa0] ss:$8 sps:$4 sm:$0xff]   ;;  %4579 = vst [vmem:[#allocation65_spill] sm:$0xff] %v3244_v59 }
 0x155   :  { %601 = vmatpush2.bf16.msra.mxu1 %v3102_v45  ;;  %4576 = vst [vmem:[#allocation62_spill] sm:$0xff] %v3235_v60 }
 0x156   :  { %602 = vmatprep.subr.bf16.mxu1 %v3108_v46 }
 0x157   :  { %892 = vmatpush2.bf16.msra.mxu0 %v3188_v1  ;;  %v3223_v1 = vld [vmem:[#allocation3 + $0xb0] ss:$8 sps:$4 sm:$0xff]  }
 0x158   :  { %893 = vmatprep.subr.bf16.mxu0 %v3191_v3  ;;  %v3220_v3 = vld [vmem:[#allocation2 + $0x54] ss:$8 sps:$4 sm:$0xff]   ;;  %4573 = vst [vmem:[#allocation59_spill] sm:$0xff] %v3223_v1 }
 0x159   :  { %603 = vmatpush2.bf16.msra.mxu1 %v3120_v49 }
 0x15a   :  { %604 = vmatprep.subr.bf16.mxu1 %v3126_v50 }
 0x15b   :  { %894 = vmatpush2.bf16.msra.mxu0 %v3198_v6  ;;  %v3226_v6 = vld [vmem:[#allocation3 + $0xa4] ss:$8 sps:$4 sm:$0xff]  }
 0x15c   :  { %895 = vmatprep.subr.bf16.mxu0 %v3201_v7  ;;  %4574 = vst [vmem:[#allocation60_spill] sm:$0xff] %v3226_v6  ;;  %v3232_v7 = vld [vmem:[#allocation2 + $0x44] ss:$8 sps:$4 sm:$0xff]  }
 0x15d   :  { %605 = vmatpush2.bf16.msra.mxu1 %v3138_v53  ;;  %4575 = vst [vmem:[#allocation61_spill] sm:$0xff] %v3232_v7 }
 0x15e   :  { %606 = vmatprep.subr.bf16.mxu1 %v3144_v54 }
 0x15f   :  { %896 = vmatpush2.bf16.msra.mxu0 %v3210_v4  ;;  %v3238_v4 = vld [vmem:[#allocation3 + $0x94] ss:$8 sps:$4 sm:$0xff]  }
 0x160   :  { %897 = vmatprep.subr.bf16.mxu0 %v3214_v24  ;;  %4577 = vst [vmem:[#allocation63_spill] sm:$0xff] %v3238_v4  ;;  %v3241_v24 = vld [vmem:[#allocation2 + $0x40] ss:$8 sps:$4 sm:$0xff]  }
 0x161   :  { %607 = vmatpush2.bf16.msra.mxu1 %v3156_v57  ;;  %4578 = vst [vmem:[#allocation64_spill] sm:$0xff] %v3241_v24 }
 0x162   :  { %608 = vmatprep.subr.bf16.mxu1 %v3162_v58 }
 0x163   :  { %898 = vmatpush2.bf16.msra.mxu0 %v3223_v1  ;;  %v3250_v1 = vld [vmem:[#allocation3 + $0x84] ss:$8 sps:$4 sm:$0xff]  }
 0x164   :  { %899 = vmatprep.subr.bf16.mxu0 %v3226_v6  ;;  %4581 = vst [vmem:[#allocation67_spill] sm:$0xff] %v3250_v1  ;;  %v3253_v6 = vld [vmem:[#allocation2 + $0x30] ss:$8 sps:$4 sm:$0xff]  }
 0x165   :  { %609 = vmatpush2.bf16.msra.mxu1 %v3174_v61  ;;  %4582 = vst [vmem:[#allocation68_spill] sm:$0xff] %v3253_v6 }
 0x166   :  { %610 = vmatprep.subr.bf16.mxu1 %v3180_v62 }
 0x167   :  { %900 = vmatpush2.bf16.msra.mxu0 %v3235_v60  ;;  %v3263_v60 = vld [vmem:[#allocation2 + $0x20] ss:$8 sps:$4 sm:$0xff]  }
 0x168   :  { %901 = vmatprep.subr.bf16.mxu0 %v3238_v4  ;;  %4585 = vst [vmem:[#allocation71_spill] sm:$0xff] %v3263_v60  ;;  %v4586_v4 = vmax.f32 %v2938_v2, 0.0  ;;  %v3282_v2 = vld [vmem:[#allocation2] ss:$8 sps:$4 sm:$0xff]  }
 0x169   :  { %611 = vmatpush2.bf16.msra.mxu1 %v3185_v63  ;;  %4590 = vst [vmem:[#allocation75_spill] sm:$0xff] %v3282_v2 }
 0x16a   :  { %1074 = vmatprep.subr.bf16.mxu1 %v3193_v5  ;;  %v679_v51 = vpack.c.bf16 %v4586_v4, %v4586_v4  ;;  %v3285_v4 = vld [vmem:[#allocation2 + $0xf4] ss:$8 sps:$4 sm:$0xff]  }
 0x16b   :  { %902 = vmatpush2.bf16.msra.mxu0 %v3247_v56  ;;  %v3274_v56 = vld [vmem:[#allocation2 + $0x10] ss:$8 sps:$4 sm:$0xff]   ;;  %4591 = vst [vmem:[#allocation76_spill] sm:$0xff] %v3285_v4 }
 0x16c   :  { %613 = vmatmul.mubr.bf16.vlgmr.msra.gmra.mxu1 %v2934_v0  ;;  %v3229_v0 = vld [vmem:[#allocation2 + $0x50] ss:$8 sps:$4 sm:$0xff]   ;;  %903 = vmatprep.subr.bf16.mxu0 %v3250_v1  ;;  %4588 = vst [vmem:[#allocation73_spill] sm:$0xff] %v3274_v56  ;;  %v3277_v1 = vld [vmem:[#allocation2 + $0x4] ss:$8 sps:$4 sm:$0xff]  }
 0x16d   :  { %1075 = vmatpush1.bf16.msra.mxu1 %v3204_v8  ;;  %4589 = vst [vmem:[#allocation74_spill] sm:$0xff] %v3277_v1 }
 0x16e   :  { %1076 = vmatprep.subr.bf16.mxu1 %v3207_v9 }
 0x16f   :  { %904 = vmatpush2.bf16.msra.mxu0 %v3259_v52 }
 0x170   :  { %1121 = vmatprep.subr.bf16.mxu0 %v2946_v10 }
 0x171   :  { %1077 = vmatpush1.bf16.msra.mxu1 %v3217_v23 }
 0x172   :  { %1078 = vmatprep.subr.bf16.mxu1 %v3220_v3  ;;  %906 = vmatmul.mubr.bf16.vlgmr.msra.gmra.mxu0 %v679_v51  ;;  %v3290_v51 = vld [vmem:[#allocation2 + $0xf0] ss:$8 sps:$4 sm:$0xff]  }
 0x173   :  { %1122 = vmatpush1.bf16.msra.mxu0 %v2951_v11  ;;  %4592 = vst [vmem:[#allocation77_spill] sm:$0xff] %v3290_v51  ;;  %v3293_v11 = vld [vmem:[#allocation2 + $0xe4] ss:$8 sps:$4 sm:$0xff]  }
 0x174   :  { %1123 = vmatprep.subr.bf16.mxu0 %v2957_v12  ;;  %4593 = vst [vmem:[#allocation78_spill] sm:$0xff] %v3293_v11  ;;  %v3298_v12 = vld [vmem:[#allocation2 + $0xe0] ss:$8 sps:$4 sm:$0xff]  }
 0x175   :  { %1079 = vmatpush1.bf16.msra.mxu1 %v3229_v0  ;;  %4594 = vst [vmem:[#allocation79_spill] sm:$0xff] %v3298_v12 }
 0x176   :  { %1080 = vmatprep.subr.bf16.mxu1 %v3232_v7 }
 0x177   :  { %1124 = vmatpush1.bf16.msra.mxu0 %v2963_v13  ;;  %v3301_v13 = vld [vmem:[#allocation2 + $0xd4] ss:$8 sps:$4 sm:$0xff]  }
 0x178   :  { %1125 = vmatprep.subr.bf16.mxu0 %v2969_v14  ;;  %4595 = vst [vmem:[#allocation80_spill] sm:$0xff] %v3301_v13  ;;  %v3306_v14 = vld [vmem:[#allocation2 + $0xd0] ss:$8 sps:$4 sm:$0xff]  }
 0x179   :  { %1081 = vmatpush1.bf16.msra.mxu1 %v3241_v24  ;;  %4596 = vst [vmem:[#allocation81_spill] sm:$0xff] %v3306_v14 }
 0x17a   :  { %1082 = vmatprep.subr.bf16.mxu1 %v3244_v59 }
 0x17b   :  { %1126 = vmatpush1.bf16.msra.mxu0 %v2975_v15  ;;  %v3309_v15 = vld [vmem:[#allocation2 + $0xc4] ss:$8 sps:$4 sm:$0xff]  }
 0x17c   :  { %1127 = vmatprep.subr.bf16.mxu0 %v2981_v16  ;;  %4597 = vst [vmem:[#allocation82_spill] sm:$0xff] %v3309_v15  ;;  %v3314_v16 = vld [vmem:[#allocation2 + $0xc0] ss:$8 sps:$4 sm:$0xff]  }
 0x17d   :  { %1083 = vmatpush1.bf16.msra.mxu1 %v3253_v6  ;;  %4598 = vst [vmem:[#allocation83_spill] sm:$0xff] %v3314_v16 }
 0x17e   :  { %1084 = vmatprep.subr.bf16.mxu1 %v3256_v55 }
 0x17f   :  { %1128 = vmatpush1.bf16.msra.mxu0 %v2987_v17 }
 0x180   :  { %1129 = vmatprep.subr.bf16.mxu0 %v2993_v18 }
 0x181   :  { %1085 = vmatpush1.bf16.msra.mxu1 %v3263_v60 }
 0x182   :  { %1086 = vmatprep.subr.bf16.mxu1 %v3269_v48 }
 0x183   :  { %1130 = vmatpush1.bf16.msra.mxu0 %v2999_v19 }
 0x184   :  { %1131 = vmatprep.subr.bf16.mxu0 %v3005_v20 }
 0x185   :  { %1087 = vmatpush1.bf16.msra.mxu1 %v3274_v56 }
 0x186   :  { %1088 = vmatprep.subr.bf16.mxu1 %v3277_v1 }
 0x187   :  { %1132 = vmatpush1.bf16.msra.mxu0 %v3011_v21 }
 0x188   :  { %1133 = vmatprep.subr.bf16.mxu0 %v3017_v22  ;;  %v3330_v22 = vld [vmem:[#allocation2 + $0xb4] ss:$8 sps:$4 sm:$0xff]  }
 0x189   :  { %1089 = vmatpush1.bf16.msra.mxu1 %v3282_v2  ;;  %4599 = vst [vmem:[#allocation84_spill] sm:$0xff] %v3330_v22 }
 0x18a   :  { %1090 = vmatprep.subr.bf16.mxu1 %v3285_v4 }
 0x18b   :  { %1134 = vmatpush1.bf16.msra.mxu0 %v3027_v27  ;;  %v3332_v27 = vld [vmem:[#allocation2 + $0xb0] ss:$8 sps:$4 sm:$0xff]  }
 0x18c   :  { %1135 = vmatprep.subr.bf16.mxu0 %v3035_v30  ;;  %4600 = vst [vmem:[#allocation85_spill] sm:$0xff] %v3332_v27 }
 0x18d   :  { %1091 = vmatpush2.bf16.msra.mxu1 %v3290_v51 }
 0x18e   :  { %1092 = vmatprep.subr.bf16.mxu1 %v3293_v11 }
 0x18f   :  { %1136 = vmatpush1.bf16.msra.mxu0 %v3048_v33 }
 0x190   :  { %1137 = vmatprep.subr.bf16.mxu0 %v3054_v34 }
 0x191   :  { %1093 = vmatpush2.bf16.msra.mxu1 %v3298_v12 }
 0x192   :  { %1094 = vmatprep.subr.bf16.mxu1 %v3301_v13 }
 0x193   :  { %1138 = vmatpush2.bf16.msra.mxu0 %v3066_v37 }
 0x194   :  { %1139 = vmatprep.subr.bf16.mxu0 %v3072_v38  ;;  %v3338_v38 = vld [vmem:[#allocation2 + $0xa4] ss:$8 sps:$4 sm:$0xff]  }
 0x195   :  { %1095 = vmatpush2.bf16.msra.mxu1 %v3306_v14  ;;  %4601 = vst [vmem:[#allocation86_spill] sm:$0xff] %v3338_v38 }
 0x196   :  { %1096 = vmatprep.subr.bf16.mxu1 %v3309_v15 }
 0x197   :  { %1140 = vmatpush2.bf16.msra.mxu0 %v3084_v41  ;;  %v3340_v41 = vld [vmem:[#allocation2 + $0xa0] ss:$8 sps:$4 sm:$0xff]  }
 0x198   :  { %1141 = vmatprep.subr.bf16.mxu0 %v3090_v42  ;;  %4602 = vst [vmem:[#allocation87_spill] sm:$0xff] %v3340_v41 }
 0x199   :  { %1097 = vmatpush2.bf16.msra.mxu1 %v3314_v16 }
 0x19a   :  { %1098 = vmatprep.subr.bf16.mxu1 %v3330_v22 }
 0x19b   :  { %1142 = vmatpush2.bf16.msra.mxu0 %v3102_v45  ;;  %v3348_v45 = vld [vmem:[#allocation2 + $0x90] ss:$8 sps:$4 sm:$0xff]  }
 0x19c   :  { %1143 = vmatprep.subr.bf16.mxu0 %v3108_v46  ;;  %v3346_v46 = vld [vmem:[#allocation2 + $0x94] ss:$8 sps:$4 sm:$0xff]   ;;  %4604 = vst [vmem:[#allocation89_spill] sm:$0xff] %v3348_v45 }
 0x19d   :  { %1099 = vmatpush2.bf16.msra.mxu1 %v3332_v27  ;;  %4603 = vst [vmem:[#allocation88_spill] sm:$0xff] %v3346_v46 }
 0x19e   :  { %1100 = vmatprep.subr.bf16.mxu1 %v3338_v38 }
 0x19f   :  { %1144 = vmatpush2.bf16.msra.mxu0 %v3120_v49  ;;  %v3356_v49 = vld [vmem:[#allocation2 + $0x80] ss:$8 sps:$4 sm:$0xff]  }
 0x1a0   :  { %1145 = vmatprep.subr.bf16.mxu0 %v3126_v50  ;;  %v3354_v50 = vld [vmem:[#allocation2 + $0x84] ss:$8 sps:$4 sm:$0xff]   ;;  %4606 = vst [vmem:[#allocation91_spill] sm:$0xff] %v3356_v49 }
 0x1a1   :  { %1101 = vmatpush2.bf16.msra.mxu1 %v3340_v41  ;;  %4605 = vst [vmem:[#allocation90_spill] sm:$0xff] %v3354_v50 }
 0x1a2   :  { %1102 = vmatprep.subr.bf16.mxu1 %v3346_v46 }
 0x1a3   :  { %1146 = vmatpush2.bf16.msra.mxu0 %v3138_v53  ;;  %v2312_v53 = vld [vmem:[%s4260_s0 + $0x4] sm:$0xf] }
 0x1a4   :  { %1147 = vmatprep.subr.bf16.mxu0 %v3144_v54 }
 0x1a5   :  { %1103 = vmatpush2.bf16.msra.mxu1 %v3348_v45 }
 0x1a6   :  { %1104 = vmatprep.subr.bf16.mxu1 %v3354_v50 }
 0x1a7   :  { %1148 = vmatpush2.bf16.msra.mxu0 %v3156_v57 }
 0x1a8   :  { %1149 = vmatprep.subr.bf16.mxu0 %v3162_v58 }
 0x1a9   :  { %1105 = vmatpush2.bf16.msra.mxu1 %v3356_v49 }
 0x1aa   :  { %1190 = vmatprep.subr.bf16.mxu1 %v3019_v25 }
 0x1ab   :  { %1150 = vmatpush2.bf16.msra.mxu0 %v3174_v61 }
 0x1ac   :  { %1151 = vmatprep.subr.bf16.mxu0 %v3180_v62 }
 0x1af   :  { %1152 = vmatpush2.bf16.msra.mxu0 %v3185_v63 }
 0x1b0   :  { %1231 = vmatprep.subr.bf16.mxu0 %v3193_v5 }
 0x22c   :  { %v614_v57 = vpop.f32.mrf.mxu1 }
 0x22e   :  { %v616_v58 = vpop.f32.mrf.mxu1 }
 0x22f   :  { %v623_v54 = vcombine.low %v614_v57, %v616_v58  ;;  %v4611_v57 = vld [vmem:[#allocation45_spill] sm:$0xff]  ;;  %v4612_v58 = vld [vmem:[#allocation48_spill] sm:$0xff] }
 0x230   :  { %v618_v42 = vpop.f32.mrf.mxu1 }
 0x231   :  { %v630_v61 = vrot.slane %v623_v54, %v2922_v28  ;;  %v4608_v42 = vld [vmem:[#allocation40_spill] sm:$0xff] }
 0x232   :  { %v619_v37 = vpop.f32.mrf.mxu1  ;;  %v4610_v54 = vld [vmem:[#allocation44_spill] sm:$0xff] }
 0x233   :  { %v632_v34 = vadd.f32 %v2312_v53, %v630_v61  ;;  %v3374_v37 = vpop.f32.mrf.mxu0  ;;  %v4609_v53 = vld [vmem:[#allocation41_spill] sm:$0xff] }
 0x234   :  { %v4613_v61 = vld [vmem:[#allocation49_spill] sm:$0xff] }
 0x235   :  { %v633_v33 = vmax.f32 %v632_v34, 0.0  ;;  %v4607_v34 = vld [vmem:[#allocation37_spill] sm:$0xff] }
 0x237   :  { %v641_v62 = vrot.slane %v633_v33, %v2922_v28 }
 0x239   :  { %v642_v30 = vcombine.high %v641_v62, %v641_v62  ;;  %v645_v63 = vpack.c.bf16 %v641_v62, %v641_v62  ;;  %v4614_v62 = vld [vmem:[#allocation53_spill] sm:$0xff] }
 0x23b   :  { %v646_v21 = vpack.c.bf16 %v642_v30, %v642_v30 }
 0x23d   :  { %1106 = vmatprep.mubr.bf16.mxu1 %v646_v21  ;;  %1153 = vmatprep.mubr.bf16.mxu0 %v646_v21  ;;  %v3380_v21 = vpop.f32.mrf.mxu0 }
 0x23e   :  { %1107 = vmatmul.mubr.bf16.vlgmr.msra.gmra.mxu1 %v645_v63  ;;  %1154 = vmatmul.mubr.bf16.vlgmr.msra.gmra.mxu0 %v645_v63  ;;  %v4615_v63 = vld [vmem:[#allocation54_spill] sm:$0xff] }
 0x23f   :  { %1191 = vmatpush1.bf16.msra.mxu1 %v3021_v26  ;;  %1232 = vmatpush1.bf16.msra.mxu0 %v3204_v8  ;;  %v911_v30 = vpop.f32.mrf.mxu0 }
 0x240   :  { %1192 = vmatprep.subr.bf16.mxu1 %v3029_v29  ;;  %1233 = vmatprep.subr.bf16.mxu0 %v3207_v9  ;;  %v4616_v30 = vld [vmem:[#allocation55_spill] sm:$0xff] }
 0x241   :  { %v912_v33 = vpop.f32.mrf.mxu0 }
 0x242   :  { %v4617_v33 = vld [vmem:[#allocation56_spill] sm:$0xff] }
 0x243   :  { %1193 = vmatpush1.bf16.msra.mxu1 %v3039_v31  ;;  %1234 = vmatpush1.bf16.msra.mxu0 %v3217_v23 }
 0x244   :  { %1194 = vmatprep.subr.bf16.mxu1 %v3042_v32  ;;  %1235 = vmatprep.subr.bf16.mxu0 %v3220_v3 }
 0x247   :  { %1195 = vmatpush1.bf16.msra.mxu1 %v3057_v35  ;;  %1236 = vmatpush1.bf16.msra.mxu0 %v3229_v0 }
 0x248   :  { %1196 = vmatprep.subr.bf16.mxu1 %v3060_v36  ;;  %1237 = vmatprep.subr.bf16.mxu0 %v3232_v7 }
 0x24b   :  { %1197 = vmatpush1.bf16.msra.mxu1 %v3075_v39  ;;  %1238 = vmatpush1.bf16.msra.mxu0 %v3241_v24 }
 0x24c   :  { %1198 = vmatprep.subr.bf16.mxu1 %v3078_v40  ;;  %1239 = vmatprep.subr.bf16.mxu0 %v3244_v59 }
 0x24f   :  { %1199 = vmatpush1.bf16.msra.mxu1 %v3093_v43  ;;  %1240 = vmatpush1.bf16.msra.mxu0 %v3253_v6 }
 0x250   :  { %1200 = vmatprep.subr.bf16.mxu1 %v3096_v44  ;;  %1241 = vmatprep.subr.bf16.mxu0 %v3256_v55 }
 0x253   :  { %1201 = vmatpush1.bf16.msra.mxu1 %v3111_v47  ;;  %1242 = vmatpush1.bf16.msra.mxu0 %v3263_v60  ;;  %v4627_v60 = vld [vmem:[#allocation17_spill] sm:$0xff] }
 0x254   :  { %1202 = vmatprep.subr.bf16.mxu1 %v4607_v34  ;;  %1243 = vmatprep.subr.bf16.mxu0 %v3269_v48 }
 0x257   :  { %1203 = vmatpush1.bf16.msra.mxu1 %v4608_v42  ;;  %1244 = vmatpush1.bf16.msra.mxu0 %v3274_v56 }
 0x258   :  { %1204 = vmatprep.subr.bf16.mxu1 %v4609_v53  ;;  %1245 = vmatprep.subr.bf16.mxu0 %v3277_v1 }
 0x25b   :  { %1205 = vmatpush1.bf16.msra.mxu1 %v4610_v54  ;;  %1246 = vmatpush1.bf16.msra.mxu0 %v3282_v2  ;;  %v4626_v2 = vld [vmem:[#allocation16_spill] sm:$0xff] }
 0x25c   :  { %1206 = vmatprep.subr.bf16.mxu1 %v4611_v57  ;;  %1247 = vmatprep.subr.bf16.mxu0 %v3285_v4 }
 0x25f   :  { %1207 = vmatpush2.bf16.msra.mxu1 %v4612_v58  ;;  %1248 = vmatpush2.bf16.msra.mxu0 %v3290_v51  ;;  %v4618_v51 = vld [vmem:[#allocation57_spill] sm:$0xff] }
 0x260   :  { %1208 = vmatprep.subr.bf16.mxu1 %v4613_v61  ;;  %1249 = vmatprep.subr.bf16.mxu0 %v3293_v11  ;;  %v4619_v11 = vld [vmem:[#allocation58_spill] sm:$0xff] }
 0x263   :  { %1209 = vmatpush2.bf16.msra.mxu1 %v4614_v62  ;;  %1250 = vmatpush2.bf16.msra.mxu0 %v3298_v12  ;;  %v4620_v12 = vld [vmem:[#allocation59_spill] sm:$0xff] }
 0x264   :  { %1210 = vmatprep.subr.bf16.mxu1 %v4615_v63  ;;  %1251 = vmatprep.subr.bf16.mxu0 %v3301_v13  ;;  %v4621_v13 = vld [vmem:[#allocation60_spill] sm:$0xff] }
 0x267   :  { %1211 = vmatpush2.bf16.msra.mxu1 %v4616_v30  ;;  %1252 = vmatpush2.bf16.msra.mxu0 %v3306_v14  ;;  %v4622_v14 = vld [vmem:[#allocation62_spill] sm:$0xff] }
 0x268   :  { %1212 = vmatprep.subr.bf16.mxu1 %v4617_v33  ;;  %1253 = vmatprep.subr.bf16.mxu0 %v3309_v15  ;;  %v4623_v15 = vld [vmem:[#allocation63_spill] sm:$0xff] }
 0x26b   :  { %1213 = vmatpush2.bf16.msra.mxu1 %v4618_v51  ;;  %1254 = vmatpush2.bf16.msra.mxu0 %v3314_v16  ;;  %v4624_v16 = vld [vmem:[#allocation66_spill] sm:$0xff] }
 0x26c   :  { %1214 = vmatprep.subr.bf16.mxu1 %v4619_v11  ;;  %1255 = vmatprep.subr.bf16.mxu0 %v3330_v22  ;;  %v4625_v22 = vld [vmem:[#allocation67_spill] sm:$0xff] }
 0x26f   :  { %1215 = vmatpush2.bf16.msra.mxu1 %v4620_v12  ;;  %1256 = vmatpush2.bf16.msra.mxu0 %v3332_v27 }
 0x270   :  { %1216 = vmatprep.subr.bf16.mxu1 %v4621_v13  ;;  %1257 = vmatprep.subr.bf16.mxu0 %v3338_v38 }
 0x273   :  { %1217 = vmatpush2.bf16.msra.mxu1 %v4622_v14  ;;  %1258 = vmatpush2.bf16.msra.mxu0 %v3340_v41 }
 0x274   :  { %1218 = vmatprep.subr.bf16.mxu1 %v4623_v15  ;;  %1259 = vmatprep.subr.bf16.mxu0 %v3346_v46 }
 0x277   :  { %1219 = vmatpush2.bf16.msra.mxu1 %v4624_v16  ;;  %1260 = vmatpush2.bf16.msra.mxu0 %v3348_v45 }
 0x278   :  { %1220 = vmatprep.subr.bf16.mxu1 %v4625_v22  ;;  %1261 = vmatprep.subr.bf16.mxu0 %v3354_v50  ;;  %v2409_v50 = vld [vmem:[%s4260_s0 + $0x8] sm:$0xf] }
 0x27b   :  { %1221 = vmatpush2.bf16.msra.mxu1 %v3259_v52  ;;  %1262 = vmatpush2.bf16.msra.mxu0 %v3356_v49 }
 0x27c   :  { %1278 = vmatprep.subr.bf16.mxu1 %v2946_v10  ;;  %1347 = vmatprep.subr.bf16.mxu0 %v3019_v25 }
 0x2fe   :  { %v1108_v41 = vpop.f32.mrf.mxu1  ;;  %v1155_v38 = vpop.f32.mrf.mxu0 }
 0x2ff   :  { %v1109_v46 = vadd.f32 %v1108_v41, %v3374_v37 }
 0x300   :  { %v1110_v27 = vpop.f32.mrf.mxu1  ;;  %v1157_v4 = vpop.f32.mrf.mxu0 }
 0x301   :  { %v1115_v45 = vadd.f32 %v1109_v46, %v4626_v2  ;;  %v1111_v1 = vadd.f32 %v1110_v27, %v3380_v21  ;;  %v1164_v56 = vcombine.low %v1155_v38, %v1157_v4  ;;  %v4628_v38 = vld [vmem:[#allocation18_spill] sm:$0xff] }
 0x302   :  { %v1112_v49 = vpop.f32.mrf.mxu1  ;;  %v1159_v48 = vpop.f32.mrf.mxu0  ;;  %v4652_v21 = vld [vmem:[#allocation50_spill] sm:$0xff] }
 0x303   :  { %v1116_v55 = vadd.f32 %v1111_v1, %v4627_v60  ;;  %v1171_v25 = vrot.slane %v1164_v56, %v2922_v28  ;;  %v1117_v6 = vmax.f32 %v1115_v45, 0.0  ;;  %v4629_v48 = vld [vmem:[#allocation19_spill] sm:$0xff]  ;;  %v4630_v56 = vld [vmem:[#allocation20_spill] sm:$0xff] }
 0x304   :  { %v1113_v59 = vpop.f32.mrf.mxu1  ;;  %v1160_v41 = vpop.f32.mrf.mxu0  ;;  %v4633_v45 = vld [vmem:[#allocation23_spill] sm:$0xff] }
 0x305   :  { %v1118_v37 = vmax.f32 %v1116_v55, 0.0  ;;  %v1173_v24 = vadd.f32 %v2409_v50, %v1171_v25  ;;  %v1188_v2 = vpack.c.bf16 %v1117_v6, %v1117_v6  ;;  %v4631_v25 = vld [vmem:[#allocation21_spill] sm:$0xff]  ;;  %v4646_v50 = vld [vmem:[#allocation38_spill] sm:$0xff]  ;;  %v4647_v55 = vld [vmem:[#allocation39_spill] sm:$0xff] }
 0x306   :  { %v4648_v59 = vld [vmem:[#allocation42_spill] sm:$0xff]  ;;  %v4649_v6 = vld [vmem:[#allocation43_spill] sm:$0xff] }
 0x307   :  { %v1189_v7 = vpack.c.bf16 %v1118_v37, %v1118_v37  ;;  %v1174_v46 = vmax.f32 %v1173_v24, 0.0  ;;  %v4632_v24 = vld [vmem:[#allocation22_spill] sm:$0xff]  ;;  %v4653_v41 = vld [vmem:[#allocation51_spill] sm:$0xff]  ;;  %v4654_v37 = vld [vmem:[#allocation52_spill] sm:$0xff] }
 0x309   :  { %v1182_v27 = vrot.slane %v1174_v46, %v2922_v28  ;;  %1222 = vmatprep.mubr.bf16.mxu1 %v1189_v7  ;;  %v4650_v7 = vld [vmem:[#allocation46_spill] sm:$0xff]  ;;  %v4655_v46 = vld [vmem:[#allocation61_spill] sm:$0xff] }
 0x30a   :  { %1223 = vmatmul.mubr.bf16.vlgmr.msra.gmra.mxu1 %v1188_v2  ;;  %v4651_v2 = vld [vmem:[#allocation47_spill] sm:$0xff] }
 0x30b   :  { %1279 = vmatpush1.bf16.msra.mxu1 %v4628_v38  ;;  %v1183_v49 = vcombine.high %v1182_v27, %v1182_v27  ;;  %v1186_v4 = vpack.c.bf16 %v1182_v27, %v1182_v27  ;;  %v4656_v27 = vld [vmem:[#allocation64_spill] sm:$0xff]  ;;  %v4657_v38 = vld [vmem:[#allocation65_spill] sm:$0xff] }
 0x30c   :  { %1280 = vmatprep.subr.bf16.mxu1 %v4629_v48  ;;  %v4659_v48 = vld [vmem:[#allocation69_spill] sm:$0xff] }
 0x30d   :  { %v1187_v1 = vpack.c.bf16 %v1183_v49, %v1183_v49  ;;  %v4658_v49 = vld [vmem:[#allocation68_spill] sm:$0xff] }
 0x30f   :  { %1281 = vmatpush1.bf16.msra.mxu1 %v4630_v56  ;;  %1263 = vmatprep.mubr.bf16.mxu0 %v1187_v1  ;;  %v4663_v56 = vld [vmem:[#allocation74_spill] sm:$0xff] }
 0x310   :  { %1310 = vmatprep.mubr.bf16.mxu1 %v1187_v1  ;;  %1264 = vmatmul.mubr.bf16.vlgmr.msra.gmra.mxu0 %v1186_v4  ;;  %v4660_v1 = vld [vmem:[#allocation71_spill] sm:$0xff] }
 0x311   :  { %1282 = vmatprep.subr.bf16.mxu1 %v4631_v25  ;;  %1348 = vmatpush1.bf16.msra.mxu0 %v3021_v26  ;;  %v4634_v26 = vld [vmem:[#allocation24_spill] sm:$0xff]  ;;  %v4664_v25 = vld [vmem:[#allocation75_spill] sm:$0xff] }
 0x312   :  { %1349 = vmatprep.subr.bf16.mxu0 %v3029_v29  ;;  %v4635_v29 = vld [vmem:[#allocation25_spill] sm:$0xff] }
 0x313   :  { %1283 = vmatpush1.bf16.msra.mxu1 %v4632_v24  ;;  %v4665_v24 = vld [vmem:[#allocation76_spill] sm:$0xff] }
 0x314   :  { %1284 = vmatprep.subr.bf16.mxu1 %v4633_v45  ;;  %v4666_v45 = vld [vmem:[#allocation77_spill] sm:$0xff] }
 0x315   :  { %1350 = vmatpush1.bf16.msra.mxu0 %v3039_v31  ;;  %v4640_v31 = vld [vmem:[#allocation31_spill] sm:$0xff] }
 0x316   :  { %1351 = vmatprep.subr.bf16.mxu0 %v3042_v32  ;;  %v4641_v32 = vld [vmem:[#allocation32_spill] sm:$0xff] }
 0x317   :  { %1285 = vmatpush1.bf16.msra.mxu1 %v2987_v17  ;;  %v4636_v17 = vld [vmem:[#allocation27_spill] sm:$0xff] }
 0x318   :  { %1286 = vmatprep.subr.bf16.mxu1 %v2993_v18  ;;  %v4637_v18 = vld [vmem:[#allocation28_spill] sm:$0xff] }
 0x319   :  { %1352 = vmatpush1.bf16.msra.mxu0 %v3057_v35  ;;  %v4642_v35 = vld [vmem:[#allocation33_spill] sm:$0xff] }
 0x31a   :  { %1353 = vmatprep.subr.bf16.mxu0 %v3060_v36  ;;  %v4643_v36 = vld [vmem:[#allocation34_spill] sm:$0xff] }
 0x31b   :  { %1287 = vmatpush1.bf16.msra.mxu1 %v2999_v19  ;;  %v4638_v19 = vld [vmem:[#allocation29_spill] sm:$0xff] }
 0x31c   :  { %1288 = vmatprep.subr.bf16.mxu1 %v3005_v20  ;;  %v4639_v20 = vld [vmem:[#allocation30_spill] sm:$0xff] }
 0x31d   :  { %1354 = vmatpush1.bf16.msra.mxu0 %v3075_v39  ;;  %v4644_v39 = vld [vmem:[#allocation35_spill] sm:$0xff] }
 0x31e   :  { %1355 = vmatprep.subr.bf16.mxu0 %v3078_v40  ;;  %v4645_v40 = vld [vmem:[#allocation36_spill] sm:$0xff] }
 0x31f   :  { %1289 = vmatpush1.bf16.msra.mxu1 %v4634_v26  ;;  %v4667_v26 = vld [vmem:[#allocation78_spill] sm:$0xff] }
 0x320   :  { %1290 = vmatprep.subr.bf16.mxu1 %v4635_v29  ;;  %v4668_v29 = vld [vmem:[#allocation79_spill] sm:$0xff] }
 0x321   :  { %1356 = vmatpush1.bf16.msra.mxu0 %v3093_v43 }
 0x322   :  { %1357 = vmatprep.subr.bf16.mxu0 %v3096_v44 }
 0x323   :  { %1291 = vmatpush1.bf16.msra.mxu1 %v4636_v17 }
 0x324   :  { %1292 = vmatprep.subr.bf16.mxu1 %v4637_v18 }
 0x325   :  { %1358 = vmatpush1.bf16.msra.mxu0 %v3111_v47 }
 0x326   :  { %1359 = vmatprep.subr.bf16.mxu0 %v4607_v34 }
 0x327   :  { %1293 = vmatpush1.bf16.msra.mxu1 %v4638_v19 }
 0x328   :  { %1294 = vmatprep.subr.bf16.mxu1 %v4639_v20 }
 0x329   :  { %1360 = vmatpush1.bf16.msra.mxu0 %v4608_v42 }
 0x32a   :  { %1361 = vmatprep.subr.bf16.mxu0 %v4609_v53 }
 0x32b   :  { %1295 = vmatpush2.bf16.msra.mxu1 %v4640_v31 }
 0x32c   :  { %1296 = vmatprep.subr.bf16.mxu1 %v4641_v32 }
 0x32d   :  { %1362 = vmatpush1.bf16.msra.mxu0 %v4610_v54 }
 0x32e   :  { %1363 = vmatprep.subr.bf16.mxu0 %v4611_v57 }
 0x32f   :  { %1297 = vmatpush2.bf16.msra.mxu1 %v4642_v35 }
 0x330   :  { %1298 = vmatprep.subr.bf16.mxu1 %v4643_v36 }
 0x331   :  { %1364 = vmatpush2.bf16.msra.mxu0 %v4612_v58 }
 0x332   :  { %1365 = vmatprep.subr.bf16.mxu0 %v4613_v61 }
 0x333   :  { %1299 = vmatpush2.bf16.msra.mxu1 %v4644_v39 }
 0x334   :  { %1300 = vmatprep.subr.bf16.mxu1 %v4645_v40 }
 0x335   :  { %1366 = vmatpush2.bf16.msra.mxu0 %v4614_v62 }
 0x336   :  { %1367 = vmatprep.subr.bf16.mxu0 %v4615_v63 }
 0x337   :  { %1301 = vmatpush2.bf16.msra.mxu1 %v4646_v50 }
 0x338   :  { %1302 = vmatprep.subr.bf16.mxu1 %v4647_v55 }
 0x339   :  { %1368 = vmatpush2.bf16.msra.mxu0 %v4616_v30  ;;  %v4679_v30 = vld [vmem:[#allocation90_spill] sm:$0xff] }
 0x33a   :  { %1369 = vmatprep.subr.bf16.mxu0 %v4617_v33  ;;  %v4678_v33 = vld [vmem:[#allocation89_spill] sm:$0xff] }
 0x33b   :  { %1303 = vmatpush2.bf16.msra.mxu1 %v4648_v59 }
 0x33c   :  { %1304 = vmatprep.subr.bf16.mxu1 %v4649_v6 }
 0x33d   :  { %1370 = vmatpush2.bf16.msra.mxu0 %v4618_v51  ;;  %v4677_v51 = vld [vmem:[#allocation88_spill] sm:$0xff] }
 0x33e   :  { %1371 = vmatprep.subr.bf16.mxu0 %v4619_v11  ;;  %v4676_v11 = vld [vmem:[#allocation87_spill] sm:$0xff] }
 0x33f   :  { %1305 = vmatpush2.bf16.msra.mxu1 %v4650_v7 }
 0x340   :  { %1306 = vmatprep.subr.bf16.mxu1 %v4651_v2 }
 0x341   :  { %1372 = vmatpush2.bf16.msra.mxu0 %v4620_v12  ;;  %v4675_v12 = vld [vmem:[#allocation86_spill] sm:$0xff] }
 0x342   :  { %1373 = vmatprep.subr.bf16.mxu0 %v4621_v13  ;;  %v4674_v13 = vld [vmem:[#allocation85_spill] sm:$0xff] }
 0x343   :  { %1307 = vmatpush2.bf16.msra.mxu1 %v4652_v21 }
 0x344   :  { %1308 = vmatprep.subr.bf16.mxu1 %v4653_v41 }
 0x345   :  { %1374 = vmatpush2.bf16.msra.mxu0 %v4622_v14  ;;  %v4673_v14 = vld [vmem:[#allocation84_spill] sm:$0xff] }
 0x346   :  { %1375 = vmatprep.subr.bf16.mxu0 %v4623_v15  ;;  %v4672_v15 = vld [vmem:[#allocation83_spill] sm:$0xff] }
 0x347   :  { %1309 = vmatpush2.bf16.msra.mxu1 %v4654_v37 }
 0x348   :  { %1388 = vmatprep.subr.bf16.mxu1 %v3193_v5 }
 0x349   :  { %1376 = vmatpush2.bf16.msra.mxu0 %v4624_v16  ;;  %v4671_v16 = vld [vmem:[#allocation82_spill] sm:$0xff] }
 0x34a   :  { %1311 = vmatmul.mubr.bf16.vlgmr.msra.gmra.mxu1 %v1186_v4  ;;  %1377 = vmatprep.subr.bf16.mxu0 %v4625_v22  ;;  %v4661_v4 = vld [vmem:[#allocation72_spill] sm:$0xff]  ;;  %v4670_v22 = vld [vmem:[#allocation81_spill] sm:$0xff] }
 0x34b   :  { %1389 = vmatpush1.bf16.msra.mxu1 %v3204_v8 }
 0x34c   :  { %1390 = vmatprep.subr.bf16.mxu1 %v3207_v9 }
 0x34d   :  { %1378 = vmatpush2.bf16.msra.mxu0 %v3259_v52  ;;  %v4669_v52 = vld [vmem:[#allocation80_spill] sm:$0xff] }
 0x34e   :  { %1435 = vmatprep.subr.bf16.mxu0 %v2946_v10  ;;  %v4662_v10 = vld [vmem:[#allocation73_spill] sm:$0xff] }
 0x34f   :  { %1391 = vmatpush1.bf16.msra.mxu1 %v3217_v23 }
 0x350   :  { %1392 = vmatprep.subr.bf16.mxu1 %v3220_v3 }
 0x353   :  { %1393 = vmatpush1.bf16.msra.mxu1 %v3229_v0 }
 0x354   :  { %1394 = vmatprep.subr.bf16.mxu1 %v4655_v46 }
 0x357   :  { %1395 = vmatpush1.bf16.msra.mxu1 %v4656_v27 }
 0x358   :  { %1396 = vmatprep.subr.bf16.mxu1 %v4657_v38 }
 0x35b   :  { %1397 = vmatpush1.bf16.msra.mxu1 %v4658_v49 }
 0x35c   :  { %1398 = vmatprep.subr.bf16.mxu1 %v4659_v48 }
 0x35f   :  { %1399 = vmatpush1.bf16.msra.mxu1 %v4660_v1 }
 0x360   :  { %1400 = vmatprep.subr.bf16.mxu1 %v4661_v4 }
 0x363   :  { %1401 = vmatpush1.bf16.msra.mxu1 %v4662_v10 }
 0x364   :  { %1402 = vmatprep.subr.bf16.mxu1 %v4663_v56 }
 0x367   :  { %1403 = vmatpush1.bf16.msra.mxu1 %v4664_v25 }
 0x368   :  { %1404 = vmatprep.subr.bf16.mxu1 %v4665_v24 }
 0x36b   :  { %1405 = vmatpush2.bf16.msra.mxu1 %v4666_v45 }
 0x36c   :  { %1406 = vmatprep.subr.bf16.mxu1 %v4667_v26 }
 0x36f   :  { %1407 = vmatpush2.bf16.msra.mxu1 %v4668_v29 }
 0x370   :  { %1408 = vmatprep.subr.bf16.mxu1 %v4669_v52  ;;  %v4680_v52 = vld [vmem:[#allocation91_spill] sm:$0xff] }
 0x373   :  { %1409 = vmatpush2.bf16.msra.mxu1 %v4670_v22  ;;  %v4681_v22 = vld [vmem:[#allocation26_spill] sm:$0xff] }
 0x374   :  { %1410 = vmatprep.subr.bf16.mxu1 %v4671_v16 }
 0x377   :  { %1411 = vmatpush2.bf16.msra.mxu1 %v4672_v15 }
 0x378   :  { %1412 = vmatprep.subr.bf16.mxu1 %v4673_v14 }
 0x37b   :  { %1413 = vmatpush2.bf16.msra.mxu1 %v4674_v13 }
 0x37c   :  { %1414 = vmatprep.subr.bf16.mxu1 %v4675_v12  ;;  %v4682_v12 = vld [vmem:[#allocation16_spill] sm:$0xff] }
 0x37f   :  { %1415 = vmatpush2.bf16.msra.mxu1 %v4676_v11 }
 0x380   :  { %1416 = vmatprep.subr.bf16.mxu1 %v4677_v51 }
 0x383   :  { %1417 = vmatpush2.bf16.msra.mxu1 %v4678_v33 }
 0x384   :  { %1418 = vmatprep.subr.bf16.mxu1 %v4679_v30 }
 0x387   :  { %1419 = vmatpush2.bf16.msra.mxu1 %v4680_v52 }
 0x388   :  { %1504 = vmatprep.subr.bf16.mxu1 %v4681_v22  ;;  %v3578_v22 = vld [vmem:[%s4261_s1 + $0x44] ss:$8 sps:$4 sm:$0xff]  }
 0x3ca   :  { %v1224_v16 = vpop.f32.mrf.mxu1 }
 0x3cc   :  { %v1226_v15 = vpop.f32.mrf.mxu1 }
 0x3ce   :  { %v1228_v63 = vpop.f32.mrf.mxu1 }
 0x3cf   :  { %v3614_v63 = vld [vmem:[%s4261_s1 + $0x14] ss:$8 sps:$4 sm:$0xff]  }
 0x3d0   :  { %v1229_v14 = vpop.f32.mrf.mxu1  ;;  %v1265_v29 = vpop.f32.mrf.mxu0 }
 0x3d1   :  { %v1266_v13 = vadd.f32 %v1265_v29, %v1224_v16  ;;  %v3548_v14 = vld [vmem:[%s4261_s1 + $0x70] ss:$8 sps:$4 sm:$0xff]  }
 0x3d2   :  { %v1267_v62 = vpop.f32.mrf.mxu0  ;;  %v3572_v16 = vld [vmem:[%s4261_s1 + $0x50] ss:$8 sps:$4 sm:$0xff]  }
 0x3d3   :  { %v1272_v26 = vadd.f32 %v1266_v13, %v4682_v12  ;;  %v1268_v11 = vadd.f32 %v1267_v62, %v1226_v15  ;;  %v3554_v13 = vld [vmem:[%s4261_s1 + $0x64] ss:$8 sps:$4 sm:$0xff]   ;;  %v3566_v15 = vld [vmem:[%s4261_s1 + $0x54] ss:$8 sps:$4 sm:$0xff]   ;;  %v3608_v62 = vld [vmem:[%s4261_s1 + $0x20] ss:$8 sps:$4 sm:$0xff]  }
 0x3d4   :  { %v1269_v61 = vpop.f32.mrf.mxu0  ;;  %v4712_v29 = vld [vmem:[#allocation90_spill] sm:$0xff] }
 0x3d5   :  { %v1273_v51 = vadd.f32 %v1268_v11, %v4627_v60  ;;  %v1274_v33 = vmax.f32 %v1272_v26, 0.0  ;;  %v3560_v11 = vld [vmem:[%s4261_s1 + $0x60] ss:$8 sps:$4 sm:$0xff]   ;;  %v3602_v61 = vld [vmem:[%s4261_s1 + $0x24] ss:$8 sps:$4 sm:$0xff]   ;;  %v4711_v26 = vld [vmem:[#allocation67_spill] sm:$0xff] }
 0x3d6   :  { %v1270_v45 = vpop.f32.mrf.mxu0 }
 0x3d7   :  { %v1275_v30 = vmax.f32 %v1273_v51, 0.0  ;;  %v1345_v52 = vpack.c.bf16 %v1274_v33, %v1274_v33  ;;  %v3590_v51 = vld [vmem:[%s4261_s1 + $0x34] ss:$8 sps:$4 sm:$0xff]   ;;  %v4710_v45 = vld [vmem:[#allocation89_spill] sm:$0xff] }
 0x3d9   :  { %v1346_v58 = vpack.c.bf16 %v1275_v30, %v1275_v30 }
 0x3db   :  { %1379 = vmatprep.mubr.bf16.mxu0 %v1346_v58  ;;  %v3596_v58 = vld [vmem:[%s4261_s1 + $0x30] ss:$8 sps:$4 sm:$0xff]  }
 0x3dc   :  { %1380 = vmatmul.mubr.bf16.vlgmr.msra.gmra.mxu0 %v1345_v52  ;;  %v3584_v52 = vld [vmem:[%s4261_s1 + $0x40] ss:$8 sps:$4 sm:$0xff]  }
 0x3dd   :  { %1436 = vmatpush1.bf16.msra.mxu0 %v3548_v14 }
 0x3de   :  { %1437 = vmatprep.subr.bf16.mxu0 %v3554_v13 }
 0x3e1   :  { %1438 = vmatpush1.bf16.msra.mxu0 %v3560_v11 }
 0x3e2   :  { %1439 = vmatprep.subr.bf16.mxu0 %v3566_v15 }
 0x3e5   :  { %1440 = vmatpush1.bf16.msra.mxu0 %v3572_v16 }
 0x3e6   :  { %1441 = vmatprep.subr.bf16.mxu0 %v3578_v22 }
 0x3e9   :  { %1442 = vmatpush1.bf16.msra.mxu0 %v3584_v52 }
 0x3ea   :  { %1443 = vmatprep.subr.bf16.mxu0 %v3590_v51 }
 0x3ed   :  { %1444 = vmatpush1.bf16.msra.mxu0 %v3596_v58 }
 0x3ee   :  { %1445 = vmatprep.subr.bf16.mxu0 %v3602_v61 }
 0x3f1   :  { %1446 = vmatpush1.bf16.msra.mxu0 %v3608_v62 }
 0x3f2   :  { %1447 = vmatprep.subr.bf16.mxu0 %v3614_v63 }
 0x3f5   :  { %1448 = vmatpush1.bf16.msra.mxu0 %v4636_v17 }
 0x3f6   :  { %1449 = vmatprep.subr.bf16.mxu0 %v4637_v18  ;;  %v2410_v18 = vld [vmem:[%s4260_s0 + $0xc] sm:$0xf] }
 0x3f9   :  { %1450 = vmatpush1.bf16.msra.mxu0 %v4638_v19 }
 0x3fa   :  { %1451 = vmatprep.subr.bf16.mxu0 %v4639_v20 }
 0x3fd   :  { %1452 = vmatpush2.bf16.msra.mxu0 %v4640_v31 }
 0x3fe   :  { %1453 = vmatprep.subr.bf16.mxu0 %v4641_v32 }
 0x401   :  { %1454 = vmatpush2.bf16.msra.mxu0 %v4642_v35 }
 0x402   :  { %1455 = vmatprep.subr.bf16.mxu0 %v4643_v36 }
 0x405   :  { %1456 = vmatpush2.bf16.msra.mxu0 %v4644_v39 }
 0x406   :  { %1457 = vmatprep.subr.bf16.mxu0 %v4645_v40 }
 0x409   :  { %1458 = vmatpush2.bf16.msra.mxu0 %v4646_v50 }
 0x40a   :  { %v1312_v30 = vpop.f32.mrf.mxu1  ;;  %1459 = vmatprep.subr.bf16.mxu0 %v4647_v55  ;;  %v3642_v55 = vld [vmem:[#allocation3 + $0x70] ss:$8 sps:$4 sm:$0xff]  }
 0x40c   :  { %v1314_v33 = vpop.f32.mrf.mxu1 }
 0x40d   :  { %v1321_v17 = vcombine.low %v1312_v30, %v1314_v33  ;;  %1460 = vmatpush2.bf16.msra.mxu0 %v4648_v59  ;;  %v3646_v59 = vld [vmem:[#allocation3 + $0x64] ss:$8 sps:$4 sm:$0xff]   ;;  %v4713_v30 = vld [vmem:[#allocation70_spill] sm:$0xff]  ;;  %v4714_v33 = vld [vmem:[#allocation91_spill] sm:$0xff] }
 0x40e   :  { %v1316_v19 = vpop.f32.mrf.mxu1  ;;  %1461 = vmatprep.subr.bf16.mxu0 %v4649_v6  ;;  %v3650_v6 = vld [vmem:[#allocation3 + $0x60] ss:$8 sps:$4 sm:$0xff]  }
 0x40f   :  { %v1328_v20 = vrot.slane %v1321_v17, %v2922_v28  ;;  %v3723_v17 = vld [vmem:[%s4261_s1 + $0x74] ss:$8 sps:$4 sm:$0xff]  }
 0x410   :  { %v1317_v31 = vpop.f32.mrf.mxu1  ;;  %4715 = vst [vmem:[#allocation41_spill] sm:$0xff] %v3723_v17 }
 0x411   :  { %v1330_v32 = vadd.f32 %v2410_v18, %v1328_v20  ;;  %1462 = vmatpush2.bf16.msra.mxu0 %v4650_v7  ;;  %v3658_v7 = vld [vmem:[#allocation3 + $0x50] ss:$8 sps:$4 sm:$0xff]   ;;  %v3726_v18 = vld [vmem:[#allocation3 + $0x74] ss:$8 sps:$4 sm:$0xff]  }
 0x412   :  { %1463 = vmatprep.subr.bf16.mxu0 %v4651_v2  ;;  %v4695_v2 = vld [vmem:[#allocation56_spill] sm:$0xff] }
 0x413   :  { %v1331_v35 = vmax.f32 %v1330_v32, 0.0 }
 0x415   :  { %v1339_v36 = vrot.slane %v1331_v35, %v2922_v28  ;;  %1464 = vmatpush2.bf16.msra.mxu0 %v4652_v21  ;;  %v4696_v21 = vld [vmem:[#allocation82_spill] sm:$0xff] }
 0x416   :  { %1465 = vmatprep.subr.bf16.mxu0 %v4653_v41  ;;  %v4697_v41 = vld [vmem:[#allocation57_spill] sm:$0xff] }
 0x417   :  { %v1340_v39 = vcombine.high %v1339_v36, %v1339_v36  ;;  %v1343_v50 = vpack.c.bf16 %v1339_v36, %v1339_v36 }
 0x419   :  { %1466 = vmatpush2.bf16.msra.mxu0 %v4654_v37  ;;  %v1344_v40 = vpack.c.bf16 %v1340_v39, %v1340_v39  ;;  %v4698_v37 = vld [vmem:[#allocation83_spill] sm:$0xff] }
 0x41a   :  { %1545 = vmatprep.subr.bf16.mxu0 %v3193_v5  ;;  %v3654_v5 = vld [vmem:[#allocation3 + $0x54] ss:$8 sps:$4 sm:$0xff]  }
 0x41b   :  { %1420 = vmatprep.mubr.bf16.mxu1 %v1344_v40  ;;  %1467 = vmatprep.mubr.bf16.mxu0 %v1344_v40 }
 0x41c   :  { %1421 = vmatmul.mubr.bf16.vlgmr.msra.gmra.mxu1 %v1343_v50  ;;  %1468 = vmatmul.mubr.bf16.vlgmr.msra.gmra.mxu0 %v1343_v50 }
 0x41d   :  { %1505 = vmatpush1.bf16.msra.mxu1 %v3642_v55  ;;  %1546 = vmatpush1.bf16.msra.mxu0 %v3204_v8  ;;  %v3662_v8 = vld [vmem:[#allocation3 + $0x44] ss:$8 sps:$4 sm:$0xff]  }
 0x41e   :  { %1506 = vmatprep.subr.bf16.mxu1 %v3646_v59  ;;  %1547 = vmatprep.subr.bf16.mxu0 %v3207_v9  ;;  %v3666_v9 = vld [vmem:[#allocation3 + $0x40] ss:$8 sps:$4 sm:$0xff]  }
 0x41f   :  { %4683 = vst [vmem:[#allocation37_spill] sm:$0xff] %v3666_v9 }
 0x421   :  { %1507 = vmatpush1.bf16.msra.mxu1 %v3650_v6  ;;  %1548 = vmatpush1.bf16.msra.mxu0 %v3217_v23  ;;  %v3670_v23 = vld [vmem:[#allocation3 + $0x34] ss:$8 sps:$4 sm:$0xff]  }
 0x422   :  { %1508 = vmatprep.subr.bf16.mxu1 %v3654_v5  ;;  %1549 = vmatprep.subr.bf16.mxu0 %v3220_v3  ;;  %4684 = vst [vmem:[#allocation40_spill] sm:$0xff] %v3670_v23  ;;  %v4688_v3 = vld [vmem:[#allocation78_spill] sm:$0xff] }
 0x425   :  { %1509 = vmatpush1.bf16.msra.mxu1 %v3658_v7  ;;  %1550 = vmatpush1.bf16.msra.mxu0 %v3229_v0  ;;  %v4689_v0 = vld [vmem:[#allocation53_spill] sm:$0xff] }
 0x426   :  { %1510 = vmatprep.subr.bf16.mxu1 %v3662_v8  ;;  %1551 = vmatprep.subr.bf16.mxu0 %v4655_v46  ;;  %v4699_v46 = vld [vmem:[#allocation58_spill] sm:$0xff] }
 0x429   :  { %1511 = vmatpush1.bf16.msra.mxu1 %v3666_v9  ;;  %1552 = vmatpush1.bf16.msra.mxu0 %v4656_v27  ;;  %v4700_v27 = vld [vmem:[#allocation84_spill] sm:$0xff] }
 0x42a   :  { %1512 = vmatprep.subr.bf16.mxu1 %v3670_v23  ;;  %1553 = vmatprep.subr.bf16.mxu0 %v4657_v38  ;;  %v4701_v38 = vld [vmem:[#allocation59_spill] sm:$0xff] }
 0x42d   :  { %1513 = vmatpush1.bf16.msra.mxu1 %v3093_v43  ;;  %1554 = vmatpush1.bf16.msra.mxu0 %v4658_v49  ;;  %v4685_v43 = vld [vmem:[#allocation48_spill] sm:$0xff]  ;;  %v4702_v49 = vld [vmem:[#allocation85_spill] sm:$0xff] }
 0x42e   :  { %1514 = vmatprep.subr.bf16.mxu1 %v3096_v44  ;;  %1555 = vmatprep.subr.bf16.mxu0 %v4659_v48  ;;  %v4686_v44 = vld [vmem:[#allocation77_spill] sm:$0xff]  ;;  %v4703_v48 = vld [vmem:[#allocation60_spill] sm:$0xff] }
 0x431   :  { %1515 = vmatpush1.bf16.msra.mxu1 %v3111_v47  ;;  %1556 = vmatpush1.bf16.msra.mxu0 %v4660_v1  ;;  %v4687_v47 = vld [vmem:[#allocation49_spill] sm:$0xff]  ;;  %v4704_v1 = vld [vmem:[#allocation86_spill] sm:$0xff] }
 0x432   :  { %1516 = vmatprep.subr.bf16.mxu1 %v4607_v34  ;;  %1557 = vmatprep.subr.bf16.mxu0 %v4661_v4  ;;  %v4690_v34 = vld [vmem:[#allocation79_spill] sm:$0xff]  ;;  %v4705_v4 = vld [vmem:[#allocation62_spill] sm:$0xff] }
 0x435   :  { %1517 = vmatpush1.bf16.msra.mxu1 %v4608_v42  ;;  %1558 = vmatpush1.bf16.msra.mxu0 %v4662_v10  ;;  %v4691_v42 = vld [vmem:[#allocation54_spill] sm:$0xff]  ;;  %v4706_v10 = vld [vmem:[#allocation87_spill] sm:$0xff] }
 0x436   :  { %1518 = vmatprep.subr.bf16.mxu1 %v4609_v53  ;;  %1559 = vmatprep.subr.bf16.mxu0 %v4663_v56  ;;  %v4692_v53 = vld [vmem:[#allocation80_spill] sm:$0xff]  ;;  %v4707_v56 = vld [vmem:[#allocation63_spill] sm:$0xff] }
 0x439   :  { %1519 = vmatpush1.bf16.msra.mxu1 %v4610_v54  ;;  %1560 = vmatpush1.bf16.msra.mxu0 %v4664_v25  ;;  %v4693_v54 = vld [vmem:[#allocation55_spill] sm:$0xff]  ;;  %v4708_v25 = vld [vmem:[#allocation88_spill] sm:$0xff] }
 0x43a   :  { %1520 = vmatprep.subr.bf16.mxu1 %v4611_v57  ;;  %1561 = vmatprep.subr.bf16.mxu0 %v4665_v24  ;;  %v4694_v57 = vld [vmem:[#allocation81_spill] sm:$0xff]  ;;  %v4709_v24 = vld [vmem:[#allocation66_spill] sm:$0xff] }
 0x43d   :  { %1521 = vmatpush2.bf16.msra.mxu1 %v4685_v43  ;;  %1562 = vmatpush2.bf16.msra.mxu0 %v4686_v44 }
 0x43e   :  { %1522 = vmatprep.subr.bf16.mxu1 %v4687_v47  ;;  %1563 = vmatprep.subr.bf16.mxu0 %v4688_v3  ;;  %v2411_v3 = vld [vmem:[%s4260_s0 + $0x10] sm:$0xf] }
 0x441   :  { %1523 = vmatpush2.bf16.msra.mxu1 %v4689_v0  ;;  %1564 = vmatpush2.bf16.msra.mxu0 %v4690_v34 }
 0x442   :  { %1524 = vmatprep.subr.bf16.mxu1 %v4691_v42  ;;  %1565 = vmatprep.subr.bf16.mxu0 %v4692_v53 }
 0x445   :  { %1525 = vmatpush2.bf16.msra.mxu1 %v4693_v54  ;;  %1566 = vmatpush2.bf16.msra.mxu0 %v4694_v57 }
 0x446   :  { %1526 = vmatprep.subr.bf16.mxu1 %v4695_v2  ;;  %1567 = vmatprep.subr.bf16.mxu0 %v4696_v21 }
 0x449   :  { %1527 = vmatpush2.bf16.msra.mxu1 %v4697_v41  ;;  %1568 = vmatpush2.bf16.msra.mxu0 %v4698_v37 }
 0x44a   :  { %1528 = vmatprep.subr.bf16.mxu1 %v4699_v46  ;;  %1569 = vmatprep.subr.bf16.mxu0 %v4700_v27 }
 0x44d   :  { %1529 = vmatpush2.bf16.msra.mxu1 %v4701_v38  ;;  %1570 = vmatpush2.bf16.msra.mxu0 %v4702_v49 }
 0x44e   :  { %1530 = vmatprep.subr.bf16.mxu1 %v4703_v48  ;;  %1571 = vmatprep.subr.bf16.mxu0 %v4704_v1 }
 0x451   :  { %1531 = vmatpush2.bf16.msra.mxu1 %v4705_v4  ;;  %1572 = vmatpush2.bf16.msra.mxu0 %v4706_v10 }
 0x452   :  { %1532 = vmatprep.subr.bf16.mxu1 %v4707_v56  ;;  %1573 = vmatprep.subr.bf16.mxu0 %v4708_v25 }
 0x455   :  { %1533 = vmatpush2.bf16.msra.mxu1 %v4709_v24  ;;  %1574 = vmatpush2.bf16.msra.mxu0 %v4710_v45 }
 0x456   :  { %1534 = vmatprep.subr.bf16.mxu1 %v4711_v26  ;;  %1575 = vmatprep.subr.bf16.mxu0 %v4712_v29 }
 0x459   :  { %1535 = vmatpush2.bf16.msra.mxu1 %v4713_v30  ;;  %1576 = vmatpush2.bf16.msra.mxu0 %v4714_v33 }
 0x45a   :  { %1592 = vmatprep.subr.bf16.mxu1 %v3723_v17  ;;  %1661 = vmatprep.subr.bf16.mxu0 %v3726_v18 }
 0x49c   :  { %v1381_v19 = vpop.f32.mrf.mxu0 }
 0x49e   :  { %v1383_v20 = vpop.f32.mrf.mxu0 }
 0x4a0   :  { %v1385_v31 = vpop.f32.mrf.mxu0 }
 0x4a1   :  { %v3762_v31 = vld [vmem:[#allocation3 + $0x24] ss:$8 sps:$4 sm:$0xff]  }
 0x4a2   :  { %v1386_v32 = vpop.f32.mrf.mxu0  ;;  %4717 = vst [vmem:[#allocation45_spill] sm:$0xff] %v3762_v31 }
 0x4a3   :  { %v3768_v32 = vld [vmem:[%s4261_s1 + $0x10] ss:$8 sps:$4 sm:$0xff]  }
 0x4dc   :  { %v1422_v35 = vpop.f32.mrf.mxu1  ;;  %v1469_v36 = vpop.f32.mrf.mxu0 }
 0x4dd   :  { %v1423_v39 = vadd.f32 %v1422_v35, %v1381_v19  ;;  %v3774_v35 = vld [vmem:[%s4261_s1 + $0x4] ss:$8 sps:$4 sm:$0xff]  }
 0x4de   :  { %v1424_v40 = vpop.f32.mrf.mxu1  ;;  %v1471_v50 = vpop.f32.mrf.mxu0 }
 0x4df   :  { %v1429_v43 = vadd.f32 %v1423_v39, %v4682_v12  ;;  %v1425_v44 = vadd.f32 %v1424_v40, %v1383_v20  ;;  %v1478_v47 = vcombine.low %v1469_v36, %v1471_v50  ;;  %v3759_v20 = vld [vmem:[#allocation3 + $0x30] ss:$8 sps:$4 sm:$0xff]   ;;  %v3777_v36 = vld [vmem:[#allocation3 + $0x20] ss:$8 sps:$4 sm:$0xff]   ;;  %v3780_v39 = vld [vmem:[#allocation3 + $0x14] ss:$8 sps:$4 sm:$0xff]  }
 0x4e0   :  { %v1426_v0 = vpop.f32.mrf.mxu1  ;;  %v1473_v34 = vpop.f32.mrf.mxu0  ;;  %4716 = vst [vmem:[#allocation44_spill] sm:$0xff] %v3759_v20  ;;  %4718 = vst [vmem:[#allocation17_spill] sm:$0xff] %v3777_v36  ;;  %v3786_v40 = vld [vmem:[%s4261_s1] ss:$8 sps:$4 sm:$0xff]   ;;  %v3792_v50 = vld [vmem:[%s4261_s1 + $0xf4] ss:$8 sps:$4 sm:$0xff]  }
 0x4e1   :  { %v1430_v42 = vadd.f32 %v1425_v44, %v4627_v60  ;;  %v1485_v53 = vrot.slane %v1478_v47, %v2922_v28  ;;  %v1431_v54 = vmax.f32 %v1429_v43, 0.0  ;;  %4719 = vst [vmem:[#allocation18_spill] sm:$0xff] %v3780_v39  ;;  %v3795_v43 = vld [vmem:[#allocation3 + $0x10] ss:$8 sps:$4 sm:$0xff]   ;;  %v3798_v44 = vld [vmem:[#allocation3 + $0x4] ss:$8 sps:$4 sm:$0xff]  }
 0x4e2   :  { %v1427_v2 = vpop.f32.mrf.mxu1  ;;  %v1474_v41 = vpop.f32.mrf.mxu0  ;;  %4720 = vst [vmem:[#allocation19_spill] sm:$0xff] %v3795_v43  ;;  %4721 = vst [vmem:[#allocation20_spill] sm:$0xff] %v3798_v44  ;;  %v3804_v47 = vld [vmem:[%s4261_s1 + $0xf0] ss:$8 sps:$4 sm:$0xff]   ;;  %v3813_v0 = vld [vmem:[#allocation3] ss:$8 sps:$4 sm:$0xff]  }
 0x4e3   :  { %v1432_v46 = vmax.f32 %v1430_v42, 0.0  ;;  %v1487_v38 = vadd.f32 %v2411_v3, %v1485_v53  ;;  %v1502_v56 = vpack.c.bf16 %v1431_v54, %v1431_v54  ;;  %v3810_v3 = vld [vmem:[%s4261_s1 + $0xe4] ss:$8 sps:$4 sm:$0xff]   ;;  %4722 = vst [vmem:[#allocation21_spill] sm:$0xff] %v3813_v0  ;;  %v3816_v34 = vld [vmem:[#allocation3 + $0xf4] ss:$8 sps:$4 sm:$0xff]  }
 0x4e4   :  { %4723 = vst [vmem:[#allocation22_spill] sm:$0xff] %v3816_v34  ;;  %v3822_v42 = vld [vmem:[%s4261_s1 + $0xe0] ss:$8 sps:$4 sm:$0xff]   ;;  %v3828_v53 = vld [vmem:[%s4261_s1 + $0xd4] ss:$8 sps:$4 sm:$0xff]  }
 0x4e5   :  { %v1503_v48 = vpack.c.bf16 %v1432_v46, %v1432_v46  ;;  %v1488_v4 = vmax.f32 %v1487_v38, 0.0  ;;  %v3831_v54 = vld [vmem:[#allocation3 + $0xf0] ss:$8 sps:$4 sm:$0xff]   ;;  %v3834_v2 = vld [vmem:[#allocation3 + $0xe4] ss:$8 sps:$4 sm:$0xff]  }
 0x4e6   :  { %4724 = vst [vmem:[#allocation23_spill] sm:$0xff] %v3831_v54  ;;  %4725 = vst [vmem:[#allocation24_spill] sm:$0xff] %v3834_v2  ;;  %v3840_v41 = vld [vmem:[%s4261_s1 + $0xd0] ss:$8 sps:$4 sm:$0xff]   ;;  %v3846_v46 = vld [vmem:[%s4261_s1 + $0xc4] ss:$8 sps:$4 sm:$0xff]  }
 0x4e7   :  { %v1496_v24 = vrot.slane %v1488_v4, %v2922_v28  ;;  %1536 = vmatprep.mubr.bf16.mxu1 %v1503_v48  ;;  %v3849_v38 = vld [vmem:[#allocation3 + $0xe0] ss:$8 sps:$4 sm:$0xff]   ;;  %v3852_v48 = vld [vmem:[#allocation3 + $0xd4] ss:$8 sps:$4 sm:$0xff]  }
 0x4e8   :  { %1537 = vmatmul.mubr.bf16.vlgmr.msra.gmra.mxu1 %v1502_v56  ;;  %4726 = vst [vmem:[#allocation25_spill] sm:$0xff] %v3849_v38  ;;  %4727 = vst [vmem:[#allocation27_spill] sm:$0xff] %v3852_v48  ;;  %v3858_v4 = vld [vmem:[%s4261_s1 + $0xc0] ss:$8 sps:$4 sm:$0xff]   ;;  %v3864_v56 = vld [vmem:[%s4261_s1 + $0xb4] ss:$8 sps:$4 sm:$0xff]  }
 0x4e9   :  { %1593 = vmatpush1.bf16.msra.mxu1 %v3548_v14  ;;  %v1497_v26 = vcombine.high %v1496_v24, %v1496_v24  ;;  %v3738_v19 = vpack.c.bf16 %v1496_v24, %v1496_v24  ;;  %4728 = vst [vmem:[#allocation28_spill] sm:$0xff] %v3858_v4  ;;  %4729 = vst [vmem:[#allocation29_spill] sm:$0xff] %v3864_v56  ;;  %v3867_v24 = vld [vmem:[#allocation3 + $0xd0] ss:$8 sps:$4 sm:$0xff]  }
 0x4ea   :  { %1594 = vmatprep.subr.bf16.mxu1 %v3554_v13  ;;  %4730 = vst [vmem:[#allocation30_spill] sm:$0xff] %v3867_v24 }
 0x4eb   :  { %v1501_v30 = vpack.c.bf16 %v1497_v26, %v1497_v26  ;;  %v3870_v26 = vld [vmem:[#allocation3 + $0xc4] ss:$8 sps:$4 sm:$0xff]  }
 0x4ec   :  { %4731 = vst [vmem:[#allocation31_spill] sm:$0xff] %v3870_v26 }
 0x4ed   :  { %1595 = vmatpush1.bf16.msra.mxu1 %v3560_v11  ;;  %1577 = vmatprep.mubr.bf16.mxu0 %v1501_v30 }
 0x4ee   :  { %1624 = vmatprep.mubr.bf16.mxu1 %v1501_v30  ;;  %1578 = vmatmul.mubr.bf16.vlgmr.msra.gmra.mxu0 %v3738_v19  ;;  %v3876_v30 = vld [vmem:[%s4261_s1 + $0xb0] ss:$8 sps:$4 sm:$0xff]  }
 0x4ef   :  { %1596 = vmatprep.subr.bf16.mxu1 %v3566_v15  ;;  %1662 = vmatpush1.bf16.msra.mxu0 %v3642_v55  ;;  %4732 = vst [vmem:[#allocation32_spill] sm:$0xff] %v3876_v30 }
 0x4f0   :  { %1663 = vmatprep.subr.bf16.mxu0 %v3646_v59 }
 0x4f1   :  { %1597 = vmatpush1.bf16.msra.mxu1 %v3572_v16 }
 0x4f2   :  { %1598 = vmatprep.subr.bf16.mxu1 %v3578_v22 }
 0x4f3   :  { %1664 = vmatpush1.bf16.msra.mxu0 %v3650_v6 }
 0x4f4   :  { %1665 = vmatprep.subr.bf16.mxu0 %v3654_v5 }
 0x4f5   :  { %1599 = vmatpush1.bf16.msra.mxu1 %v3584_v52 }
 0x4f6   :  { %1600 = vmatprep.subr.bf16.mxu1 %v3590_v51 }
 0x4f7   :  { %1666 = vmatpush1.bf16.msra.mxu0 %v3658_v7 }
 0x4f8   :  { %1667 = vmatprep.subr.bf16.mxu0 %v3662_v8 }
 0x4f9   :  { %1601 = vmatpush1.bf16.msra.mxu1 %v3596_v58 }
 0x4fa   :  { %1602 = vmatprep.subr.bf16.mxu1 %v3602_v61 }
 0x4fb   :  { %1668 = vmatpush1.bf16.msra.mxu0 %v3666_v9  ;;  %v3977_v9 = vld [vmem:[#allocation2 + $0x20] ss:$8 sps:$4 sm:$0xff]  }
 0x4fc   :  { %1669 = vmatprep.subr.bf16.mxu0 %v3670_v23  ;;  %v3974_v23 = vld [vmem:[#allocation2 + $0x24] ss:$8 sps:$4 sm:$0xff]   ;;  %4759 = vst [vmem:[#allocation48_spill] sm:$0xff] %v3977_v9 }
 0x4fd   :  { %1603 = vmatpush1.bf16.msra.mxu1 %v3608_v62  ;;  %4758 = vst [vmem:[#allocation16_spill] sm:$0xff] %v3974_v23 }
 0x4fe   :  { %1604 = vmatprep.subr.bf16.mxu1 %v3614_v63 }
 0x4ff   :  { %1670 = vmatpush1.bf16.msra.mxu0 %v3759_v20  ;;  %v3965_v20 = vld [vmem:[#allocation2 + $0x40] ss:$8 sps:$4 sm:$0xff]  }
 0x500   :  { %1671 = vmatprep.subr.bf16.mxu0 %v3762_v31  ;;  %v3962_v31 = vld [vmem:[#allocation2 + $0x44] ss:$8 sps:$4 sm:$0xff]   ;;  %4755 = vst [vmem:[#allocation75_spill] sm:$0xff] %v3965_v20 }
 0x501   :  { %1605 = vmatpush1.bf16.msra.mxu1 %v3768_v32  ;;  %4754 = vst [vmem:[#allocation74_spill] sm:$0xff] %v3962_v31 }
 0x502   :  { %1606 = vmatprep.subr.bf16.mxu1 %v3774_v35 }
 0x503   :  { %1672 = vmatpush1.bf16.msra.mxu0 %v3777_v36  ;;  %v3949_v36 = vld [vmem:[#allocation3 + $0x80] ss:$8 sps:$4 sm:$0xff]  }
 0x504   :  { %1673 = vmatprep.subr.bf16.mxu0 %v3780_v39  ;;  %v3946_v39 = vld [vmem:[#allocation2 + $0x64] ss:$8 sps:$4 sm:$0xff]   ;;  %4750 = vst [vmem:[#allocation69_spill] sm:$0xff] %v3949_v36 }
 0x505   :  { %1607 = vmatpush1.bf16.msra.mxu1 %v3786_v40  ;;  %4749 = vst [vmem:[#allocation68_spill] sm:$0xff] %v3946_v39 }
 0x506   :  { %1608 = vmatprep.subr.bf16.mxu1 %v3792_v50 }
 0x507   :  { %1674 = vmatpush1.bf16.msra.mxu0 %v3795_v43  ;;  %v3936_v43 = vld [vmem:[#allocation3 + $0x90] ss:$8 sps:$4 sm:$0xff]  }
 0x508   :  { %1675 = vmatprep.subr.bf16.mxu0 %v3798_v44  ;;  %v3933_v44 = vld [vmem:[#allocation2 + $0x74] ss:$8 sps:$4 sm:$0xff]   ;;  %4746 = vst [vmem:[#allocation61_spill] sm:$0xff] %v3936_v43 }
 0x509   :  { %1609 = vmatpush2.bf16.msra.mxu1 %v3804_v47  ;;  %4745 = vst [vmem:[#allocation52_spill] sm:$0xff] %v3933_v44 }
 0x50a   :  { %1610 = vmatprep.subr.bf16.mxu1 %v3810_v3 }
 0x50b   :  { %1676 = vmatpush1.bf16.msra.mxu0 %v3813_v0  ;;  %v3921_v0 = vld [vmem:[#allocation3 + $0xa0] ss:$8 sps:$4 sm:$0xff]  }
 0x50c   :  { %1677 = vmatprep.subr.bf16.mxu0 %v3816_v34  ;;  %v3918_v34 = vld [vmem:[%s4261_s1 + $0x84] ss:$8 sps:$4 sm:$0xff]   ;;  %4742 = vst [vmem:[#allocation47_spill] sm:$0xff] %v3921_v0 }
 0x50d   :  { %1611 = vmatpush2.bf16.msra.mxu1 %v3822_v42  ;;  %4741 = vst [vmem:[#allocation46_spill] sm:$0xff] %v3918_v34 }
 0x50e   :  { %1612 = vmatprep.subr.bf16.mxu1 %v3828_v53 }
 0x50f   :  { %1678 = vmatpush2.bf16.msra.mxu0 %v3831_v54  ;;  %v3903_v54 = vld [vmem:[#allocation3 + $0xb0] ss:$8 sps:$4 sm:$0xff]  }
 0x510   :  { %1679 = vmatprep.subr.bf16.mxu0 %v3834_v2  ;;  %v3900_v2 = vld [vmem:[%s4261_s1 + $0x94] ss:$8 sps:$4 sm:$0xff]   ;;  %4738 = vst [vmem:[#allocation39_spill] sm:$0xff] %v3903_v54 }
 0x511   :  { %1613 = vmatpush2.bf16.msra.mxu1 %v3840_v41  ;;  %4737 = vst [vmem:[#allocation38_spill] sm:$0xff] %v3900_v2 }
 0x512   :  { %1614 = vmatprep.subr.bf16.mxu1 %v3846_v46 }
 0x513   :  { %1680 = vmatpush2.bf16.msra.mxu0 %v3849_v38  ;;  %v3885_v38 = vld [vmem:[#allocation3 + $0xc0] ss:$8 sps:$4 sm:$0xff]  }
 0x514   :  { %1681 = vmatprep.subr.bf16.mxu0 %v3852_v48  ;;  %v3882_v48 = vld [vmem:[%s4261_s1 + $0xa4] ss:$8 sps:$4 sm:$0xff]   ;;  %4734 = vst [vmem:[#allocation34_spill] sm:$0xff] %v3885_v38 }
 0x515   :  { %1615 = vmatpush2.bf16.msra.mxu1 %v3858_v4  ;;  %4733 = vst [vmem:[#allocation33_spill] sm:$0xff] %v3882_v48 }
 0x516   :  { %1616 = vmatprep.subr.bf16.mxu1 %v3864_v56 }
 0x517   :  { %1682 = vmatpush2.bf16.msra.mxu0 %v3867_v24  ;;  %v3888_v24 = vld [vmem:[#allocation3 + $0xb4] ss:$8 sps:$4 sm:$0xff]  }
 0x518   :  { %1683 = vmatprep.subr.bf16.mxu0 %v3870_v26  ;;  %4735 = vst [vmem:[#allocation35_spill] sm:$0xff] %v3888_v24  ;;  %v3894_v26 = vld [vmem:[%s4261_s1 + $0xa0] ss:$8 sps:$4 sm:$0xff]  }
 0x519   :  { %1617 = vmatpush2.bf16.msra.mxu1 %v3876_v30  ;;  %4736 = vst [vmem:[#allocation36_spill] sm:$0xff] %v3894_v26 }
 0x51a   :  { %1618 = vmatprep.subr.bf16.mxu1 %v3882_v48 }
 0x51b   :  { %1684 = vmatpush2.bf16.msra.mxu0 %v3885_v38  ;;  %v3906_v38 = vld [vmem:[#allocation3 + $0xa4] ss:$8 sps:$4 sm:$0xff]  }
 0x51c   :  { %1685 = vmatprep.subr.bf16.mxu0 %v3888_v24  ;;  %4739 = vst [vmem:[#allocation42_spill] sm:$0xff] %v3906_v38  ;;  %v3912_v24 = vld [vmem:[%s4261_s1 + $0x90] ss:$8 sps:$4 sm:$0xff]  }
 0x51d   :  { %1619 = vmatpush2.bf16.msra.mxu1 %v3894_v26  ;;  %4740 = vst [vmem:[#allocation43_spill] sm:$0xff] %v3912_v24 }
 0x51e   :  { %1620 = vmatprep.subr.bf16.mxu1 %v3900_v2 }
 0x51f   :  { %1686 = vmatpush2.bf16.msra.mxu0 %v3903_v54  ;;  %v3924_v54 = vld [vmem:[#allocation3 + $0x94] ss:$8 sps:$4 sm:$0xff]  }
 0x520   :  { %1687 = vmatprep.subr.bf16.mxu0 %v3906_v38  ;;  %4743 = vst [vmem:[#allocation50_spill] sm:$0xff] %v3924_v54  ;;  %v3930_v38 = vld [vmem:[%s4261_s1 + $0x80] ss:$8 sps:$4 sm:$0xff]  }
 0x521   :  { %1621 = vmatpush2.bf16.msra.mxu1 %v3912_v24  ;;  %4744 = vst [vmem:[#allocation51_spill] sm:$0xff] %v3930_v38 }
 0x522   :  { %1622 = vmatprep.subr.bf16.mxu1 %v3918_v34 }
 0x523   :  { %1688 = vmatpush2.bf16.msra.mxu0 %v3921_v0  ;;  %v3940_v0 = vld [vmem:[#allocation3 + $0x84] ss:$8 sps:$4 sm:$0xff]  }
 0x524   :  { %1689 = vmatprep.subr.bf16.mxu0 %v3924_v54  ;;  %4747 = vst [vmem:[#allocation64_spill] sm:$0xff] %v3940_v0  ;;  %v3943_v54 = vld [vmem:[#allocation2 + $0x70] ss:$8 sps:$4 sm:$0xff]  }
 0x525   :  { %1623 = vmatpush2.bf16.msra.mxu1 %v3930_v38  ;;  %4748 = vst [vmem:[#allocation65_spill] sm:$0xff] %v3943_v54 }
 0x526   :  { %1702 = vmatprep.subr.bf16.mxu1 %v3933_v44 }
 0x527   :  { %1690 = vmatpush2.bf16.msra.mxu0 %v3936_v43  ;;  %v3953_v43 = vld [vmem:[#allocation2 + $0x60] ss:$8 sps:$4 sm:$0xff]  }
 0x528   :  { %1625 = vmatmul.mubr.bf16.vlgmr.msra.gmra.mxu1 %v3738_v19  ;;  %1691 = vmatprep.subr.bf16.mxu0 %v3940_v0  ;;  %4751 = vst [vmem:[#allocation71_spill] sm:$0xff] %v3953_v43  ;;  %v3956_v19 = vld [vmem:[#allocation2 + $0x54] ss:$8 sps:$4 sm:$0xff]   ;;  %v3959_v0 = vld [vmem:[#allocation2 + $0x50] ss:$8 sps:$4 sm:$0xff]  }
 0x529   :  { %1703 = vmatpush1.bf16.msra.mxu1 %v3943_v54  ;;  %4752 = vst [vmem:[#allocation72_spill] sm:$0xff] %v3956_v19  ;;  %4753 = vst [vmem:[#allocation73_spill] sm:$0xff] %v3959_v0 }
 0x52a   :  { %1704 = vmatprep.subr.bf16.mxu1 %v3946_v39 }
 0x52b   :  { %1692 = vmatpush2.bf16.msra.mxu0 %v3949_v36  ;;  %v3971_v36 = vld [vmem:[#allocation2 + $0x30] ss:$8 sps:$4 sm:$0xff]  }
 0x52c   :  { %1749 = vmatprep.subr.bf16.mxu0 %v3723_v17  ;;  %v3968_v17 = vld [vmem:[#allocation2 + $0x34] ss:$8 sps:$4 sm:$0xff]   ;;  %4757 = vst [vmem:[#allocation26_spill] sm:$0xff] %v3971_v36 }
 0x52d   :  { %1705 = vmatpush1.bf16.msra.mxu1 %v3953_v43  ;;  %4756 = vst [vmem:[#allocation76_spill] sm:$0xff] %v3968_v17 }
 0x52e   :  { %1706 = vmatprep.subr.bf16.mxu1 %v3956_v19 }
 0x531   :  { %1707 = vmatpush1.bf16.msra.mxu1 %v3959_v0 }
 0x532   :  { %1708 = vmatprep.subr.bf16.mxu1 %v3962_v31  ;;  %v3980_v31 = vld [vmem:[#allocation2 + $0x14] ss:$8 sps:$4 sm:$0xff]  }
 0x533   :  { %4760 = vst [vmem:[#allocation77_spill] sm:$0xff] %v3980_v31 }
 0x535   :  { %1709 = vmatpush1.bf16.msra.mxu1 %v3965_v20  ;;  %v3983_v20 = vld [vmem:[#allocation2 + $0x10] ss:$8 sps:$4 sm:$0xff]  }
 0x536   :  { %1710 = vmatprep.subr.bf16.mxu1 %v3968_v17  ;;  %4761 = vst [vmem:[#allocation49_spill] sm:$0xff] %v3983_v20  ;;  %v3986_v17 = vld [vmem:[#allocation2 + $0x4] ss:$8 sps:$4 sm:$0xff]  }
 0x537   :  { %4762 = vst [vmem:[#allocation78_spill] sm:$0xff] %v3986_v17 }
 0x539   :  { %1711 = vmatpush1.bf16.msra.mxu1 %v3971_v36  ;;  %v3989_v36 = vld [vmem:[#allocation2] ss:$8 sps:$4 sm:$0xff]  }
 0x53a   :  { %1712 = vmatprep.subr.bf16.mxu1 %v3974_v23  ;;  %4763 = vst [vmem:[#allocation53_spill] sm:$0xff] %v3989_v36  ;;  %v3992_v23 = vld [vmem:[#allocation2 + $0xf4] ss:$8 sps:$4 sm:$0xff]  }
 0x53b   :  { %4764 = vst [vmem:[#allocation79_spill] sm:$0xff] %v3992_v23 }
 0x53d   :  { %1713 = vmatpush1.bf16.msra.mxu1 %v3977_v9  ;;  %v3995_v9 = vld [vmem:[#allocation2 + $0xf0] ss:$8 sps:$4 sm:$0xff]  }
 0x53e   :  { %1714 = vmatprep.subr.bf16.mxu1 %v3980_v31  ;;  %4765 = vst [vmem:[#allocation54_spill] sm:$0xff] %v3995_v9  ;;  %v3998_v31 = vld [vmem:[#allocation2 + $0xe4] ss:$8 sps:$4 sm:$0xff]  }
 0x53f   :  { %4766 = vst [vmem:[#allocation80_spill] sm:$0xff] %v3998_v31 }
 0x541   :  { %1715 = vmatpush1.bf16.msra.mxu1 %v3983_v20  ;;  %v4001_v20 = vld [vmem:[#allocation2 + $0xe0] ss:$8 sps:$4 sm:$0xff]  }
 0x542   :  { %1716 = vmatprep.subr.bf16.mxu1 %v3986_v17  ;;  %4767 = vst [vmem:[#allocation55_spill] sm:$0xff] %v4001_v20  ;;  %v4004_v17 = vld [vmem:[#allocation2 + $0xd4] ss:$8 sps:$4 sm:$0xff]  }
 0x543   :  { %4768 = vst [vmem:[#allocation81_spill] sm:$0xff] %v4004_v17 }
 0x545   :  { %1717 = vmatpush1.bf16.msra.mxu1 %v3989_v36 }
 0x546   :  { %1718 = vmatprep.subr.bf16.mxu1 %v3992_v23 }
 0x549   :  { %1719 = vmatpush2.bf16.msra.mxu1 %v3995_v9 }
 0x54a   :  { %1720 = vmatprep.subr.bf16.mxu1 %v3998_v31 }
 0x54d   :  { %1721 = vmatpush2.bf16.msra.mxu1 %v4001_v20 }
 0x54e   :  { %1722 = vmatprep.subr.bf16.mxu1 %v4004_v17 }
 0x551   :  { %1723 = vmatpush2.bf16.msra.mxu1 %v4694_v57 }
 0x552   :  { %1724 = vmatprep.subr.bf16.mxu1 %v4696_v21 }
 0x555   :  { %1725 = vmatpush2.bf16.msra.mxu1 %v4698_v37 }
 0x556   :  { %1726 = vmatprep.subr.bf16.mxu1 %v4700_v27 }
 0x559   :  { %1727 = vmatpush2.bf16.msra.mxu1 %v4702_v49 }
 0x55a   :  { %1728 = vmatprep.subr.bf16.mxu1 %v4704_v1 }
 0x55d   :  { %1729 = vmatpush2.bf16.msra.mxu1 %v4706_v10 }
 0x55e   :  { %1730 = vmatprep.subr.bf16.mxu1 %v4708_v25 }
 0x561   :  { %1731 = vmatpush2.bf16.msra.mxu1 %v4710_v45 }
 0x562   :  { %1732 = vmatprep.subr.bf16.mxu1 %v4712_v29 }
 0x565   :  { %1733 = vmatpush2.bf16.msra.mxu1 %v4714_v33 }
 0x566   :  { %1818 = vmatprep.subr.bf16.mxu1 %v3726_v18 }
 0x5a8   :  { %v1538_v57 = vpop.f32.mrf.mxu1 }
 0x5aa   :  { %v1540_v21 = vpop.f32.mrf.mxu1 }
 0x5ac   :  { %v1542_v37 = vpop.f32.mrf.mxu1 }
 0x5ae   :  { %v1543_v27 = vpop.f32.mrf.mxu1  ;;  %v1579_v17 = vpop.f32.mrf.mxu0 }
 0x5af   :  { %v1580_v49 = vadd.f32 %v1579_v17, %v1538_v57 }
 0x5b0   :  { %v1581_v20 = vpop.f32.mrf.mxu0 }
 0x5b1   :  { %v1586_v1 = vadd.f32 %v1580_v49, %v4682_v12  ;;  %v1582_v10 = vadd.f32 %v1581_v20, %v1540_v21  ;;  %v2412_v20 = vld [vmem:[%s4260_s0 + $0x14] sm:$0xf] }
 0x5b2   :  { %v1583_v31 = vpop.f32.mrf.mxu0 }
 0x5b3   :  { %v1587_v25 = vadd.f32 %v1582_v10, %v4627_v60  ;;  %v1588_v45 = vmax.f32 %v1586_v1, 0.0 }
 0x5b4   :  { %v1584_v9 = vpop.f32.mrf.mxu0 }
 0x5b5   :  { %v1589_v29 = vmax.f32 %v1587_v25, 0.0  ;;  %v1659_v33 = vpack.c.bf16 %v1588_v45, %v1588_v45  ;;  %v4769_v45 = vld [vmem:[#allocation74_spill] sm:$0xff] }
 0x5b7   :  { %v1660_v23 = vpack.c.bf16 %v1589_v29, %v1589_v29  ;;  %v4770_v29 = vld [vmem:[#allocation37_spill] sm:$0xff] }
 0x5b9   :  { %1693 = vmatprep.mubr.bf16.mxu0 %v1660_v23 }
 0x5ba   :  { %1694 = vmatmul.mubr.bf16.vlgmr.msra.gmra.mxu0 %v1659_v33  ;;  %v4771_v33 = vld [vmem:[#allocation75_spill] sm:$0xff] }
 0x5bb   :  { %1750 = vmatpush1.bf16.msra.mxu0 %v3548_v14 }
 0x5bc   :  { %1751 = vmatprep.subr.bf16.mxu0 %v3554_v13 }
 0x5bf   :  { %1752 = vmatpush1.bf16.msra.mxu0 %v3560_v11 }
 0x5c0   :  { %1753 = vmatprep.subr.bf16.mxu0 %v3566_v15 }
 0x5c3   :  { %1754 = vmatpush1.bf16.msra.mxu0 %v3572_v16 }
 0x5c4   :  { %1755 = vmatprep.subr.bf16.mxu0 %v3578_v22 }
 0x5c7   :  { %1756 = vmatpush1.bf16.msra.mxu0 %v3584_v52 }
 0x5c8   :  { %1757 = vmatprep.subr.bf16.mxu0 %v3590_v51 }
 0x5cb   :  { %1758 = vmatpush1.bf16.msra.mxu0 %v3596_v58 }
 0x5cc   :  { %1759 = vmatprep.subr.bf16.mxu0 %v3602_v61 }
 0x5cf   :  { %1760 = vmatpush1.bf16.msra.mxu0 %v3608_v62 }
 0x5d0   :  { %1761 = vmatprep.subr.bf16.mxu0 %v3614_v63 }
 0x5d3   :  { %1762 = vmatpush1.bf16.msra.mxu0 %v3768_v32 }
 0x5d4   :  { %1763 = vmatprep.subr.bf16.mxu0 %v3774_v35 }
 0x5d7   :  { %1764 = vmatpush1.bf16.msra.mxu0 %v3786_v40 }
 0x5d8   :  { %1765 = vmatprep.subr.bf16.mxu0 %v3792_v50 }
 0x5db   :  { %1766 = vmatpush2.bf16.msra.mxu0 %v3804_v47 }
 0x5dc   :  { %1767 = vmatprep.subr.bf16.mxu0 %v3810_v3 }
 0x5df   :  { %1768 = vmatpush2.bf16.msra.mxu0 %v3822_v42 }
 0x5e0   :  { %1769 = vmatprep.subr.bf16.mxu0 %v3828_v53 }
 0x5e3   :  { %1770 = vmatpush2.bf16.msra.mxu0 %v3840_v41 }
 0x5e4   :  { %1771 = vmatprep.subr.bf16.mxu0 %v3846_v46 }
 0x5e7   :  { %1772 = vmatpush2.bf16.msra.mxu0 %v3858_v4 }
 0x5e8   :  { %v1626_v9 = vpop.f32.mrf.mxu1  ;;  %1773 = vmatprep.subr.bf16.mxu0 %v3864_v56 }
 0x5ea   :  { %v1628_v23 = vpop.f32.mrf.mxu1 }
 0x5eb   :  { %v1635_v17 = vcombine.low %v1626_v9, %v1628_v23  ;;  %1774 = vmatpush2.bf16.msra.mxu0 %v3876_v30  ;;  %v4772_v9 = vld [vmem:[#allocation40_spill] sm:$0xff] }
 0x5ec   :  { %v1630_v31 = vpop.f32.mrf.mxu1  ;;  %1775 = vmatprep.subr.bf16.mxu0 %v3882_v48  ;;  %v4773_v23 = vld [vmem:[#allocation76_spill] sm:$0xff] }
 0x5ed   :  { %v1642_v57 = vrot.slane %v1635_v17, %v2922_v28  ;;  %v4774_v17 = vld [vmem:[#allocation44_spill] sm:$0xff]  ;;  %v4776_v31 = vld [vmem:[#allocation45_spill] sm:$0xff] }
 0x5ee   :  { %v1631_v21 = vpop.f32.mrf.mxu1 }
 0x5ef   :  { %v1644_v37 = vadd.f32 %v2412_v20, %v1642_v57  ;;  %1776 = vmatpush2.bf16.msra.mxu0 %v3894_v26  ;;  %v4775_v20 = vld [vmem:[#allocation26_spill] sm:$0xff]  ;;  %v4777_v57 = vld [vmem:[#allocation16_spill] sm:$0xff]  ;;  %v4778_v21 = vld [vmem:[#allocation17_spill] sm:$0xff] }
 0x5f0   :  { %1777 = vmatprep.subr.bf16.mxu0 %v3900_v2 }
 0x5f1   :  { %v1645_v27 = vmax.f32 %v1644_v37, 0.0  ;;  %v4779_v37 = vld [vmem:[#allocation48_spill] sm:$0xff] }
 0x5f3   :  { %v1653_v49 = vrot.slane %v1645_v27, %v2922_v28  ;;  %1778 = vmatpush2.bf16.msra.mxu0 %v3912_v24  ;;  %v4780_v27 = vld [vmem:[#allocation18_spill] sm:$0xff] }
 0x5f4   :  { %1779 = vmatprep.subr.bf16.mxu0 %v3918_v34  ;;  %v4809_v34 = vld [vmem:[#allocation47_spill] sm:$0xff]  ;;  %v4811_v24 = vld [vmem:[#allocation50_spill] sm:$0xff] }
 0x5f5   :  { %v1654_v1 = vcombine.high %v1653_v49, %v1653_v49  ;;  %v1657_v25 = vpack.c.bf16 %v1653_v49, %v1653_v49  ;;  %v4781_v49 = vld [vmem:[#allocation77_spill] sm:$0xff] }
 0x5f7   :  { %1780 = vmatpush2.bf16.msra.mxu0 %v3930_v38  ;;  %v1658_v10 = vpack.c.bf16 %v1654_v1, %v1654_v1  ;;  %v4782_v1 = vld [vmem:[#allocation19_spill] sm:$0xff]  ;;  %v4807_v38 = vld [vmem:[#allocation42_spill] sm:$0xff] }
 0x5f8   :  { %1859 = vmatprep.subr.bf16.mxu0 %v3933_v44  ;;  %v4805_v44 = vld [vmem:[#allocation39_spill] sm:$0xff] }
 0x5f9   :  { %1734 = vmatprep.mubr.bf16.mxu1 %v1658_v10  ;;  %1781 = vmatprep.mubr.bf16.mxu0 %v1658_v10  ;;  %v4783_v10 = vld [vmem:[#allocation49_spill] sm:$0xff] }
 0x5fa   :  { %1735 = vmatmul.mubr.bf16.vlgmr.msra.gmra.mxu1 %v1657_v25  ;;  %1782 = vmatmul.mubr.bf16.vlgmr.msra.gmra.mxu0 %v1657_v25  ;;  %v4784_v25 = vld [vmem:[#allocation20_spill] sm:$0xff] }
 0x5fb   :  { %1819 = vmatpush1.bf16.msra.mxu1 %v3642_v55  ;;  %1860 = vmatpush1.bf16.msra.mxu0 %v3943_v54  ;;  %v4107_v54 = vld [vmem:[#allocation2 + $0xc0] ss:$8 sps:$4 sm:$0xff]  }
 0x5fc   :  { %1820 = vmatprep.subr.bf16.mxu1 %v3646_v59  ;;  %1861 = vmatprep.subr.bf16.mxu0 %v3946_v39  ;;  %v4099_v39 = vld [vmem:[#allocation2 + $0xd0] ss:$8 sps:$4 sm:$0xff]   ;;  %4802 = vst [vmem:[#allocation57_spill] sm:$0xff] %v4107_v54 }
 0x5fd   :  { %4798 = vst [vmem:[#allocation56_spill] sm:$0xff] %v4099_v39 }
 0x5ff   :  { %1821 = vmatpush1.bf16.msra.mxu1 %v3650_v6  ;;  %1862 = vmatpush1.bf16.msra.mxu0 %v3953_v43  ;;  %v4796_v43 = vld [vmem:[#allocation81_spill] sm:$0xff] }
 0x600   :  { %1822 = vmatprep.subr.bf16.mxu1 %v3654_v5  ;;  %1863 = vmatprep.subr.bf16.mxu0 %v3956_v19  ;;  %v4794_v19 = vld [vmem:[#allocation55_spill] sm:$0xff] }
 0x603   :  { %1823 = vmatpush1.bf16.msra.mxu1 %v3658_v7  ;;  %1864 = vmatpush1.bf16.msra.mxu0 %v3959_v0  ;;  %v4792_v0 = vld [vmem:[#allocation80_spill] sm:$0xff] }
 0x604   :  { %1824 = vmatprep.subr.bf16.mxu1 %v3662_v8  ;;  %1865 = vmatprep.subr.bf16.mxu0 %v4769_v45  ;;  %v4790_v45 = vld [vmem:[#allocation54_spill] sm:$0xff] }
 0x607   :  { %1825 = vmatpush1.bf16.msra.mxu1 %v4770_v29  ;;  %1866 = vmatpush1.bf16.msra.mxu0 %v4771_v33  ;;  %v4788_v33 = vld [vmem:[#allocation79_spill] sm:$0xff] }
 0x608   :  { %1826 = vmatprep.subr.bf16.mxu1 %v4772_v9  ;;  %1867 = vmatprep.subr.bf16.mxu0 %v4773_v23  ;;  %v4785_v23 = vld [vmem:[#allocation78_spill] sm:$0xff] }
 0x60b   :  { %1827 = vmatpush1.bf16.msra.mxu1 %v4774_v17  ;;  %1868 = vmatpush1.bf16.msra.mxu0 %v4775_v20  ;;  %v4786_v20 = vld [vmem:[#allocation21_spill] sm:$0xff] }
 0x60c   :  { %1828 = vmatprep.subr.bf16.mxu1 %v4776_v31  ;;  %1869 = vmatprep.subr.bf16.mxu0 %v4777_v57  ;;  %v4787_v57 = vld [vmem:[#allocation22_spill] sm:$0xff] }
 0x60f   :  { %1829 = vmatpush1.bf16.msra.mxu1 %v4778_v21  ;;  %1870 = vmatpush1.bf16.msra.mxu0 %v4779_v37  ;;  %v4789_v37 = vld [vmem:[#allocation23_spill] sm:$0xff] }
 0x610   :  { %1830 = vmatprep.subr.bf16.mxu1 %v4780_v27  ;;  %1871 = vmatprep.subr.bf16.mxu0 %v4781_v49  ;;  %v4791_v49 = vld [vmem:[#allocation24_spill] sm:$0xff] }
 0x613   :  { %1831 = vmatpush1.bf16.msra.mxu1 %v4782_v1  ;;  %1872 = vmatpush1.bf16.msra.mxu0 %v4783_v10  ;;  %v4793_v10 = vld [vmem:[#allocation25_spill] sm:$0xff] }
 0x614   :  { %1832 = vmatprep.subr.bf16.mxu1 %v4784_v25  ;;  %1873 = vmatprep.subr.bf16.mxu0 %v4785_v23  ;;  %v4795_v23 = vld [vmem:[#allocation27_spill] sm:$0xff] }
 0x617   :  { %1833 = vmatpush1.bf16.msra.mxu1 %v4786_v20  ;;  %1874 = vmatpush1.bf16.msra.mxu0 %v3989_v36  ;;  %v4797_v36 = vld [vmem:[#allocation30_spill] sm:$0xff] }
 0x618   :  { %1834 = vmatprep.subr.bf16.mxu1 %v4787_v57  ;;  %1875 = vmatprep.subr.bf16.mxu0 %v4788_v33  ;;  %v4799_v33 = vld [vmem:[#allocation31_spill] sm:$0xff] }
 0x61b   :  { %1835 = vmatpush2.bf16.msra.mxu1 %v4789_v37  ;;  %1876 = vmatpush2.bf16.msra.mxu0 %v4790_v45  ;;  %v4103_v45 = vld [vmem:[#allocation2 + $0xc4] ss:$8 sps:$4 sm:$0xff]  }
 0x61c   :  { %1836 = vmatprep.subr.bf16.mxu1 %v4791_v49  ;;  %1877 = vmatprep.subr.bf16.mxu0 %v4792_v0  ;;  %4800 = vst [vmem:[#allocation82_spill] sm:$0xff] %v4103_v45  ;;  %v4801_v0 = vld [vmem:[#allocation34_spill] sm:$0xff] }
 0x61f   :  { %1837 = vmatpush2.bf16.msra.mxu1 %v4793_v10  ;;  %1878 = vmatpush2.bf16.msra.mxu0 %v4794_v19  ;;  %v4803_v19 = vld [vmem:[#allocation35_spill] sm:$0xff] }
 0x620   :  { %1838 = vmatprep.subr.bf16.mxu1 %v4795_v23  ;;  %1879 = vmatprep.subr.bf16.mxu0 %v4796_v43  ;;  %v4111_v43 = vld [vmem:[#allocation2 + $0xb4] ss:$8 sps:$4 sm:$0xff]  }
 0x621   :  { %4804 = vst [vmem:[#allocation83_spill] sm:$0xff] %v4111_v43 }
 0x623   :  { %1839 = vmatpush2.bf16.msra.mxu1 %v4797_v36  ;;  %1880 = vmatpush2.bf16.msra.mxu0 %v4099_v39  ;;  %v4115_v39 = vld [vmem:[#allocation2 + $0xb0] ss:$8 sps:$4 sm:$0xff]  }
 0x624   :  { %1840 = vmatprep.subr.bf16.mxu1 %v4799_v33  ;;  %1881 = vmatprep.subr.bf16.mxu0 %v4103_v45  ;;  %4806 = vst [vmem:[#allocation58_spill] sm:$0xff] %v4115_v39  ;;  %v4119_v45 = vld [vmem:[#allocation2 + $0xa4] ss:$8 sps:$4 sm:$0xff]  }
 0x625   :  { %4808 = vst [vmem:[#allocation84_spill] sm:$0xff] %v4119_v45 }
 0x627   :  { %1841 = vmatpush2.bf16.msra.mxu1 %v4801_v0  ;;  %1882 = vmatpush2.bf16.msra.mxu0 %v4107_v54  ;;  %v4123_v54 = vld [vmem:[#allocation2 + $0xa0] ss:$8 sps:$4 sm:$0xff]  }
 0x628   :  { %1842 = vmatprep.subr.bf16.mxu1 %v4803_v19  ;;  %1883 = vmatprep.subr.bf16.mxu0 %v4111_v43  ;;  %4810 = vst [vmem:[#allocation59_spill] sm:$0xff] %v4123_v54  ;;  %v4127_v43 = vld [vmem:[#allocation2 + $0x94] ss:$8 sps:$4 sm:$0xff]  }
 0x629   :  { %4812 = vst [vmem:[#allocation85_spill] sm:$0xff] %v4127_v43 }
 0x62b   :  { %1843 = vmatpush2.bf16.msra.mxu1 %v4805_v44  ;;  %1884 = vmatpush2.bf16.msra.mxu0 %v4115_v39  ;;  %v4813_v44 = vld [vmem:[#allocation61_spill] sm:$0xff]  ;;  %v4131_v39 = vld [vmem:[#allocation2 + $0x90] ss:$8 sps:$4 sm:$0xff]  }
 0x62c   :  { %1844 = vmatprep.subr.bf16.mxu1 %v4807_v38  ;;  %1885 = vmatprep.subr.bf16.mxu0 %v4119_v45  ;;  %4814 = vst [vmem:[#allocation60_spill] sm:$0xff] %v4131_v39  ;;  %v4815_v38 = vld [vmem:[#allocation64_spill] sm:$0xff] }
 0x62d   :  { %v4135_v45 = vld [vmem:[#allocation2 + $0x84] ss:$8 sps:$4 sm:$0xff]  }
 0x62e   :  { %4816 = vst [vmem:[#allocation86_spill] sm:$0xff] %v4135_v45 }
 0x62f   :  { %1845 = vmatpush2.bf16.msra.mxu1 %v4809_v34  ;;  %1886 = vmatpush2.bf16.msra.mxu0 %v4123_v54  ;;  %v4817_v34 = vld [vmem:[#allocation69_spill] sm:$0xff] }
 0x630   :  { %1846 = vmatprep.subr.bf16.mxu1 %v4811_v24  ;;  %1887 = vmatprep.subr.bf16.mxu0 %v4127_v43  ;;  %v4139_v54 = vld [vmem:[#allocation2 + $0x80] ss:$8 sps:$4 sm:$0xff]  }
 0x631   :  { %4818 = vst [vmem:[#allocation62_spill] sm:$0xff] %v4139_v54  ;;  %v4819_v24 = vld [vmem:[#allocation41_spill] sm:$0xff] }
 0x633   :  { %1847 = vmatpush2.bf16.msra.mxu1 %v4813_v44  ;;  %1888 = vmatpush2.bf16.msra.mxu0 %v4131_v39 }
 0x634   :  { %1848 = vmatprep.subr.bf16.mxu1 %v4815_v38  ;;  %1889 = vmatprep.subr.bf16.mxu0 %v4135_v45 }
 0x637   :  { %1849 = vmatpush2.bf16.msra.mxu1 %v4817_v34  ;;  %1890 = vmatpush2.bf16.msra.mxu0 %v4139_v54  ;;  %v2413_v54 = vld [vmem:[%s4260_s0 + $0x18] sm:$0xf] }
 0x638   :  { %1906 = vmatprep.subr.bf16.mxu1 %v4819_v24  ;;  %1975 = vmatprep.subr.bf16.mxu0 %v3726_v18 }
 0x67a   :  { %v1695_v43 = vpop.f32.mrf.mxu0 }
 0x67c   :  { %v1697_v44 = vpop.f32.mrf.mxu0 }
 0x67e   :  { %v1699_v2 = vpop.f32.mrf.mxu0 }
 0x680   :  { %v1700_v39 = vpop.f32.mrf.mxu0 }
 0x6ba   :  { %v1736_v26 = vpop.f32.mrf.mxu1  ;;  %v1783_v38 = vpop.f32.mrf.mxu0 }
 0x6bb   :  { %v1737_v19 = vadd.f32 %v1736_v26, %v1695_v43 }
 0x6bc   :  { %v1738_v0 = vpop.f32.mrf.mxu1  ;;  %v1785_v48 = vpop.f32.mrf.mxu0 }
 0x6bd   :  { %v1743_v45 = vadd.f32 %v1737_v19, %v4682_v12  ;;  %v1739_v34 = vadd.f32 %v1738_v0, %v1697_v44  ;;  %v1792_v30 = vcombine.low %v1783_v38, %v1785_v48  ;;  %v4850_v48 = vld [vmem:[#allocation26_spill] sm:$0xff] }
 0x6be   :  { %v1740_v24 = vpop.f32.mrf.mxu1  ;;  %v1787_v33 = vpop.f32.mrf.mxu0 }
 0x6bf   :  { %v1744_v18 = vadd.f32 %v1739_v34, %v4627_v60  ;;  %v1799_v2 = vrot.slane %v1792_v30, %v2922_v28  ;;  %v1745_v39 = vmax.f32 %v1743_v45, 0.0  ;;  %v4853_v30 = vld [vmem:[#allocation77_spill] sm:$0xff]  ;;  %v4870_v24 = vld [vmem:[#allocation60_spill] sm:$0xff] }
 0x6c0   :  { %v1741_v36 = vpop.f32.mrf.mxu1  ;;  %v1788_v56 = vpop.f32.mrf.mxu0  ;;  %v4854_v45 = vld [vmem:[#allocation49_spill] sm:$0xff] }
 0x6c1   :  { %v1746_v43 = vmax.f32 %v1744_v18, 0.0  ;;  %v1801_v26 = vadd.f32 %v2413_v54, %v1799_v2  ;;  %v1816_v19 = vpack.c.bf16 %v1745_v39, %v1745_v39  ;;  %v4840_v36 = vld [vmem:[#allocation64_spill] sm:$0xff]  ;;  %v4847_v54 = vld [vmem:[#allocation74_spill] sm:$0xff]  ;;  %v4856_v33 = vld [vmem:[#allocation53_spill] sm:$0xff] }
 0x6c2   :  { %v4852_v56 = vld [vmem:[#allocation48_spill] sm:$0xff]  ;;  %v4871_v18 = vld [vmem:[#allocation86_spill] sm:$0xff] }
 0x6c3   :  { %v1817_v4 = vpack.c.bf16 %v1746_v43, %v1746_v43  ;;  %v1802_v23 = vmax.f32 %v1801_v26, 0.0  ;;  %v4872_v2 = vld [vmem:[#allocation62_spill] sm:$0xff] }
 0x6c5   :  { %v1810_v44 = vrot.slane %v1802_v23, %v2922_v28  ;;  %1850 = vmatprep.mubr.bf16.mxu1 %v1817_v4  ;;  %v4851_v4 = vld [vmem:[#allocation16_spill] sm:$0xff]  ;;  %v4858_v23 = vld [vmem:[#allocation54_spill] sm:$0xff] }
 0x6c6   :  { %1851 = vmatmul.mubr.bf16.vlgmr.msra.gmra.mxu1 %v1816_v19 }
 0x6c7   :  { %1907 = vmatpush1.bf16.msra.mxu1 %v3548_v14  ;;  %v1811_v0 = vcombine.high %v1810_v44, %v1810_v44  ;;  %v1814_v38 = vpack.c.bf16 %v1810_v44, %v1810_v44  ;;  %v4820_v14 = vld [vmem:[#allocation27_spill] sm:$0xff] }
 0x6c8   :  { %1908 = vmatprep.subr.bf16.mxu1 %v3554_v13  ;;  %v4821_v13 = vld [vmem:[#allocation28_spill] sm:$0xff] }
 0x6c9   :  { %v1815_v34 = vpack.c.bf16 %v1811_v0, %v1811_v0 }
 0x6cb   :  { %1909 = vmatpush1.bf16.msra.mxu1 %v3560_v11  ;;  %1891 = vmatprep.mubr.bf16.mxu0 %v1815_v34  ;;  %v4822_v11 = vld [vmem:[#allocation29_spill] sm:$0xff] }
 0x6cc   :  { %1938 = vmatprep.mubr.bf16.mxu1 %v1815_v34  ;;  %1892 = vmatmul.mubr.bf16.vlgmr.msra.gmra.mxu0 %v1814_v38 }
 0x6cd   :  { %1910 = vmatprep.subr.bf16.mxu1 %v3566_v15  ;;  %1976 = vmatpush1.bf16.msra.mxu0 %v3642_v55  ;;  %v4823_v15 = vld [vmem:[#allocation30_spill] sm:$0xff] }
 0x6ce   :  { %1977 = vmatprep.subr.bf16.mxu0 %v3646_v59  ;;  %v4832_v55 = vld [vmem:[#allocation42_spill] sm:$0xff]  ;;  %v4833_v59 = vld [vmem:[#allocation43_spill] sm:$0xff] }
 0x6cf   :  { %1911 = vmatpush1.bf16.msra.mxu1 %v3572_v16  ;;  %v4824_v16 = vld [vmem:[#allocation31_spill] sm:$0xff] }
 0x6d0   :  { %1912 = vmatprep.subr.bf16.mxu1 %v3578_v22  ;;  %v4825_v22 = vld [vmem:[#allocation32_spill] sm:$0xff] }
 0x6d1   :  { %1978 = vmatpush1.bf16.msra.mxu0 %v3650_v6  ;;  %v4834_v6 = vld [vmem:[#allocation46_spill] sm:$0xff] }
 0x6d2   :  { %1979 = vmatprep.subr.bf16.mxu0 %v3654_v5  ;;  %v4835_v5 = vld [vmem:[#allocation47_spill] sm:$0xff] }
 0x6d3   :  { %1913 = vmatpush1.bf16.msra.mxu1 %v3584_v52  ;;  %v4826_v52 = vld [vmem:[#allocation33_spill] sm:$0xff] }
 0x6d4   :  { %1914 = vmatprep.subr.bf16.mxu1 %v3590_v51  ;;  %v4827_v51 = vld [vmem:[#allocation34_spill] sm:$0xff] }
 0x6d5   :  { %1980 = vmatpush1.bf16.msra.mxu0 %v3658_v7  ;;  %v4836_v7 = vld [vmem:[#allocation50_spill] sm:$0xff] }
 0x6d6   :  { %1981 = vmatprep.subr.bf16.mxu0 %v3662_v8  ;;  %v4837_v8 = vld [vmem:[#allocation51_spill] sm:$0xff] }
 0x6d7   :  { %1915 = vmatpush1.bf16.msra.mxu1 %v3596_v58  ;;  %v4828_v58 = vld [vmem:[#allocation35_spill] sm:$0xff] }
 0x6d8   :  { %1916 = vmatprep.subr.bf16.mxu1 %v3602_v61  ;;  %v4829_v61 = vld [vmem:[#allocation36_spill] sm:$0xff] }
 0x6d9   :  { %1982 = vmatpush1.bf16.msra.mxu0 %v4770_v29  ;;  %v4855_v29 = vld [vmem:[#allocation78_spill] sm:$0xff] }
 0x6da   :  { %1983 = vmatprep.subr.bf16.mxu0 %v4772_v9  ;;  %v4857_v9 = vld [vmem:[#allocation79_spill] sm:$0xff] }
 0x6db   :  { %1917 = vmatpush1.bf16.msra.mxu1 %v3608_v62  ;;  %v4830_v62 = vld [vmem:[#allocation38_spill] sm:$0xff] }
 0x6dc   :  { %1918 = vmatprep.subr.bf16.mxu1 %v3614_v63  ;;  %v4831_v63 = vld [vmem:[#allocation39_spill] sm:$0xff] }
 0x6dd   :  { %1984 = vmatpush1.bf16.msra.mxu0 %v4774_v17  ;;  %v4859_v17 = vld [vmem:[#allocation80_spill] sm:$0xff] }
 0x6de   :  { %1985 = vmatprep.subr.bf16.mxu0 %v4776_v31  ;;  %v4861_v31 = vld [vmem:[#allocation81_spill] sm:$0xff] }
 0x6df   :  { %1919 = vmatpush1.bf16.msra.mxu1 %v3768_v32  ;;  %v4838_v32 = vld [vmem:[#allocation52_spill] sm:$0xff] }
 0x6e0   :  { %1920 = vmatprep.subr.bf16.mxu1 %v3774_v35  ;;  %v4839_v35 = vld [vmem:[#allocation61_spill] sm:$0xff] }
 0x6e1   :  { %1986 = vmatpush1.bf16.msra.mxu0 %v4778_v21  ;;  %v4863_v21 = vld [vmem:[#allocation82_spill] sm:$0xff] }
 0x6e2   :  { %1987 = vmatprep.subr.bf16.mxu0 %v4780_v27  ;;  %v4865_v27 = vld [vmem:[#allocation83_spill] sm:$0xff] }
 0x6e3   :  { %1921 = vmatpush1.bf16.msra.mxu1 %v3786_v40  ;;  %v4841_v40 = vld [vmem:[#allocation65_spill] sm:$0xff] }
 0x6e4   :  { %1922 = vmatprep.subr.bf16.mxu1 %v3792_v50  ;;  %v4842_v50 = vld [vmem:[#allocation68_spill] sm:$0xff] }
 0x6e5   :  { %1988 = vmatpush1.bf16.msra.mxu0 %v4782_v1  ;;  %v4867_v1 = vld [vmem:[#allocation84_spill] sm:$0xff] }
 0x6e6   :  { %1989 = vmatprep.subr.bf16.mxu0 %v4784_v25  ;;  %v4869_v25 = vld [vmem:[#allocation85_spill] sm:$0xff] }
 0x6e7   :  { %1923 = vmatpush2.bf16.msra.mxu1 %v3804_v47  ;;  %v4843_v47 = vld [vmem:[#allocation69_spill] sm:$0xff] }
 0x6e8   :  { %1924 = vmatprep.subr.bf16.mxu1 %v3810_v3  ;;  %v4844_v3 = vld [vmem:[#allocation71_spill] sm:$0xff] }
 0x6e9   :  { %1990 = vmatpush1.bf16.msra.mxu0 %v4786_v20  ;;  %v4860_v20 = vld [vmem:[#allocation55_spill] sm:$0xff] }
 0x6ea   :  { %1991 = vmatprep.subr.bf16.mxu0 %v4787_v57  ;;  %v4862_v57 = vld [vmem:[#allocation56_spill] sm:$0xff] }
 0x6eb   :  { %1925 = vmatpush2.bf16.msra.mxu1 %v3822_v42  ;;  %v4845_v42 = vld [vmem:[#allocation72_spill] sm:$0xff] }
 0x6ec   :  { %1926 = vmatprep.subr.bf16.mxu1 %v3828_v53  ;;  %v4846_v53 = vld [vmem:[#allocation73_spill] sm:$0xff] }
 0x6ed   :  { %1992 = vmatpush2.bf16.msra.mxu0 %v4789_v37  ;;  %v4864_v37 = vld [vmem:[#allocation57_spill] sm:$0xff] }
 0x6ee   :  { %1993 = vmatprep.subr.bf16.mxu0 %v4791_v49  ;;  %v4866_v49 = vld [vmem:[#allocation58_spill] sm:$0xff] }
 0x6ef   :  { %1927 = vmatpush2.bf16.msra.mxu1 %v3840_v41  ;;  %v4848_v41 = vld [vmem:[#allocation75_spill] sm:$0xff] }
 0x6f0   :  { %1928 = vmatprep.subr.bf16.mxu1 %v3846_v46  ;;  %v4849_v46 = vld [vmem:[#allocation76_spill] sm:$0xff] }
 0x6f1   :  { %1994 = vmatpush2.bf16.msra.mxu0 %v4793_v10  ;;  %v4868_v10 = vld [vmem:[#allocation59_spill] sm:$0xff] }
 0x6f2   :  { %1995 = vmatprep.subr.bf16.mxu0 %v4820_v14 }
 0x6f3   :  { %1929 = vmatpush2.bf16.msra.mxu1 %v4821_v13 }
 0x6f4   :  { %1930 = vmatprep.subr.bf16.mxu1 %v4822_v11 }
 0x6f5   :  { %1996 = vmatpush2.bf16.msra.mxu0 %v4823_v15 }
 0x6f6   :  { %1997 = vmatprep.subr.bf16.mxu0 %v4824_v16 }
 0x6f7   :  { %1931 = vmatpush2.bf16.msra.mxu1 %v4825_v22 }
 0x6f8   :  { %1932 = vmatprep.subr.bf16.mxu1 %v4826_v52 }
 0x6f9   :  { %1998 = vmatpush2.bf16.msra.mxu0 %v4827_v51 }
 0x6fa   :  { %1999 = vmatprep.subr.bf16.mxu0 %v4828_v58 }
 0x6fb   :  { %1933 = vmatpush2.bf16.msra.mxu1 %v4829_v61 }
 0x6fc   :  { %1934 = vmatprep.subr.bf16.mxu1 %v4830_v62 }
 0x6fd   :  { %2000 = vmatpush2.bf16.msra.mxu0 %v4831_v63  ;;  %v2414_v63 = vld [vmem:[%s4260_s0 + $0x1c] sm:$0xf] }
 0x6fe   :  { %2001 = vmatprep.subr.bf16.mxu0 %v4832_v55 }
 0x6ff   :  { %1935 = vmatpush2.bf16.msra.mxu1 %v4833_v59 }
 0x700   :  { %1936 = vmatprep.subr.bf16.mxu1 %v4834_v6 }
 0x701   :  { %2002 = vmatpush2.bf16.msra.mxu0 %v4835_v5 }
 0x702   :  { %2003 = vmatprep.subr.bf16.mxu0 %v4836_v7 }
 0x703   :  { %1937 = vmatpush2.bf16.msra.mxu1 %v4837_v8 }
 0x704   :  { %2016 = vmatprep.subr.bf16.mxu1 %v4838_v32 }
 0x705   :  { %2004 = vmatpush2.bf16.msra.mxu0 %v4839_v35 }
 0x706   :  { %1939 = vmatmul.mubr.bf16.vlgmr.msra.gmra.mxu1 %v1814_v38  ;;  %2005 = vmatprep.subr.bf16.mxu0 %v4840_v36 }
 0x707   :  { %2017 = vmatpush1.bf16.msra.mxu1 %v4841_v40 }
 0x708   :  { %2018 = vmatprep.subr.bf16.mxu1 %v4842_v50 }
 0x709   :  { %2006 = vmatpush2.bf16.msra.mxu0 %v4843_v47 }
 0x70b   :  { %2019 = vmatpush1.bf16.msra.mxu1 %v4844_v3 }
 0x70c   :  { %2020 = vmatprep.subr.bf16.mxu1 %v4845_v42 }
 0x70f   :  { %2021 = vmatpush1.bf16.msra.mxu1 %v4846_v53 }
 0x710   :  { %2022 = vmatprep.subr.bf16.mxu1 %v4847_v54 }
 0x713   :  { %2023 = vmatpush1.bf16.msra.mxu1 %v4848_v41 }
 0x714   :  { %2024 = vmatprep.subr.bf16.mxu1 %v4849_v46 }
 0x717   :  { %2025 = vmatpush1.bf16.msra.mxu1 %v4850_v48 }
 0x718   :  { %2026 = vmatprep.subr.bf16.mxu1 %v4851_v4 }
 0x71b   :  { %2027 = vmatpush1.bf16.msra.mxu1 %v4852_v56 }
 0x71c   :  { %2028 = vmatprep.subr.bf16.mxu1 %v4853_v30 }
 0x71f   :  { %2029 = vmatpush1.bf16.msra.mxu1 %v4854_v45 }
 0x720   :  { %2030 = vmatprep.subr.bf16.mxu1 %v4855_v29 }
 0x723   :  { %2031 = vmatpush1.bf16.msra.mxu1 %v4856_v33 }
 0x724   :  { %2032 = vmatprep.subr.bf16.mxu1 %v4857_v9 }
 0x727   :  { %2033 = vmatpush2.bf16.msra.mxu1 %v4858_v23 }
 0x728   :  { %2034 = vmatprep.subr.bf16.mxu1 %v4859_v17 }
 0x72b   :  { %2035 = vmatpush2.bf16.msra.mxu1 %v4860_v20 }
 0x72c   :  { %2036 = vmatprep.subr.bf16.mxu1 %v4861_v31 }
 0x72f   :  { %2037 = vmatpush2.bf16.msra.mxu1 %v4862_v57 }
 0x730   :  { %2038 = vmatprep.subr.bf16.mxu1 %v4863_v21 }
 0x733   :  { %2039 = vmatpush2.bf16.msra.mxu1 %v4864_v37 }
 0x734   :  { %2040 = vmatprep.subr.bf16.mxu1 %v4865_v27 }
 0x737   :  { %2041 = vmatpush2.bf16.msra.mxu1 %v4866_v49 }
 0x738   :  { %2042 = vmatprep.subr.bf16.mxu1 %v4867_v1 }
 0x73b   :  { %2043 = vmatpush2.bf16.msra.mxu1 %v4868_v10 }
 0x73c   :  { %2044 = vmatprep.subr.bf16.mxu1 %v4869_v25 }
 0x73f   :  { %2045 = vmatpush2.bf16.msra.mxu1 %v4870_v24 }
 0x740   :  { %2046 = vmatprep.subr.bf16.mxu1 %v4871_v18 }
 0x743   :  { %2047 = vmatpush2.bf16.msra.mxu1 %v4872_v2 }
 0x786   :  { %v1852_v39 = vpop.f32.mrf.mxu1 }
 0x788   :  { %v1854_v43 = vpop.f32.mrf.mxu1 }
 0x78a   :  { %v1856_v26 = vpop.f32.mrf.mxu1 }
 0x78c   :  { %v1857_v19 = vpop.f32.mrf.mxu1  ;;  %v1893_v44 = vpop.f32.mrf.mxu0 }
 0x78d   :  { %v1894_v0 = vadd.f32 %v1893_v44, %v1852_v39 }
 0x78e   :  { %v1895_v34 = vpop.f32.mrf.mxu0 }
 0x78f   :  { %v1900_v38 = vadd.f32 %v1894_v0, %v4682_v12  ;;  %v1896_v14 = vadd.f32 %v1895_v34, %v1854_v43 }
 0x790   :  { %v1897_v13 = vpop.f32.mrf.mxu0 }
 0x791   :  { %v1901_v11 = vadd.f32 %v1896_v14, %v4627_v60  ;;  %v1902_v15 = vmax.f32 %v1900_v38, 0.0 }
 0x792   :  { %v1898_v16 = vpop.f32.mrf.mxu0 }
 0x793   :  { %v1903_v22 = vmax.f32 %v1901_v11, 0.0  ;;  %v1973_v51 = vpack.c.bf16 %v1902_v15, %v1902_v15 }
 0x795   :  { %v1974_v52 = vpack.c.bf16 %v1903_v22, %v1903_v22 }
 0x797   :  { %2007 = vmatprep.mubr.bf16.mxu0 %v1974_v52 }
 0x798   :  { %2008 = vmatmul.mubr.bf16.vlgmr.msra.gmra.mxu0 %v1973_v51 }
 0x7c6   :  { %v1940_v58 = vpop.f32.mrf.mxu1 }
 0x7c8   :  { %v1942_v61 = vpop.f32.mrf.mxu1 }
 0x7c9   :  { %v1949_v62 = vcombine.low %v1940_v58, %v1942_v61 }
 0x7ca   :  { %v1944_v55 = vpop.f32.mrf.mxu1 }
 0x7cb   :  { %v1956_v59 = vrot.slane %v1949_v62, %v2922_v28 }
 0x7cc   :  { %v1945_v6 = vpop.f32.mrf.mxu1 }
 0x7cd   :  { %v1958_v5 = vadd.f32 %v2414_v63, %v1956_v59 }
 0x7cf   :  { %v1959_v7 = vmax.f32 %v1958_v5, 0.0 }
 0x7d1   :  { %v1967_v8 = vrot.slane %v1959_v7, %v2922_v28 }
 0x7d3   :  { %v1968_v32 = vcombine.high %v1967_v8, %v1967_v8  ;;  %v1971_v36 = vpack.c.bf16 %v1967_v8, %v1967_v8 }
 0x7d5   :  { %v1972_v35 = vpack.c.bf16 %v1968_v32, %v1968_v32 }
 0x7d7   :  { %2048 = vmatprep.mubr.bf16.mxu1 %v1972_v35 }
 0x7d8   :  { %2049 = vmatmul.mubr.bf16.vlgmr.msra.gmra.mxu1 %v1971_v36 }
 0x858   :  { %v2009_v40 = vpop.f32.mrf.mxu0 }
 0x85a   :  { %v2011_v50 = vpop.f32.mrf.mxu0 }
 0x85c   :  { %v2013_v47 = vpop.f32.mrf.mxu0 }
 0x85e   :  { %v2014_v3 = vpop.f32.mrf.mxu0 }
 0x898   :  { %v2050_v42 = vpop.f32.mrf.mxu1 }
 0x899   :  { %v2051_v53 = vadd.f32 %v2050_v42, %v2009_v40 }
 0x89a   :  { %v2052_v54 = vpop.f32.mrf.mxu1 }
 0x89b   :  { %v2057_v41 = vadd.f32 %v2051_v53, %v4682_v12  ;;  %v2053_v46 = vadd.f32 %v2052_v54, %v2011_v50 }
 0x89c   :  { %v2054_v48 = vpop.f32.mrf.mxu1 }
 0x89d   :  { %v2059_v4 = vmax.f32 %v2057_v41, 0.0  ;;  %v2058_v56 = vadd.f32 %v2053_v46, %v4627_v60 }
 0x89e   :  { %v2055_v28 = vpop.f32.mrf.mxu1 }
 0x89f   :  { %v2060_v30 = vmax.f32 %v2058_v56, 0.0 }
 0x8a0   :  { %2813 = dma.done.wait [#allocation5 + $0x2], 2048 }
 0x8a1   :  { %2814 = vsyncadd [#allocation5 + $0x2], 4294965248  ;;  %v2065_v45 = vpack.c.bf16 %v2060_v30, %v2060_v30  ;;  %v2749_v29 = vld [vmem:[#allocation4 + $0x78] sm:$0xff]   ;;  %v2751_v9 = vld [vmem:[#allocation4 + $0x70] sm:$0xff]   ;;  %v2064_v25 = vpack.c.bf16 %v2059_v4, %v2059_v4 }
 0x8a2   :  { %v2750_v33 = vld [vmem:[#allocation4 + $0x38] sm:$0xff]   ;;  %2436 = vmatprep.subr.bf16.mxu0 %v2749_v29  ;;  %v2752_v23 = vld [vmem:[#allocation4 + $0x30] sm:$0xff]   ;;  %v2753_v17 = vld [vmem:[#allocation4 + $0x68] sm:$0xff]  }
 0x8a3   :  { %2233 = vmatprep.mubr.bf16.mxu0 %v2065_v45  ;;  %2437 = vmatpush3.bf16.msra.mxu0 %v2750_v33  ;;  %v2754_v12 = vld [vmem:[#allocation4 + $0x28] sm:$0xff]   ;;  %v2755_v20 = vld [vmem:[#allocation4 + $0x60] sm:$0xff]   ;;  %v2757_v31 = vld [vmem:[#allocation4 + $0x58] sm:$0xff]  }
 0x8a4   :  { %2438 = vmatprep.subr.bf16.mxu0 %v2751_v9  ;;  %v2756_v60 = vld [vmem:[#allocation4 + $0x20] sm:$0xff]   ;;  %v2758_v57 = vld [vmem:[#allocation4 + $0x18] sm:$0xff]   ;;  %v2759_v21 = vld [vmem:[#allocation4 + $0x50] sm:$0xff]  }
 0x8a5   :  { %v2760_v37 = vld [vmem:[#allocation4 + $0x10] sm:$0xff]   ;;  %v2761_v27 = vld [vmem:[#allocation4 + $0x48] sm:$0xff]   ;;  %v2763_v1 = vld [vmem:[#allocation4 + $0x40] sm:$0xff]  }
 0x8a6   :  { %v2762_v49 = vld [vmem:[#allocation4 + $0x8] sm:$0xff]   ;;  %v2764_v10 = vld [vmem:[#allocation4] sm:$0xff]  }
 0x8a7   :  { %2439 = vmatpush3.bf16.msra.mxu0 %v2752_v23  ;;  %v2415_v18 = vld [vmem:[%s4264_s6] ss:$0 sm:$0xff] }
 0x8a8   :  { %2440 = vmatprep.subr.bf16.mxu0 %v2753_v17 }
 0x8ab   :  { %2441 = vmatpush3.bf16.msra.mxu0 %v2754_v12 }
 0x8ac   :  { %2442 = vmatprep.subr.bf16.mxu0 %v2755_v20 }
 0x8af   :  { %2443 = vmatpush3.bf16.msra.mxu0 %v2756_v60 }
 0x8b0   :  { %2444 = vmatprep.subr.bf16.mxu0 %v2757_v31 }
 0x8b3   :  { %2445 = vmatpush3.bf16.msra.mxu0 %v2758_v57 }
 0x8b4   :  { %2446 = vmatprep.subr.bf16.mxu0 %v2759_v21 }
 0x8b7   :  { %2447 = vmatpush3.bf16.msra.mxu0 %v2760_v37 }
 0x8b8   :  { %2448 = vmatprep.subr.bf16.mxu0 %v2761_v27 }
 0x8bb   :  { %2449 = vmatpush3.bf16.msra.mxu0 %v2762_v49 }
 0x8bc   :  { %2450 = vmatprep.subr.bf16.mxu0 %v2763_v1 }
 0x8bf   :  { %2451 = vmatpush3.bf16.msra.mxu0 %v2764_v10 }
 0x8c2   :  { %2234 = vmatmul.mubr.bf16.vlgmr.msra.gmra.mxu0 %v2064_v25 }
 0x982   :  { %v2452_v24 = vpop.f32.mrf.mxu0 }
 0x984   :  { %v2453_v2 = vpop.f32.mrf.mxu0 }
 0x985   :  { %v2454_v39 = vadd.f32 %v2453_v2, %v2452_v24 }
 0x986   :  { %v2455_v43 = vpop.f32.mrf.mxu0 }
 0x987   :  { %v2236_v26 = vadd.f32 %v2454_v39, %v2415_v18 }
 0x988   :  { %v2456_v19 = vpop.f32.mrf.mxu0 }
 0x989   :  { %v2432_v44 = vmul.f32 -1.442695, %v2236_v26 }
 0x98b   :  { %2765 = vpow2.f32 %v2432_v44 }
 0x998   :  { %v2766_v0 = vpop.eup %2765 }
 0x999   :  { %v2244_v34 = vadd.f32 1.0, %v2766_v0 }
 0x99b   :  { %2767 = vrcp.f32 %v2244_v34 }
 0x9a8   :  { %v2768_v38 = vpop.eup %2767 }
 0x9a9   :  { %2247 = vst [vmem:[%s4265_s7] sm:$0x3] %v2768_v38 }
 0x9aa   :  { %2252 = vsyncmov [#allocation5] }
 0x9ad   :  { %s2253_s29 = vpop.sfrf %2252 }
 0x9ae   :  { %p2433_p10 = scmp.ne.s32.totalorder %s2253_s29, 0 }
 0x9b0   :  { %2257 = shalt.err (%p2433_p10)  }
 0x9b1   :  { %2259 = vsyncmov [#allocation5 + $0x1] }
 0x9b4   :  { %s2260_s6 = vpop.sfrf %2259 }
 0x9b5   :  { %p2434_p11 = scmp.ne.s32.totalorder %s2260_s6, 0 }
 0x9b7   :  { %2264 = shalt.err (%p2434_p11)  }
 0x9b8   :  { %2266 = vsyncmov [#allocation5 + $0x2] }
 0x9bb   :  { %s2267_s30 = vpop.sfrf %2266 }
 0x9bc   :  { %p2435_p12 = scmp.ne.s32.totalorder %s2267_s30, 0 }
 0x9be   :  { %2271 = shalt.err (%p2435_p12)  }

</bundles_post_ra>
